<compile_context>
chip_gen: v6e
topology: v6e:2x2x1
jax: 0.10.0
libtpu: 0.0.40
codegen_flags: <defaults>
</compile_context>

<pallas_src>
import functools

import jax
import jax.numpy as jnp
import numpy as np
from jax.experimental import pallas as pl
from jax.experimental.pallas import tpu as pltpu

# ---- hyperparameters (stand-ins for the module's globals) ----
NCHANNEL = 4
WAVE_LENGTH = 16
HIDDEN_SIZE = 32
NUM_LSTM_LAYERS = 2
DROP_OUT = 0.0   # nn.LSTM dropout is train-mode only -> no-op in the eval forward pass
BATCH = 2

CW = NCHANNEL * WAVE_LENGTH        # 64 (MLP input size)
H4 = 4 * HIDDEN_SIZE               # 128 (LSTM gate width) -> exactly one lane group

# ------------------------------------------------------------------
# Weight-slab layout: (name, rows, cols).  Each segment starts on an
# 8-row boundary; every segment is <= 128 lanes wide.
# ------------------------------------------------------------------
_SEGS = [
    ("w1",    CW,        CW // 2),      # (64, 32)
    ("b1",    1,         CW // 2),
    ("w2",    CW // 2,   CW // 4),      # (32, 16)
    ("b2",    1,         CW // 4),
    ("w3",    CW // 4,   WAVE_LENGTH),  # (16, 16)
    ("b3",    1,         WAVE_LENGTH),
    ("wih0x", NCHANNEL,  H4),           # (4, 128)
    ("wih0e", 1,         H4),           # (1, 128)
    ("whh0",  HIDDEN_SIZE, H4),         # (32, 128)
    ("wl1",   2 * HIDDEN_SIZE, H4),     # (64, 128)  = vstack([wih1, whh1])
    ("wout",  HIDDEN_SIZE, 1),          # (32, 1)
]
SLAB_OFF = {}
_off = 0
for _name, _r, _c in _SEGS:
    SLAB_OFF[_name] = (_off, _r, _c)
    _off += -(-_r // 8) * 8            # round rows up to a multiple of 8
SLAB_ROWS = _off                        # 280 (multiple of 8)
SLAB_LANES = 128


def comnn_kernel(in_ref, w_ref, out_ref, px_ref, *, Bp):
    """in_ref:  (Bp + W*Bp, 128) packed inputs:
                  rows [0:Bp),      lanes [0:CW)       -> flattened x for the MLP
                  rows [Bp:Bp+W*Bp), lanes [0:NCHANNEL) -> time-major x (row t*Bp + b)
       w_ref:   (SLAB_ROWS, 128) packed weights, gate order (i,f,o,g), sigmoid-gate
                columns pre-scaled by 0.5.
       out_ref: (Bp, 1)
       px_ref:  (W*Bp, 4H) VMEM scratch holding the hoisted layer-0 input projection."""
    H = HIDDEN_SIZE
    W = WAVE_LENGTH
    f32 = jnp.float32

    def seg(name):
        off, r, c = SLAB_OFF[name]
        return w_ref[off:off + r, 0:c]

    # ---- magnifier1 MLP (independent of the recurrence) ----
    xf = in_ref[0:Bp, 0:CW]                                      # (Bp, 64)
    h = jnp.dot(xf, seg("w1"), preferred_element_type=f32) + seg("b1")
    h = jnp.maximum(h, 0.0)
    h = jnp.dot(h, seg("w2"), preferred_element_type=f32) + seg("b2")
    h = jnp.maximum(h, 0.0)
    extra = jnp.dot(h, seg("w3"), preferred_element_type=f32) + seg("b3")   # (Bp, W)

    # ---- hoisted layer-0 input projection: ONE matmul for all timesteps, staged
    # in VMEM scratch so the unrolled recurrence carries no large live values. ----
    xtm = in_ref[Bp:Bp + W * Bp, 0:NCHANNEL]                     # (W*Bp, C) time-major
    px_ref[...] = jnp.dot(xtm, seg("wih0x"), preferred_element_type=f32)

    # Weights kept resident across the unrolled loop (~13 vregs total).
    wih0e = seg("wih0e")                                         # (1, 4H)
    whh0 = seg("whh0")                                           # (H, 4H)
    wl1 = seg("wl1")                                             # (2H, 4H)

    # ---- 2-layer LSTM, bias=False, zero initial state ----
    # Gate order (i, f, o, g); sigmoid columns were pre-scaled by 0.5, so
    # sigmoid(x) == 0.5 * tanh(x_scaled) + 0.5 (single tanh over all 128 lanes).
    def cell(gates, c_prev):
        t_all = jnp.tanh(gates)                       # one EUP push over (Bp, 4H)
        sfo = t_all[:, :3 * H] * 0.5 + 0.5            # recover i, f, o sigmoids on VPU
        g = t_all[:, 3 * H:]
        i, f, o = sfo[:, :H], sfo[:, H:2 * H], sfo[:, 2 * H:]
        c_new = f * c_prev + i * g
        h_new = o * jnp.tanh(c_new)
        return h_new, c_new

    z = jnp.zeros((Bp, H), f32)
    h0, c0, h1, c1 = z, z, z, z
    for t in range(W):                 # small static seq length -> unrolled
        # Per-step off-chain work: load the staged projection slice and add the
        # magnifier "extra" channel contribution (neither depends on h0/c0).
        g0x = px_ref[t * Bp:(t + 1) * Bp, :] + extra[:, t:t + 1] * wih0e
        gates0 = g0x + jnp.dot(h0, whh0, preferred_element_type=f32)
        h0, c0 = cell(gates0, c0)
        # Fused layer-1 input + recurrent matmul: one (Bp,2H)@(2H,4H) dot; layer-1
        # is off the critical (layer-0) chain and hides in its latency gaps.
        gates1 = jnp.dot(jnp.concatenate([h0, h1], axis=1), wl1,
                         preferred_element_type=f32)
        h1, c1 = cell(gates1, c1)

    # ---- out1: Linear(H, 1, bias=False) on lstm_out[:, -1, :] ----
    out_ref[...] = jnp.dot(h1, seg("wout"), preferred_element_type=f32)


def pack_params(p):
    """Pack all weights into one (SLAB_ROWS, 128) f32 slab.

    LSTM gate columns are permuted from PyTorch order (i, f, g, o) to the kernel
    order (i, f, o, g), the sigmoid-gate columns (i, f, o) are pre-scaled by 0.5
    (tanh-only nonlinearity trick), and layer-1's W_ih^T / W_hh^T are stacked so
    the kernel can fuse them into one matmul."""
    H = HIDDEN_SIZE
    perm = np.concatenate([np.arange(0, H), np.arange(H, 2 * H),
                           np.arange(3 * H, 4 * H), np.arange(2 * H, 3 * H)])

    def gp(w):                      # permute gate columns + halve sigmoid columns
        w = np.asarray(w, np.float32)[:, perm].copy()
        w[:, :3 * H] *= 0.5         # exact (power-of-two scale)
        return w

    entries = {
        "w1": np.asarray(p["w1"]), "b1": np.asarray(p["b1"]),
        "w2": np.asarray(p["w2"]), "b2": np.asarray(p["b2"]),
        "w3": np.asarray(p["w3"]), "b3": np.asarray(p["b3"]),
        "wih0x": gp(p["wih0x"]), "wih0e": gp(p["wih0e"]),
        "whh0": gp(p["whh0"]),
        "wl1": np.concatenate([gp(p["wih1"]), gp(p["whh1"])], axis=0),
        "wout": np.asarray(p["wout"]),
    }
    slab = np.zeros((SLAB_ROWS, SLAB_LANES), np.float32)
    for name, (off, r, c) in SLAB_OFF.items():
        slab[off:off + r, :c] = entries[name]
    return jnp.asarray(slab)


@jax.jit
def comnn_forward(x, wslab):
    B = x.shape[0]
    Bp = max(8, -(-B // 8) * 8)       # pad batch to full sublanes
    xp = jnp.zeros((Bp, WAVE_LENGTH, NCHANNEL), jnp.float32).at[:B].set(x)
    xf = xp.reshape(Bp, WAVE_LENGTH * NCHANNEL)                    # (Bp, W*C)
    xtm = jnp.transpose(xp, (1, 0, 2)).reshape(Bp * WAVE_LENGTH, NCHANNEL)

    # Single lane-dense input slab: xf rows [0:Bp) lanes [0:CW), xtm rows below.
    inp = jnp.zeros((Bp + WAVE_LENGTH * Bp, SLAB_LANES), jnp.float32)
    inp = inp.at[:Bp, :CW].set(xf)
    inp = inp.at[Bp:, :NCHANNEL].set(xtm)

    vspec = pl.BlockSpec(memory_space=pltpu.MemorySpace.VMEM)
    out = pl.pallas_call(
        functools.partial(comnn_kernel, Bp=Bp),
        out_shape=jax.ShapeDtypeStruct((Bp, 1), jnp.float32),
        in_specs=[vspec, vspec],
        out_specs=vspec,
        scratch_shapes=[pltpu.VMEM((WAVE_LENGTH * Bp, H4), jnp.float32)],
    )(inp, wslab)
    return out[:B]


def init_params(key):
    """Deterministic synthetic params (PyTorch-like uniform init), stored (in, out),
    gate order i,f,g,o along the 4H axis (PyTorch convention)."""
    ks = jax.random.split(key, 12)

    def u(k, shape, fan_in):
        bound = 1.0 / np.sqrt(fan_in)
        return jax.random.uniform(k, shape, jnp.float32, -bound, bound)

    H = HIDDEN_SIZE
    wih0 = u(ks[6], (NCHANNEL + 1, 4 * H), H)   # layer-0 W_ih^T, input = NCHANNEL + 1
    return {
        # MLP(64, 16): Linear(64,32) ReLU Linear(32,16) ReLU Linear(16,16)
        "w1": u(ks[0], (CW, CW // 2), CW),            "b1": u(ks[1], (1, CW // 2), CW),
        "w2": u(ks[2], (CW // 2, CW // 4), CW // 2),  "b2": u(ks[3], (1, CW // 4), CW // 2),
        "w3": u(ks[4], (CW // 4, WAVE_LENGTH), CW // 4), "b3": u(ks[5], (1, WAVE_LENGTH), CW // 4),
        # LSTM (bias=False)
        "wih0x": wih0[:NCHANNEL, :],                  # (C, 4H)
        "wih0e": wih0[NCHANNEL:, :],                  # (1, 4H)
        "whh0": u(ks[7], (H, 4 * H), H),
        "wih1": u(ks[8], (H, 4 * H), H),
        "whh1": u(ks[9], (H, 4 * H), H),
        # out1: Linear(H, 1, bias=False)
        "wout": u(ks[10], (H, 1), H),
    }


def comnn_reference(x, p):
    """Pure-JAX reference replicating the PyTorch forward (eval mode, gate order i,f,g,o)."""
    B = x.shape[0]
    H = HIDDEN_SIZE
    xf = x.reshape(B, -1)
    h = jnp.maximum(xf @ p["w1"] + p["b1"], 0.0)
    h = jnp.maximum(h @ p["w2"] + p["b2"], 0.0)
    extra = h @ p["w3"] + p["b3"]                           # (B, W)
    xin = jnp.concatenate([x, extra[:, :, None]], axis=2)   # (B, W, C+1)
    wih0 = jnp.concatenate([p["wih0x"], p["wih0e"]], axis=0)

    def cell(xp_, hh, cc, whh):
        g = xp_ + hh @ whh
        i = jax.nn.sigmoid(g[:, :H]); f = jax.nn.sigmoid(g[:, H:2 * H])
        gg = jnp.tanh(g[:, 2 * H:3 * H]); o = jax.nn.sigmoid(g[:, 3 * H:])
        cc = f * cc + i * gg
        return o * jnp.tanh(cc), cc

    h0 = c0 = h1 = c1 = jnp.zeros((B, H), jnp.float32)
    for t in range(WAVE_LENGTH):
        h0, c0 = cell(xin[:, t, :] @ wih0, h0, c0, p["whh0"])
        h1, c1 = cell(h0 @ p["wih1"], h1, c1, p["whh1"])
    return h1 @ p["wout"]


if __name__ == "__main__":
    key = jax.random.PRNGKey(0)
    kx, kp = jax.random.split(key)
    x = jax.random.normal(kx, (BATCH, WAVE_LENGTH, NCHANNEL), jnp.float32)
    params = init_params(kp)
    wslab = pack_params(params)

    out = comnn_forward(x, wslab)
    out = jax.block_until_ready(out)

    ref = comnn_reference(x, params)
    assert out.shape == (BATCH, 1)
    np.testing.assert_allclose(np.asarray(out), np.asarray(ref), rtol=1e-4, atol=1e-4)
    print("KERNEL_OK")
</pallas_src>

<mosaic_0001>
module attributes {stable_mosaic.version = 11 : i64} {
  func.func @comnn_kernel(%arg0: memref<136x128xf32, #tpu.memory_space<vmem>>, %arg1: memref<280x128xf32, #tpu.memory_space<vmem>>, %arg2: memref<8x1xf32, #tpu.memory_space<vmem>>, %arg3: memref<128x128xf32, #tpu.memory_space<vmem>>) attributes {dimension_semantics = [], scalar_prefetch = 0 : i64, scratch_operands = 1 : i64, tpu.core_type = #tpu.core_type<tc>} {
    %c0 = arith.constant 0 : index
    %c0_0 = arith.constant 0 : index
    %0 = vector.load %arg0[%c0, %c0_0] : memref<136x128xf32, #tpu.memory_space<vmem>>, vector<8x64xf32>
    %c0_1 = arith.constant 0 : index
    %c0_2 = arith.constant 0 : index
    %1 = vector.load %arg1[%c0_1, %c0_2] : memref<280x128xf32, #tpu.memory_space<vmem>>, vector<64x32xf32>
    %cst = arith.constant dense<0.000000e+00> : vector<8x32xf32>
    %2 = tpu.matmul %0, %1, %cst {dimension_numbers = #tpu.dot_dimension_numbers<[1], [0], [0], [1], [0, 0, 1, 1], [], []>} : vector<8x64xf32>, vector<64x32xf32>, vector<8x32xf32> -> vector<8x32xf32>
    %c64 = arith.constant 64 : index
    %c0_3 = arith.constant 0 : index
    %3 = vector.load %arg1[%c64, %c0_3] : memref<280x128xf32, #tpu.memory_space<vmem>>, vector<1x32xf32>
    %4 = vector.broadcast %3 : vector<1x32xf32> to vector<8x32xf32>
    %5 = arith.addf %2, %4 : vector<8x32xf32>
    %cst_4 = arith.constant 0.000000e+00 : f32
    %6 = vector.broadcast %cst_4 : f32 to vector<8x32xf32>
    %7 = arith.maximumf %5, %6 : vector<8x32xf32>
    %c72 = arith.constant 72 : index
    %c0_5 = arith.constant 0 : index
    %8 = vector.load %arg1[%c72, %c0_5] : memref<280x128xf32, #tpu.memory_space<vmem>>, vector<32x16xf32>
    %cst_6 = arith.constant dense<0.000000e+00> : vector<8x16xf32>
    %9 = tpu.matmul %7, %8, %cst_6 {dimension_numbers = #tpu.dot_dimension_numbers<[1], [0], [0], [1], [0, 0, 1, 1], [], []>} : vector<8x32xf32>, vector<32x16xf32>, vector<8x16xf32> -> vector<8x16xf32>
    %c104 = arith.constant 104 : index
    %c0_7 = arith.constant 0 : index
    %10 = vector.load %arg1[%c104, %c0_7] : memref<280x128xf32, #tpu.memory_space<vmem>>, vector<1x16xf32>
    %11 = vector.broadcast %10 : vector<1x16xf32> to vector<8x16xf32>
    %12 = arith.addf %9, %11 : vector<8x16xf32>
    %cst_8 = arith.constant 0.000000e+00 : f32
    %13 = vector.broadcast %cst_8 : f32 to vector<8x16xf32>
    %14 = arith.maximumf %12, %13 : vector<8x16xf32>
    %c112 = arith.constant 112 : index
    %c0_9 = arith.constant 0 : index
    %15 = vector.load %arg1[%c112, %c0_9] : memref<280x128xf32, #tpu.memory_space<vmem>>, vector<16x16xf32>
    %cst_10 = arith.constant dense<0.000000e+00> : vector<8x16xf32>
    %16 = tpu.matmul %14, %15, %cst_10 {dimension_numbers = #tpu.dot_dimension_numbers<[1], [0], [0], [1], [0, 0, 1, 1], [], []>} : vector<8x16xf32>, vector<16x16xf32>, vector<8x16xf32> -> vector<8x16xf32>
    %c128 = arith.constant 128 : index
    %c0_11 = arith.constant 0 : index
    %17 = vector.load %arg1[%c128, %c0_11] : memref<280x128xf32, #tpu.memory_space<vmem>>, vector<1x16xf32>
    %18 = vector.broadcast %17 : vector<1x16xf32> to vector<8x16xf32>
    %19 = arith.addf %16, %18 : vector<8x16xf32>
    %c8 = arith.constant 8 : index
    %c0_12 = arith.constant 0 : index
    %20 = vector.load %arg0[%c8, %c0_12] : memref<136x128xf32, #tpu.memory_space<vmem>>, vector<128x4xf32>
    %c136 = arith.constant 136 : index
    %c0_13 = arith.constant 0 : index
    %21 = vector.load %arg1[%c136, %c0_13] : memref<280x128xf32, #tpu.memory_space<vmem>>, vector<4x128xf32>
    %cst_14 = arith.constant dense<0.000000e+00> : vector<128x128xf32>
    %22 = tpu.matmul %20, %21, %cst_14 {dimension_numbers = #tpu.dot_dimension_numbers<[1], [0], [0], [1], [0, 0, 1, 1], [], []>} : vector<128x4xf32>, vector<4x128xf32>, vector<128x128xf32> -> vector<128x128xf32>
    %c0_15 = arith.constant 0 : index
    %c0_16 = arith.constant 0 : index
    %23 = vector.load %arg3[%c0_15, %c0_16] : memref<128x128xf32, #tpu.memory_space<vmem>>, vector<128x128xf32>
    tpu.vector_store %arg3[%c0_15, %c0_16], %22 {strides = array<i32>} : memref<128x128xf32, #tpu.memory_space<vmem>>, vector<128x128xf32>,
    %c144 = arith.constant 144 : index
    %c0_17 = arith.constant 0 : index
    %24 = vector.load %arg1[%c144, %c0_17] : memref<280x128xf32, #tpu.memory_space<vmem>>, vector<1x128xf32>
    %c152 = arith.constant 152 : index
    %c0_18 = arith.constant 0 : index
    %25 = vector.load %arg1[%c152, %c0_18] : memref<280x128xf32, #tpu.memory_space<vmem>>, vector<32x128xf32>
    %c184 = arith.constant 184 : index
    %c0_19 = arith.constant 0 : index
    %26 = vector.load %arg1[%c184, %c0_19] : memref<280x128xf32, #tpu.memory_space<vmem>>, vector<64x128xf32>
    %cst_20 = arith.constant 0.000000e+00 : f32
    %27 = vector.broadcast %cst_20 : f32 to vector<8x32xf32>
    %c0_21 = arith.constant 0 : index
    %c0_22 = arith.constant 0 : index
    %28 = vector.load %arg3[%c0_21, %c0_22] : memref<128x128xf32, #tpu.memory_space<vmem>>, vector<8x128xf32>
    %29 = vector.extract_strided_slice %19 {offsets = [0, 0], sizes = [8, 1], strides = [1, 1]} : vector<8x16xf32> to vector<8x1xf32>
    %30 = vector.broadcast %29 : vector<8x1xf32> to vector<8x128xf32>
    %31 = vector.broadcast %24 : vector<1x128xf32> to vector<8x128xf32>
    %32 = arith.mulf %30, %31 : vector<8x128xf32>
    %33 = arith.addf %28, %32 : vector<8x128xf32>
    %cst_23 = arith.constant dense<0.000000e+00> : vector<8x128xf32>
    %34 = tpu.matmul %27, %25, %cst_23 {dimension_numbers = #tpu.dot_dimension_numbers<[1], [0], [0], [1], [0, 0, 1, 1], [], []>} : vector<8x32xf32>, vector<32x128xf32>, vector<8x128xf32> -> vector<8x128xf32>
    %35 = arith.addf %33, %34 : vector<8x128xf32>
    %36 = math.tanh %35 : vector<8x128xf32>
    %37 = vector.extract_strided_slice %36 {offsets = [0, 0], sizes = [8, 96], strides = [1, 1]} : vector<8x128xf32> to vector<8x96xf32>
    %cst_24 = arith.constant 5.000000e-01 : f32
    %38 = vector.broadcast %cst_24 : f32 to vector<8x96xf32>
    %39 = arith.mulf %37, %38 : vector<8x96xf32>
    %cst_25 = arith.constant 5.000000e-01 : f32
    %40 = vector.broadcast %cst_25 : f32 to vector<8x96xf32>
    %41 = arith.addf %39, %40 : vector<8x96xf32>
    %42 = vector.extract_strided_slice %36 {offsets = [0, 96], sizes = [8, 32], strides = [1, 1]} : vector<8x128xf32> to vector<8x32xf32>
    %43 = vector.extract_strided_slice %41 {offsets = [0, 0], sizes = [8, 32], strides = [1, 1]} : vector<8x96xf32> to vector<8x32xf32>
    %44 = vector.extract_strided_slice %41 {offsets = [0, 32], sizes = [8, 32], strides = [1, 1]} : vector<8x96xf32> to vector<8x32xf32>
    %45 = vector.extract_strided_slice %41 {offsets = [0, 64], sizes = [8, 32], strides = [1, 1]} : vector<8x96xf32> to vector<8x32xf32>
    %46 = arith.mulf %44, %27 : vector<8x32xf32>
    %47 = arith.mulf %43, %42 : vector<8x32xf32>
    %48 = arith.addf %46, %47 : vector<8x32xf32>
    %49 = math.tanh %48 : vector<8x32xf32>
    %50 = arith.mulf %45, %49 : vector<8x32xf32>
    %51 = tpu.concatenate %50, %27 in 1 : vector<8x32xf32>, vector<8x32xf32> -> vector<8x64xf32>
    %cst_26 = arith.constant dense<0.000000e+00> : vector<8x128xf32>
    %52 = tpu.matmul %51, %26, %cst_26 {dimension_numbers = #tpu.dot_dimension_numbers<[1], [0], [0], [1], [0, 0, 1, 1], [], []>} : vector<8x64xf32>, vector<64x128xf32>, vector<8x128xf32> -> vector<8x128xf32>
    %53 = math.tanh %52 : vector<8x128xf32>
    %54 = vector.extract_strided_slice %53 {offsets = [0, 0], sizes = [8, 96], strides = [1, 1]} : vector<8x128xf32> to vector<8x96xf32>
    %cst_27 = arith.constant 5.000000e-01 : f32
    %55 = vector.broadcast %cst_27 : f32 to vector<8x96xf32>
    %56 = arith.mulf %54, %55 : vector<8x96xf32>
    %cst_28 = arith.constant 5.000000e-01 : f32
    %57 = vector.broadcast %cst_28 : f32 to vector<8x96xf32>
    %58 = arith.addf %56, %57 : vector<8x96xf32>
    %59 = vector.extract_strided_slice %53 {offsets = [0, 96], sizes = [8, 32], strides = [1, 1]} : vector<8x128xf32> to vector<8x32xf32>
    %60 = vector.extract_strided_slice %58 {offsets = [0, 0], sizes = [8, 32], strides = [1, 1]} : vector<8x96xf32> to vector<8x32xf32>
    %61 = vector.extract_strided_slice %58 {offsets = [0, 32], sizes = [8, 32], strides = [1, 1]} : vector<8x96xf32> to vector<8x32xf32>
    %62 = vector.extract_strided_slice %58 {offsets = [0, 64], sizes = [8, 32], strides = [1, 1]} : vector<8x96xf32> to vector<8x32xf32>
    %63 = arith.mulf %61, %27 : vector<8x32xf32>
    %64 = arith.mulf %60, %59 : vector<8x32xf32>
    %65 = arith.addf %63, %64 : vector<8x32xf32>
    %66 = math.tanh %65 : vector<8x32xf32>
    %67 = arith.mulf %62, %66 : vector<8x32xf32>
    %c8_29 = arith.constant 8 : index
    %c0_30 = arith.constant 0 : index
    %68 = vector.load %arg3[%c8_29, %c0_30] : memref<128x128xf32, #tpu.memory_space<vmem>>, vector<8x128xf32>
    %69 = vector.extract_strided_slice %19 {offsets = [0, 1], sizes = [8, 1], strides = [1, 1]} : vector<8x16xf32> to vector<8x1xf32>
    %70 = vector.broadcast %69 : vector<8x1xf32> to vector<8x128xf32>
    %71 = vector.broadcast %24 : vector<1x128xf32> to vector<8x128xf32>
    %72 = arith.mulf %70, %71 : vector<8x128xf32>
    %73 = arith.addf %68, %72 : vector<8x128xf32>
    %cst_31 = arith.constant dense<0.000000e+00> : vector<8x128xf32>
    %74 = tpu.matmul %50, %25, %cst_31 {dimension_numbers = #tpu.dot_dimension_numbers<[1], [0], [0], [1], [0, 0, 1, 1], [], []>} : vector<8x32xf32>, vector<32x128xf32>, vector<8x128xf32> -> vector<8x128xf32>
    %75 = arith.addf %73, %74 : vector<8x128xf32>
    %76 = math.tanh %75 : vector<8x128xf32>
    %77 = vector.extract_strided_slice %76 {offsets = [0, 0], sizes = [8, 96], strides = [1, 1]} : vector<8x128xf32> to vector<8x96xf32>
    %cst_32 = arith.constant 5.000000e-01 : f32
    %78 = vector.broadcast %cst_32 : f32 to vector<8x96xf32>
    %79 = arith.mulf %77, %78 : vector<8x96xf32>
    %cst_33 = arith.constant 5.000000e-01 : f32
    %80 = vector.broadcast %cst_33 : f32 to vector<8x96xf32>
    %81 = arith.addf %79, %80 : vector<8x96xf32>
    %82 = vector.extract_strided_slice %76 {offsets = [0, 96], sizes = [8, 32], strides = [1, 1]} : vector<8x128xf32> to vector<8x32xf32>
    %83 = vector.extract_strided_slice %81 {offsets = [0, 0], sizes = [8, 32], strides = [1, 1]} : vector<8x96xf32> to vector<8x32xf32>
    %84 = vector.extract_strided_slice %81 {offsets = [0, 32], sizes = [8, 32], strides = [1, 1]} : vector<8x96xf32> to vector<8x32xf32>
    %85 = vector.extract_strided_slice %81 {offsets = [0, 64], sizes = [8, 32], strides = [1, 1]} : vector<8x96xf32> to vector<8x32xf32>
    %86 = arith.mulf %84, %48 : vector<8x32xf32>
    %87 = arith.mulf %83, %82 : vector<8x32xf32>
    %88 = arith.addf %86, %87 : vector<8x32xf32>
    %89 = math.tanh %88 : vector<8x32xf32>
    %90 = arith.mulf %85, %89 : vector<8x32xf32>
    %91 = tpu.concatenate %90, %67 in 1 : vector<8x32xf32>, vector<8x32xf32> -> vector<8x64xf32>
    %cst_34 = arith.constant dense<0.000000e+00> : vector<8x128xf32>
    %92 = tpu.matmul %91, %26, %cst_34 {dimension_numbers = #tpu.dot_dimension_numbers<[1], [0], [0], [1], [0, 0, 1, 1], [], []>} : vector<8x64xf32>, vector<64x128xf32>, vector<8x128xf32> -> vector<8x128xf32>
    %93 = math.tanh %92 : vector<8x128xf32>
    %94 = vector.extract_strided_slice %93 {offsets = [0, 0], sizes = [8, 96], strides = [1, 1]} : vector<8x128xf32> to vector<8x96xf32>
    %cst_35 = arith.constant 5.000000e-01 : f32
    %95 = vector.broadcast %cst_35 : f32 to vector<8x96xf32>
    %96 = arith.mulf %94, %95 : vector<8x96xf32>
    %cst_36 = arith.constant 5.000000e-01 : f32
    %97 = vector.broadcast %cst_36 : f32 to vector<8x96xf32>
    %98 = arith.addf %96, %97 : vector<8x96xf32>
    %99 = vector.extract_strided_slice %93 {offsets = [0, 96], sizes = [8, 32], strides = [1, 1]} : vector<8x128xf32> to vector<8x32xf32>
    %100 = vector.extract_strided_slice %98 {offsets = [0, 0], sizes = [8, 32], strides = [1, 1]} : vector<8x96xf32> to vector<8x32xf32>
    %101 = vector.extract_strided_slice %98 {offsets = [0, 32], sizes = [8, 32], strides = [1, 1]} : vector<8x96xf32> to vector<8x32xf32>
    %102 = vector.extract_strided_slice %98 {offsets = [0, 64], sizes = [8, 32], strides = [1, 1]} : vector<8x96xf32> to vector<8x32xf32>
    %103 = arith.mulf %101, %65 : vector<8x32xf32>
    %104 = arith.mulf %100, %99 : vector<8x32xf32>
    %105 = arith.addf %103, %104 : vector<8x32xf32>
    %106 = math.tanh %105 : vector<8x32xf32>
    %107 = arith.mulf %102, %106 : vector<8x32xf32>
    %c16 = arith.constant 16 : index
    %c0_37 = arith.constant 0 : index
    %108 = vector.load %arg3[%c16, %c0_37] : memref<128x128xf32, #tpu.memory_space<vmem>>, vector<8x128xf32>
    %109 = vector.extract_strided_slice %19 {offsets = [0, 2], sizes = [8, 1], strides = [1, 1]} : vector<8x16xf32> to vector<8x1xf32>
    %110 = vector.broadcast %109 : vector<8x1xf32> to vector<8x128xf32>
    %111 = vector.broadcast %24 : vector<1x128xf32> to vector<8x128xf32>
    %112 = arith.mulf %110, %111 : vector<8x128xf32>
    %113 = arith.addf %108, %112 : vector<8x128xf32>
    %cst_38 = arith.constant dense<0.000000e+00> : vector<8x128xf32>
    %114 = tpu.matmul %90, %25, %cst_38 {dimension_numbers = #tpu.dot_dimension_numbers<[1], [0], [0], [1], [0, 0, 1, 1], [], []>} : vector<8x32xf32>, vector<32x128xf32>, vector<8x128xf32> -> vector<8x128xf32>
    %115 = arith.addf %113, %114 : vector<8x128xf32>
    %116 = math.tanh %115 : vector<8x128xf32>
    %117 = vector.extract_strided_slice %116 {offsets = [0, 0], sizes = [8, 96], strides = [1, 1]} : vector<8x128xf32> to vector<8x96xf32>
    %cst_39 = arith.constant 5.000000e-01 : f32
    %118 = vector.broadcast %cst_39 : f32 to vector<8x96xf32>
    %119 = arith.mulf %117, %118 : vector<8x96xf32>
    %cst_40 = arith.constant 5.000000e-01 : f32
    %120 = vector.broadcast %cst_40 : f32 to vector<8x96xf32>
    %121 = arith.addf %119, %120 : vector<8x96xf32>
    %122 = vector.extract_strided_slice %116 {offsets = [0, 96], sizes = [8, 32], strides = [1, 1]} : vector<8x128xf32> to vector<8x32xf32>
    %123 = vector.extract_strided_slice %121 {offsets = [0, 0], sizes = [8, 32], strides = [1, 1]} : vector<8x96xf32> to vector<8x32xf32>
    %124 = vector.extract_strided_slice %121 {offsets = [0, 32], sizes = [8, 32], strides = [1, 1]} : vector<8x96xf32> to vector<8x32xf32>
    %125 = vector.extract_strided_slice %121 {offsets = [0, 64], sizes = [8, 32], strides = [1, 1]} : vector<8x96xf32> to vector<8x32xf32>
    %126 = arith.mulf %124, %88 : vector<8x32xf32>
    %127 = arith.mulf %123, %122 : vector<8x32xf32>
    %128 = arith.addf %126, %127 : vector<8x32xf32>
    %129 = math.tanh %128 : vector<8x32xf32>
    %130 = arith.mulf %125, %129 : vector<8x32xf32>
    %131 = tpu.concatenate %130, %107 in 1 : vector<8x32xf32>, vector<8x32xf32> -> vector<8x64xf32>
    %cst_41 = arith.constant dense<0.000000e+00> : vector<8x128xf32>
    %132 = tpu.matmul %131, %26, %cst_41 {dimension_numbers = #tpu.dot_dimension_numbers<[1], [0], [0], [1], [0, 0, 1, 1], [], []>} : vector<8x64xf32>, vector<64x128xf32>, vector<8x128xf32> -> vector<8x128xf32>
    %133 = math.tanh %132 : vector<8x128xf32>
    %134 = vector.extract_strided_slice %133 {offsets = [0, 0], sizes = [8, 96], strides = [1, 1]} : vector<8x128xf32> to vector<8x96xf32>
    %cst_42 = arith.constant 5.000000e-01 : f32
    %135 = vector.broadcast %cst_42 : f32 to vector<8x96xf32>
    %136 = arith.mulf %134, %135 : vector<8x96xf32>
    %cst_43 = arith.constant 5.000000e-01 : f32
    %137 = vector.broadcast %cst_43 : f32 to vector<8x96xf32>
    %138 = arith.addf %136, %137 : vector<8x96xf32>
    %139 = vector.extract_strided_slice %133 {offsets = [0, 96], sizes = [8, 32], strides = [1, 1]} : vector<8x128xf32> to vector<8x32xf32>
    %140 = vector.extract_strided_slice %138 {offsets = [0, 0], sizes = [8, 32], strides = [1, 1]} : vector<8x96xf32> to vector<8x32xf32>
    %141 = vector.extract_strided_slice %138 {offsets = [0, 32], sizes = [8, 32], strides = [1, 1]} : vector<8x96xf32> to vector<8x32xf32>
    %142 = vector.extract_strided_slice %138 {offsets = [0, 64], sizes = [8, 32], strides = [1, 1]} : vector<8x96xf32> to vector<8x32xf32>
    %143 = arith.mulf %141, %105 : vector<8x32xf32>
    %144 = arith.mulf %140, %139 : vector<8x32xf32>
    %145 = arith.addf %143, %144 : vector<8x32xf32>
    %146 = math.tanh %145 : vector<8x32xf32>
    %147 = arith.mulf %142, %146 : vector<8x32xf32>
    %c24 = arith.constant 24 : index
    %c0_44 = arith.constant 0 : index
    %148 = vector.load %arg3[%c24, %c0_44] : memref<128x128xf32, #tpu.memory_space<vmem>>, vector<8x128xf32>
    %149 = vector.extract_strided_slice %19 {offsets = [0, 3], sizes = [8, 1], strides = [1, 1]} : vector<8x16xf32> to vector<8x1xf32>
    %150 = vector.broadcast %149 : vector<8x1xf32> to vector<8x128xf32>
    %151 = vector.broadcast %24 : vector<1x128xf32> to vector<8x128xf32>
    %152 = arith.mulf %150, %151 : vector<8x128xf32>
    %153 = arith.addf %148, %152 : vector<8x128xf32>
    %cst_45 = arith.constant dense<0.000000e+00> : vector<8x128xf32>
    %154 = tpu.matmul %130, %25, %cst_45 {dimension_numbers = #tpu.dot_dimension_numbers<[1], [0], [0], [1], [0, 0, 1, 1], [], []>} : vector<8x32xf32>, vector<32x128xf32>, vector<8x128xf32> -> vector<8x128xf32>
    %155 = arith.addf %153, %154 : vector<8x128xf32>
    %156 = math.tanh %155 : vector<8x128xf32>
    %157 = vector.extract_strided_slice %156 {offsets = [0, 0], sizes = [8, 96], strides = [1, 1]} : vector<8x128xf32> to vector<8x96xf32>
    %cst_46 = arith.constant 5.000000e-01 : f32
    %158 = vector.broadcast %cst_46 : f32 to vector<8x96xf32>
    %159 = arith.mulf %157, %158 : vector<8x96xf32>
    %cst_47 = arith.constant 5.000000e-01 : f32
    %160 = vector.broadcast %cst_47 : f32 to vector<8x96xf32>
    %161 = arith.addf %159, %160 : vector<8x96xf32>
    %162 = vector.extract_strided_slice %156 {offsets = [0, 96], sizes = [8, 32], strides = [1, 1]} : vector<8x128xf32> to vector<8x32xf32>
    %163 = vector.extract_strided_slice %161 {offsets = [0, 0], sizes = [8, 32], strides = [1, 1]} : vector<8x96xf32> to vector<8x32xf32>
    %164 = vector.extract_strided_slice %161 {offsets = [0, 32], sizes = [8, 32], strides = [1, 1]} : vector<8x96xf32> to vector<8x32xf32>
    %165 = vector.extract_strided_slice %161 {offsets = [0, 64], sizes = [8, 32], strides = [1, 1]} : vector<8x96xf32> to vector<8x32xf32>
    %166 = arith.mulf %164, %128 : vector<8x32xf32>
    %167 = arith.mulf %163, %162 : vector<8x32xf32>
    %168 = arith.addf %166, %167 : vector<8x32xf32>
    %169 = math.tanh %168 : vector<8x32xf32>
    %170 = arith.mulf %165, %169 : vector<8x32xf32>
    %171 = tpu.concatenate %170, %147 in 1 : vector<8x32xf32>, vector<8x32xf32> -> vector<8x64xf32>
    %cst_48 = arith.constant dense<0.000000e+00> : vector<8x128xf32>
    %172 = tpu.matmul %171, %26, %cst_48 {dimension_numbers = #tpu.dot_dimension_numbers<[1], [0], [0], [1], [0, 0, 1, 1], [], []>} : vector<8x64xf32>, vector<64x128xf32>, vector<8x128xf32> -> vector<8x128xf32>
    %173 = math.tanh %172 : vector<8x128xf32>
    %174 = vector.extract_strided_slice %173 {offsets = [0, 0], sizes = [8, 96], strides = [1, 1]} : vector<8x128xf32> to vector<8x96xf32>
    %cst_49 = arith.constant 5.000000e-01 : f32
    %175 = vector.broadcast %cst_49 : f32 to vector<8x96xf32>
    %176 = arith.mulf %174, %175 : vector<8x96xf32>
    %cst_50 = arith.constant 5.000000e-01 : f32
    %177 = vector.broadcast %cst_50 : f32 to vector<8x96xf32>
    %178 = arith.addf %176, %177 : vector<8x96xf32>
    %179 = vector.extract_strided_slice %173 {offsets = [0, 96], sizes = [8, 32], strides = [1, 1]} : vector<8x128xf32> to vector<8x32xf32>
    %180 = vector.extract_strided_slice %178 {offsets = [0, 0], sizes = [8, 32], strides = [1, 1]} : vector<8x96xf32> to vector<8x32xf32>
    %181 = vector.extract_strided_slice %178 {offsets = [0, 32], sizes = [8, 32], strides = [1, 1]} : vector<8x96xf32> to vector<8x32xf32>
    %182 = vector.extract_strided_slice %178 {offsets = [0, 64], sizes = [8, 32], strides = [1, 1]} : vector<8x96xf32> to vector<8x32xf32>
    %183 = arith.mulf %181, %145 : vector<8x32xf32>
    %184 = arith.mulf %180, %179 : vector<8x32xf32>
    %185 = arith.addf %183, %184 : vector<8x32xf32>
    %186 = math.tanh %185 : vector<8x32xf32>
    %187 = arith.mulf %182, %186 : vector<8x32xf32>
    %c32 = arith.constant 32 : index
    %c0_51 = arith.constant 0 : index
    %188 = vector.load %arg3[%c32, %c0_51] : memref<128x128xf32, #tpu.memory_space<vmem>>, vector<8x128xf32>
    %189 = vector.extract_strided_slice %19 {offsets = [0, 4], sizes = [8, 1], strides = [1, 1]} : vector<8x16xf32> to vector<8x1xf32>
    %190 = vector.broadcast %189 : vector<8x1xf32> to vector<8x128xf32>
    %191 = vector.broadcast %24 : vector<1x128xf32> to vector<8x128xf32>
    %192 = arith.mulf %190, %191 : vector<8x128xf32>
    %193 = arith.addf %188, %192 : vector<8x128xf32>
    %cst_52 = arith.constant dense<0.000000e+00> : vector<8x128xf32>
    %194 = tpu.matmul %170, %25, %cst_52 {dimension_numbers = #tpu.dot_dimension_numbers<[1], [0], [0], [1], [0, 0, 1, 1], [], []>} : vector<8x32xf32>, vector<32x128xf32>, vector<8x128xf32> -> vector<8x128xf32>
    %195 = arith.addf %193, %194 : vector<8x128xf32>
    %196 = math.tanh %195 : vector<8x128xf32>
    %197 = vector.extract_strided_slice %196 {offsets = [0, 0], sizes = [8, 96], strides = [1, 1]} : vector<8x128xf32> to vector<8x96xf32>
    %cst_53 = arith.constant 5.000000e-01 : f32
    %198 = vector.broadcast %cst_53 : f32 to vector<8x96xf32>
    %199 = arith.mulf %197, %198 : vector<8x96xf32>
    %cst_54 = arith.constant 5.000000e-01 : f32
    %200 = vector.broadcast %cst_54 : f32 to vector<8x96xf32>
    %201 = arith.addf %199, %200 : vector<8x96xf32>
    %202 = vector.extract_strided_slice %196 {offsets = [0, 96], sizes = [8, 32], strides = [1, 1]} : vector<8x128xf32> to vector<8x32xf32>
    %203 = vector.extract_strided_slice %201 {offsets = [0, 0], sizes = [8, 32], strides = [1, 1]} : vector<8x96xf32> to vector<8x32xf32>
    %204 = vector.extract_strided_slice %201 {offsets = [0, 32], sizes = [8, 32], strides = [1, 1]} : vector<8x96xf32> to vector<8x32xf32>
    %205 = vector.extract_strided_slice %201 {offsets = [0, 64], sizes = [8, 32], strides = [1, 1]} : vector<8x96xf32> to vector<8x32xf32>
    %206 = arith.mulf %204, %168 : vector<8x32xf32>
    %207 = arith.mulf %203, %202 : vector<8x32xf32>
    %208 = arith.addf %206, %207 : vector<8x32xf32>
    %209 = math.tanh %208 : vector<8x32xf32>
    %210 = arith.mulf %205, %209 : vector<8x32xf32>
    %211 = tpu.concatenate %210, %187 in 1 : vector<8x32xf32>, vector<8x32xf32> -> vector<8x64xf32>
    %cst_55 = arith.constant dense<0.000000e+00> : vector<8x128xf32>
    %212 = tpu.matmul %211, %26, %cst_55 {dimension_numbers = #tpu.dot_dimension_numbers<[1], [0], [0], [1], [0, 0, 1, 1], [], []>} : vector<8x64xf32>, vector<64x128xf32>, vector<8x128xf32> -> vector<8x128xf32>
    %213 = math.tanh %212 : vector<8x128xf32>
    %214 = vector.extract_strided_slice %213 {offsets = [0, 0], sizes = [8, 96], strides = [1, 1]} : vector<8x128xf32> to vector<8x96xf32>
    %cst_56 = arith.constant 5.000000e-01 : f32
    %215 = vector.broadcast %cst_56 : f32 to vector<8x96xf32>
    %216 = arith.mulf %214, %215 : vector<8x96xf32>
    %cst_57 = arith.constant 5.000000e-01 : f32
    %217 = vector.broadcast %cst_57 : f32 to vector<8x96xf32>
    %218 = arith.addf %216, %217 : vector<8x96xf32>
    %219 = vector.extract_strided_slice %213 {offsets = [0, 96], sizes = [8, 32], strides = [1, 1]} : vector<8x128xf32> to vector<8x32xf32>
    %220 = vector.extract_strided_slice %218 {offsets = [0, 0], sizes = [8, 32], strides = [1, 1]} : vector<8x96xf32> to vector<8x32xf32>
    %221 = vector.extract_strided_slice %218 {offsets = [0, 32], sizes = [8, 32], strides = [1, 1]} : vector<8x96xf32> to vector<8x32xf32>
    %222 = vector.extract_strided_slice %218 {offsets = [0, 64], sizes = [8, 32], strides = [1, 1]} : vector<8x96xf32> to vector<8x32xf32>
    %223 = arith.mulf %221, %185 : vector<8x32xf32>
    %224 = arith.mulf %220, %219 : vector<8x32xf32>
    %225 = arith.addf %223, %224 : vector<8x32xf32>
    %226 = math.tanh %225 : vector<8x32xf32>
    %227 = arith.mulf %222, %226 : vector<8x32xf32>
    %c40 = arith.constant 40 : index
    %c0_58 = arith.constant 0 : index
    %228 = vector.load %arg3[%c40, %c0_58] : memref<128x128xf32, #tpu.memory_space<vmem>>, vector<8x128xf32>
    %229 = vector.extract_strided_slice %19 {offsets = [0, 5], sizes = [8, 1], strides = [1, 1]} : vector<8x16xf32> to vector<8x1xf32>
    %230 = vector.broadcast %229 : vector<8x1xf32> to vector<8x128xf32>
    %231 = vector.broadcast %24 : vector<1x128xf32> to vector<8x128xf32>
    %232 = arith.mulf %230, %231 : vector<8x128xf32>
    %233 = arith.addf %228, %232 : vector<8x128xf32>
    %cst_59 = arith.constant dense<0.000000e+00> : vector<8x128xf32>
    %234 = tpu.matmul %210, %25, %cst_59 {dimension_numbers = #tpu.dot_dimension_numbers<[1], [0], [0], [1], [0, 0, 1, 1], [], []>} : vector<8x32xf32>, vector<32x128xf32>, vector<8x128xf32> -> vector<8x128xf32>
    %235 = arith.addf %233, %234 : vector<8x128xf32>
    %236 = math.tanh %235 : vector<8x128xf32>
    %237 = vector.extract_strided_slice %236 {offsets = [0, 0], sizes = [8, 96], strides = [1, 1]} : vector<8x128xf32> to vector<8x96xf32>
    %cst_60 = arith.constant 5.000000e-01 : f32
    %238 = vector.broadcast %cst_60 : f32 to vector<8x96xf32>
    %239 = arith.mulf %237, %238 : vector<8x96xf32>
    %cst_61 = arith.constant 5.000000e-01 : f32
    %240 = vector.broadcast %cst_61 : f32 to vector<8x96xf32>
    %241 = arith.addf %239, %240 : vector<8x96xf32>
    %242 = vector.extract_strided_slice %236 {offsets = [0, 96], sizes = [8, 32], strides = [1, 1]} : vector<8x128xf32> to vector<8x32xf32>
    %243 = vector.extract_strided_slice %241 {offsets = [0, 0], sizes = [8, 32], strides = [1, 1]} : vector<8x96xf32> to vector<8x32xf32>
    %244 = vector.extract_strided_slice %241 {offsets = [0, 32], sizes = [8, 32], strides = [1, 1]} : vector<8x96xf32> to vector<8x32xf32>
    %245 = vector.extract_strided_slice %241 {offsets = [0, 64], sizes = [8, 32], strides = [1, 1]} : vector<8x96xf32> to vector<8x32xf32>
    %246 = arith.mulf %244, %208 : vector<8x32xf32>
    %247 = arith.mulf %243, %242 : vector<8x32xf32>
    %248 = arith.addf %246, %247 : vector<8x32xf32>
    %249 = math.tanh %248 : vector<8x32xf32>
    %250 = arith.mulf %245, %249 : vector<8x32xf32>
    %251 = tpu.concatenate %250, %227 in 1 : vector<8x32xf32>, vector<8x32xf32> -> vector<8x64xf32>
    %cst_62 = arith.constant dense<0.000000e+00> : vector<8x128xf32>
    %252 = tpu.matmul %251, %26, %cst_62 {dimension_numbers = #tpu.dot_dimension_numbers<[1], [0], [0], [1], [0, 0, 1, 1], [], []>} : vector<8x64xf32>, vector<64x128xf32>, vector<8x128xf32> -> vector<8x128xf32>
    %253 = math.tanh %252 : vector<8x128xf32>
    %254 = vector.extract_strided_slice %253 {offsets = [0, 0], sizes = [8, 96], strides = [1, 1]} : vector<8x128xf32> to vector<8x96xf32>
    %cst_63 = arith.constant 5.000000e-01 : f32
    %255 = vector.broadcast %cst_63 : f32 to vector<8x96xf32>
    %256 = arith.mulf %254, %255 : vector<8x96xf32>
    %cst_64 = arith.constant 5.000000e-01 : f32
    %257 = vector.broadcast %cst_64 : f32 to vector<8x96xf32>
    %258 = arith.addf %256, %257 : vector<8x96xf32>
    %259 = vector.extract_strided_slice %253 {offsets = [0, 96], sizes = [8, 32], strides = [1, 1]} : vector<8x128xf32> to vector<8x32xf32>
    %260 = vector.extract_strided_slice %258 {offsets = [0, 0], sizes = [8, 32], strides = [1, 1]} : vector<8x96xf32> to vector<8x32xf32>
    %261 = vector.extract_strided_slice %258 {offsets = [0, 32], sizes = [8, 32], strides = [1, 1]} : vector<8x96xf32> to vector<8x32xf32>
    %262 = vector.extract_strided_slice %258 {offsets = [0, 64], sizes = [8, 32], strides = [1, 1]} : vector<8x96xf32> to vector<8x32xf32>
    %263 = arith.mulf %261, %225 : vector<8x32xf32>
    %264 = arith.mulf %260, %259 : vector<8x32xf32>
    %265 = arith.addf %263, %264 : vector<8x32xf32>
    %266 = math.tanh %265 : vector<8x32xf32>
    %267 = arith.mulf %262, %266 : vector<8x32xf32>
    %c48 = arith.constant 48 : index
    %c0_65 = arith.constant 0 : index
    %268 = vector.load %arg3[%c48, %c0_65] : memref<128x128xf32, #tpu.memory_space<vmem>>, vector<8x128xf32>
    %269 = vector.extract_strided_slice %19 {offsets = [0, 6], sizes = [8, 1], strides = [1, 1]} : vector<8x16xf32> to vector<8x1xf32>
    %270 = vector.broadcast %269 : vector<8x1xf32> to vector<8x128xf32>
    %271 = vector.broadcast %24 : vector<1x128xf32> to vector<8x128xf32>
    %272 = arith.mulf %270, %271 : vector<8x128xf32>
    %273 = arith.addf %268, %272 : vector<8x128xf32>
    %cst_66 = arith.constant dense<0.000000e+00> : vector<8x128xf32>
    %274 = tpu.matmul %250, %25, %cst_66 {dimension_numbers = #tpu.dot_dimension_numbers<[1], [0], [0], [1], [0, 0, 1, 1], [], []>} : vector<8x32xf32>, vector<32x128xf32>, vector<8x128xf32> -> vector<8x128xf32>
    %275 = arith.addf %273, %274 : vector<8x128xf32>
    %276 = math.tanh %275 : vector<8x128xf32>
    %277 = vector.extract_strided_slice %276 {offsets = [0, 0], sizes = [8, 96], strides = [1, 1]} : vector<8x128xf32> to vector<8x96xf32>
    %cst_67 = arith.constant 5.000000e-01 : f32
    %278 = vector.broadcast %cst_67 : f32 to vector<8x96xf32>
    %279 = arith.mulf %277, %278 : vector<8x96xf32>
    %cst_68 = arith.constant 5.000000e-01 : f32
    %280 = vector.broadcast %cst_68 : f32 to vector<8x96xf32>
    %281 = arith.addf %279, %280 : vector<8x96xf32>
    %282 = vector.extract_strided_slice %276 {offsets = [0, 96], sizes = [8, 32], strides = [1, 1]} : vector<8x128xf32> to vector<8x32xf32>
    %283 = vector.extract_strided_slice %281 {offsets = [0, 0], sizes = [8, 32], strides = [1, 1]} : vector<8x96xf32> to vector<8x32xf32>
    %284 = vector.extract_strided_slice %281 {offsets = [0, 32], sizes = [8, 32], strides = [1, 1]} : vector<8x96xf32> to vector<8x32xf32>
    %285 = vector.extract_strided_slice %281 {offsets = [0, 64], sizes = [8, 32], strides = [1, 1]} : vector<8x96xf32> to vector<8x32xf32>
    %286 = arith.mulf %284, %248 : vector<8x32xf32>
    %287 = arith.mulf %283, %282 : vector<8x32xf32>
    %288 = arith.addf %286, %287 : vector<8x32xf32>
    %289 = math.tanh %288 : vector<8x32xf32>
    %290 = arith.mulf %285, %289 : vector<8x32xf32>
    %291 = tpu.concatenate %290, %267 in 1 : vector<8x32xf32>, vector<8x32xf32> -> vector<8x64xf32>
    %cst_69 = arith.constant dense<0.000000e+00> : vector<8x128xf32>
    %292 = tpu.matmul %291, %26, %cst_69 {dimension_numbers = #tpu.dot_dimension_numbers<[1], [0], [0], [1], [0, 0, 1, 1], [], []>} : vector<8x64xf32>, vector<64x128xf32>, vector<8x128xf32> -> vector<8x128xf32>
    %293 = math.tanh %292 : vector<8x128xf32>
    %294 = vector.extract_strided_slice %293 {offsets = [0, 0], sizes = [8, 96], strides = [1, 1]} : vector<8x128xf32> to vector<8x96xf32>
    %cst_70 = arith.constant 5.000000e-01 : f32
    %295 = vector.broadcast %cst_70 : f32 to vector<8x96xf32>
    %296 = arith.mulf %294, %295 : vector<8x96xf32>
    %cst_71 = arith.constant 5.000000e-01 : f32
    %297 = vector.broadcast %cst_71 : f32 to vector<8x96xf32>
    %298 = arith.addf %296, %297 : vector<8x96xf32>
    %299 = vector.extract_strided_slice %293 {offsets = [0, 96], sizes = [8, 32], strides = [1, 1]} : vector<8x128xf32> to vector<8x32xf32>
    %300 = vector.extract_strided_slice %298 {offsets = [0, 0], sizes = [8, 32], strides = [1, 1]} : vector<8x96xf32> to vector<8x32xf32>
    %301 = vector.extract_strided_slice %298 {offsets = [0, 32], sizes = [8, 32], strides = [1, 1]} : vector<8x96xf32> to vector<8x32xf32>
    %302 = vector.extract_strided_slice %298 {offsets = [0, 64], sizes = [8, 32], strides = [1, 1]} : vector<8x96xf32> to vector<8x32xf32>
    %303 = arith.mulf %301, %265 : vector<8x32xf32>
    %304 = arith.mulf %300, %299 : vector<8x32xf32>
    %305 = arith.addf %303, %304 : vector<8x32xf32>
    %306 = math.tanh %305 : vector<8x32xf32>
    %307 = arith.mulf %302, %306 : vector<8x32xf32>
    %c56 = arith.constant 56 : index
    %c0_72 = arith.constant 0 : index
    %308 = vector.load %arg3[%c56, %c0_72] : memref<128x128xf32, #tpu.memory_space<vmem>>, vector<8x128xf32>
    %309 = vector.extract_strided_slice %19 {offsets = [0, 7], sizes = [8, 1], strides = [1, 1]} : vector<8x16xf32> to vector<8x1xf32>
    %310 = vector.broadcast %309 : vector<8x1xf32> to vector<8x128xf32>
    %311 = vector.broadcast %24 : vector<1x128xf32> to vector<8x128xf32>
    %312 = arith.mulf %310, %311 : vector<8x128xf32>
    %313 = arith.addf %308, %312 : vector<8x128xf32>
    %cst_73 = arith.constant dense<0.000000e+00> : vector<8x128xf32>
    %314 = tpu.matmul %290, %25, %cst_73 {dimension_numbers = #tpu.dot_dimension_numbers<[1], [0], [0], [1], [0, 0, 1, 1], [], []>} : vector<8x32xf32>, vector<32x128xf32>, vector<8x128xf32> -> vector<8x128xf32>
    %315 = arith.addf %313, %314 : vector<8x128xf32>
    %316 = math.tanh %315 : vector<8x128xf32>
    %317 = vector.extract_strided_slice %316 {offsets = [0, 0], sizes = [8, 96], strides = [1, 1]} : vector<8x128xf32> to vector<8x96xf32>
    %cst_74 = arith.constant 5.000000e-01 : f32
    %318 = vector.broadcast %cst_74 : f32 to vector<8x96xf32>
    %319 = arith.mulf %317, %318 : vector<8x96xf32>
    %cst_75 = arith.constant 5.000000e-01 : f32
    %320 = vector.broadcast %cst_75 : f32 to vector<8x96xf32>
    %321 = arith.addf %319, %320 : vector<8x96xf32>
    %322 = vector.extract_strided_slice %316 {offsets = [0, 96], sizes = [8, 32], strides = [1, 1]} : vector<8x128xf32> to vector<8x32xf32>
    %323 = vector.extract_strided_slice %321 {offsets = [0, 0], sizes = [8, 32], strides = [1, 1]} : vector<8x96xf32> to vector<8x32xf32>
    %324 = vector.extract_strided_slice %321 {offsets = [0, 32], sizes = [8, 32], strides = [1, 1]} : vector<8x96xf32> to vector<8x32xf32>
    %325 = vector.extract_strided_slice %321 {offsets = [0, 64], sizes = [8, 32], strides = [1, 1]} : vector<8x96xf32> to vector<8x32xf32>
    %326 = arith.mulf %324, %288 : vector<8x32xf32>
    %327 = arith.mulf %323, %322 : vector<8x32xf32>
    %328 = arith.addf %326, %327 : vector<8x32xf32>
    %329 = math.tanh %328 : vector<8x32xf32>
    %330 = arith.mulf %325, %329 : vector<8x32xf32>
    %331 = tpu.concatenate %330, %307 in 1 : vector<8x32xf32>, vector<8x32xf32> -> vector<8x64xf32>
    %cst_76 = arith.constant dense<0.000000e+00> : vector<8x128xf32>
    %332 = tpu.matmul %331, %26, %cst_76 {dimension_numbers = #tpu.dot_dimension_numbers<[1], [0], [0], [1], [0, 0, 1, 1], [], []>} : vector<8x64xf32>, vector<64x128xf32>, vector<8x128xf32> -> vector<8x128xf32>
    %333 = math.tanh %332 : vector<8x128xf32>
    %334 = vector.extract_strided_slice %333 {offsets = [0, 0], sizes = [8, 96], strides = [1, 1]} : vector<8x128xf32> to vector<8x96xf32>
    %cst_77 = arith.constant 5.000000e-01 : f32
    %335 = vector.broadcast %cst_77 : f32 to vector<8x96xf32>
    %336 = arith.mulf %334, %335 : vector<8x96xf32>
    %cst_78 = arith.constant 5.000000e-01 : f32
    %337 = vector.broadcast %cst_78 : f32 to vector<8x96xf32>
    %338 = arith.addf %336, %337 : vector<8x96xf32>
    %339 = vector.extract_strided_slice %333 {offsets = [0, 96], sizes = [8, 32], strides = [1, 1]} : vector<8x128xf32> to vector<8x32xf32>
    %340 = vector.extract_strided_slice %338 {offsets = [0, 0], sizes = [8, 32], strides = [1, 1]} : vector<8x96xf32> to vector<8x32xf32>
    %341 = vector.extract_strided_slice %338 {offsets = [0, 32], sizes = [8, 32], strides = [1, 1]} : vector<8x96xf32> to vector<8x32xf32>
    %342 = vector.extract_strided_slice %338 {offsets = [0, 64], sizes = [8, 32], strides = [1, 1]} : vector<8x96xf32> to vector<8x32xf32>
    %343 = arith.mulf %341, %305 : vector<8x32xf32>
    %344 = arith.mulf %340, %339 : vector<8x32xf32>
    %345 = arith.addf %343, %344 : vector<8x32xf32>
    %346 = math.tanh %345 : vector<8x32xf32>
    %347 = arith.mulf %342, %346 : vector<8x32xf32>
    %c64_79 = arith.constant 64 : index
    %c0_80 = arith.constant 0 : index
    %348 = vector.load %arg3[%c64_79, %c0_80] : memref<128x128xf32, #tpu.memory_space<vmem>>, vector<8x128xf32>
    %349 = vector.extract_strided_slice %19 {offsets = [0, 8], sizes = [8, 1], strides = [1, 1]} : vector<8x16xf32> to vector<8x1xf32>
    %350 = vector.broadcast %349 : vector<8x1xf32> to vector<8x128xf32>
    %351 = vector.broadcast %24 : vector<1x128xf32> to vector<8x128xf32>
    %352 = arith.mulf %350, %351 : vector<8x128xf32>
    %353 = arith.addf %348, %352 : vector<8x128xf32>
    %cst_81 = arith.constant dense<0.000000e+00> : vector<8x128xf32>
    %354 = tpu.matmul %330, %25, %cst_81 {dimension_numbers = #tpu.dot_dimension_numbers<[1], [0], [0], [1], [0, 0, 1, 1], [], []>} : vector<8x32xf32>, vector<32x128xf32>, vector<8x128xf32> -> vector<8x128xf32>
    %355 = arith.addf %353, %354 : vector<8x128xf32>
    %356 = math.tanh %355 : vector<8x128xf32>
    %357 = vector.extract_strided_slice %356 {offsets = [0, 0], sizes = [8, 96], strides = [1, 1]} : vector<8x128xf32> to vector<8x96xf32>
    %cst_82 = arith.constant 5.000000e-01 : f32
    %358 = vector.broadcast %cst_82 : f32 to vector<8x96xf32>
    %359 = arith.mulf %357, %358 : vector<8x96xf32>
    %cst_83 = arith.constant 5.000000e-01 : f32
    %360 = vector.broadcast %cst_83 : f32 to vector<8x96xf32>
    %361 = arith.addf %359, %360 : vector<8x96xf32>
    %362 = vector.extract_strided_slice %356 {offsets = [0, 96], sizes = [8, 32], strides = [1, 1]} : vector<8x128xf32> to vector<8x32xf32>
    %363 = vector.extract_strided_slice %361 {offsets = [0, 0], sizes = [8, 32], strides = [1, 1]} : vector<8x96xf32> to vector<8x32xf32>
    %364 = vector.extract_strided_slice %361 {offsets = [0, 32], sizes = [8, 32], strides = [1, 1]} : vector<8x96xf32> to vector<8x32xf32>
    %365 = vector.extract_strided_slice %361 {offsets = [0, 64], sizes = [8, 32], strides = [1, 1]} : vector<8x96xf32> to vector<8x32xf32>
    %366 = arith.mulf %364, %328 : vector<8x32xf32>
    %367 = arith.mulf %363, %362 : vector<8x32xf32>
    %368 = arith.addf %366, %367 : vector<8x32xf32>
    %369 = math.tanh %368 : vector<8x32xf32>
    %370 = arith.mulf %365, %369 : vector<8x32xf32>
    %371 = tpu.concatenate %370, %347 in 1 : vector<8x32xf32>, vector<8x32xf32> -> vector<8x64xf32>
    %cst_84 = arith.constant dense<0.000000e+00> : vector<8x128xf32>
    %372 = tpu.matmul %371, %26, %cst_84 {dimension_numbers = #tpu.dot_dimension_numbers<[1], [0], [0], [1], [0, 0, 1, 1], [], []>} : vector<8x64xf32>, vector<64x128xf32>, vector<8x128xf32> -> vector<8x128xf32>
    %373 = math.tanh %372 : vector<8x128xf32>
    %374 = vector.extract_strided_slice %373 {offsets = [0, 0], sizes = [8, 96], strides = [1, 1]} : vector<8x128xf32> to vector<8x96xf32>
    %cst_85 = arith.constant 5.000000e-01 : f32
    %375 = vector.broadcast %cst_85 : f32 to vector<8x96xf32>
    %376 = arith.mulf %374, %375 : vector<8x96xf32>
    %cst_86 = arith.constant 5.000000e-01 : f32
    %377 = vector.broadcast %cst_86 : f32 to vector<8x96xf32>
    %378 = arith.addf %376, %377 : vector<8x96xf32>
    %379 = vector.extract_strided_slice %373 {offsets = [0, 96], sizes = [8, 32], strides = [1, 1]} : vector<8x128xf32> to vector<8x32xf32>
    %380 = vector.extract_strided_slice %378 {offsets = [0, 0], sizes = [8, 32], strides = [1, 1]} : vector<8x96xf32> to vector<8x32xf32>
    %381 = vector.extract_strided_slice %378 {offsets = [0, 32], sizes = [8, 32], strides = [1, 1]} : vector<8x96xf32> to vector<8x32xf32>
    %382 = vector.extract_strided_slice %378 {offsets = [0, 64], sizes = [8, 32], strides = [1, 1]} : vector<8x96xf32> to vector<8x32xf32>
    %383 = arith.mulf %381, %345 : vector<8x32xf32>
    %384 = arith.mulf %380, %379 : vector<8x32xf32>
    %385 = arith.addf %383, %384 : vector<8x32xf32>
    %386 = math.tanh %385 : vector<8x32xf32>
    %387 = arith.mulf %382, %386 : vector<8x32xf32>
    %c72_87 = arith.constant 72 : index
    %c0_88 = arith.constant 0 : index
    %388 = vector.load %arg3[%c72_87, %c0_88] : memref<128x128xf32, #tpu.memory_space<vmem>>, vector<8x128xf32>
    %389 = vector.extract_strided_slice %19 {offsets = [0, 9], sizes = [8, 1], strides = [1, 1]} : vector<8x16xf32> to vector<8x1xf32>
    %390 = vector.broadcast %389 : vector<8x1xf32> to vector<8x128xf32>
    %391 = vector.broadcast %24 : vector<1x128xf32> to vector<8x128xf32>
    %392 = arith.mulf %390, %391 : vector<8x128xf32>
    %393 = arith.addf %388, %392 : vector<8x128xf32>
    %cst_89 = arith.constant dense<0.000000e+00> : vector<8x128xf32>
    %394 = tpu.matmul %370, %25, %cst_89 {dimension_numbers = #tpu.dot_dimension_numbers<[1], [0], [0], [1], [0, 0, 1, 1], [], []>} : vector<8x32xf32>, vector<32x128xf32>, vector<8x128xf32> -> vector<8x128xf32>
    %395 = arith.addf %393, %394 : vector<8x128xf32>
    %396 = math.tanh %395 : vector<8x128xf32>
    %397 = vector.extract_strided_slice %396 {offsets = [0, 0], sizes = [8, 96], strides = [1, 1]} : vector<8x128xf32> to vector<8x96xf32>
    %cst_90 = arith.constant 5.000000e-01 : f32
    %398 = vector.broadcast %cst_90 : f32 to vector<8x96xf32>
    %399 = arith.mulf %397, %398 : vector<8x96xf32>
    %cst_91 = arith.constant 5.000000e-01 : f32
    %400 = vector.broadcast %cst_91 : f32 to vector<8x96xf32>
    %401 = arith.addf %399, %400 : vector<8x96xf32>
    %402 = vector.extract_strided_slice %396 {offsets = [0, 96], sizes = [8, 32], strides = [1, 1]} : vector<8x128xf32> to vector<8x32xf32>
    %403 = vector.extract_strided_slice %401 {offsets = [0, 0], sizes = [8, 32], strides = [1, 1]} : vector<8x96xf32> to vector<8x32xf32>
    %404 = vector.extract_strided_slice %401 {offsets = [0, 32], sizes = [8, 32], strides = [1, 1]} : vector<8x96xf32> to vector<8x32xf32>
    %405 = vector.extract_strided_slice %401 {offsets = [0, 64], sizes = [8, 32], strides = [1, 1]} : vector<8x96xf32> to vector<8x32xf32>
    %406 = arith.mulf %404, %368 : vector<8x32xf32>
    %407 = arith.mulf %403, %402 : vector<8x32xf32>
    %408 = arith.addf %406, %407 : vector<8x32xf32>
    %409 = math.tanh %408 : vector<8x32xf32>
    %410 = arith.mulf %405, %409 : vector<8x32xf32>
    %411 = tpu.concatenate %410, %387 in 1 : vector<8x32xf32>, vector<8x32xf32> -> vector<8x64xf32>
    %cst_92 = arith.constant dense<0.000000e+00> : vector<8x128xf32>
    %412 = tpu.matmul %411, %26, %cst_92 {dimension_numbers = #tpu.dot_dimension_numbers<[1], [0], [0], [1], [0, 0, 1, 1], [], []>} : vector<8x64xf32>, vector<64x128xf32>, vector<8x128xf32> -> vector<8x128xf32>
    %413 = math.tanh %412 : vector<8x128xf32>
    %414 = vector.extract_strided_slice %413 {offsets = [0, 0], sizes = [8, 96], strides = [1, 1]} : vector<8x128xf32> to vector<8x96xf32>
    %cst_93 = arith.constant 5.000000e-01 : f32
    %415 = vector.broadcast %cst_93 : f32 to vector<8x96xf32>
    %416 = arith.mulf %414, %415 : vector<8x96xf32>
    %cst_94 = arith.constant 5.000000e-01 : f32
    %417 = vector.broadcast %cst_94 : f32 to vector<8x96xf32>
    %418 = arith.addf %416, %417 : vector<8x96xf32>
    %419 = vector.extract_strided_slice %413 {offsets = [0, 96], sizes = [8, 32], strides = [1, 1]} : vector<8x128xf32> to vector<8x32xf32>
    %420 = vector.extract_strided_slice %418 {offsets = [0, 0], sizes = [8, 32], strides = [1, 1]} : vector<8x96xf32> to vector<8x32xf32>
    %421 = vector.extract_strided_slice %418 {offsets = [0, 32], sizes = [8, 32], strides = [1, 1]} : vector<8x96xf32> to vector<8x32xf32>
    %422 = vector.extract_strided_slice %418 {offsets = [0, 64], sizes = [8, 32], strides = [1, 1]} : vector<8x96xf32> to vector<8x32xf32>
    %423 = arith.mulf %421, %385 : vector<8x32xf32>
    %424 = arith.mulf %420, %419 : vector<8x32xf32>
    %425 = arith.addf %423, %424 : vector<8x32xf32>
    %426 = math.tanh %425 : vector<8x32xf32>
    %427 = arith.mulf %422, %426 : vector<8x32xf32>
    %c80 = arith.constant 80 : index
    %c0_95 = arith.constant 0 : index
    %428 = vector.load %arg3[%c80, %c0_95] : memref<128x128xf32, #tpu.memory_space<vmem>>, vector<8x128xf32>
    %429 = vector.extract_strided_slice %19 {offsets = [0, 10], sizes = [8, 1], strides = [1, 1]} : vector<8x16xf32> to vector<8x1xf32>
    %430 = vector.broadcast %429 : vector<8x1xf32> to vector<8x128xf32>
    %431 = vector.broadcast %24 : vector<1x128xf32> to vector<8x128xf32>
    %432 = arith.mulf %430, %431 : vector<8x128xf32>
    %433 = arith.addf %428, %432 : vector<8x128xf32>
    %cst_96 = arith.constant dense<0.000000e+00> : vector<8x128xf32>
    %434 = tpu.matmul %410, %25, %cst_96 {dimension_numbers = #tpu.dot_dimension_numbers<[1], [0], [0], [1], [0, 0, 1, 1], [], []>} : vector<8x32xf32>, vector<32x128xf32>, vector<8x128xf32> -> vector<8x128xf32>
    %435 = arith.addf %433, %434 : vector<8x128xf32>
    %436 = math.tanh %435 : vector<8x128xf32>
    %437 = vector.extract_strided_slice %436 {offsets = [0, 0], sizes = [8, 96], strides = [1, 1]} : vector<8x128xf32> to vector<8x96xf32>
    %cst_97 = arith.constant 5.000000e-01 : f32
    %438 = vector.broadcast %cst_97 : f32 to vector<8x96xf32>
    %439 = arith.mulf %437, %438 : vector<8x96xf32>
    %cst_98 = arith.constant 5.000000e-01 : f32
    %440 = vector.broadcast %cst_98 : f32 to vector<8x96xf32>
    %441 = arith.addf %439, %440 : vector<8x96xf32>
    %442 = vector.extract_strided_slice %436 {offsets = [0, 96], sizes = [8, 32], strides = [1, 1]} : vector<8x128xf32> to vector<8x32xf32>
    %443 = vector.extract_strided_slice %441 {offsets = [0, 0], sizes = [8, 32], strides = [1, 1]} : vector<8x96xf32> to vector<8x32xf32>
    %444 = vector.extract_strided_slice %441 {offsets = [0, 32], sizes = [8, 32], strides = [1, 1]} : vector<8x96xf32> to vector<8x32xf32>
    %445 = vector.extract_strided_slice %441 {offsets = [0, 64], sizes = [8, 32], strides = [1, 1]} : vector<8x96xf32> to vector<8x32xf32>
    %446 = arith.mulf %444, %408 : vector<8x32xf32>
    %447 = arith.mulf %443, %442 : vector<8x32xf32>
    %448 = arith.addf %446, %447 : vector<8x32xf32>
    %449 = math.tanh %448 : vector<8x32xf32>
    %450 = arith.mulf %445, %449 : vector<8x32xf32>
    %451 = tpu.concatenate %450, %427 in 1 : vector<8x32xf32>, vector<8x32xf32> -> vector<8x64xf32>
    %cst_99 = arith.constant dense<0.000000e+00> : vector<8x128xf32>
    %452 = tpu.matmul %451, %26, %cst_99 {dimension_numbers = #tpu.dot_dimension_numbers<[1], [0], [0], [1], [0, 0, 1, 1], [], []>} : vector<8x64xf32>, vector<64x128xf32>, vector<8x128xf32> -> vector<8x128xf32>
    %453 = math.tanh %452 : vector<8x128xf32>
    %454 = vector.extract_strided_slice %453 {offsets = [0, 0], sizes = [8, 96], strides = [1, 1]} : vector<8x128xf32> to vector<8x96xf32>
    %cst_100 = arith.constant 5.000000e-01 : f32
    %455 = vector.broadcast %cst_100 : f32 to vector<8x96xf32>
    %456 = arith.mulf %454, %455 : vector<8x96xf32>
    %cst_101 = arith.constant 5.000000e-01 : f32
    %457 = vector.broadcast %cst_101 : f32 to vector<8x96xf32>
    %458 = arith.addf %456, %457 : vector<8x96xf32>
    %459 = vector.extract_strided_slice %453 {offsets = [0, 96], sizes = [8, 32], strides = [1, 1]} : vector<8x128xf32> to vector<8x32xf32>
    %460 = vector.extract_strided_slice %458 {offsets = [0, 0], sizes = [8, 32], strides = [1, 1]} : vector<8x96xf32> to vector<8x32xf32>
    %461 = vector.extract_strided_slice %458 {offsets = [0, 32], sizes = [8, 32], strides = [1, 1]} : vector<8x96xf32> to vector<8x32xf32>
    %462 = vector.extract_strided_slice %458 {offsets = [0, 64], sizes = [8, 32], strides = [1, 1]} : vector<8x96xf32> to vector<8x32xf32>
    %463 = arith.mulf %461, %425 : vector<8x32xf32>
    %464 = arith.mulf %460, %459 : vector<8x32xf32>
    %465 = arith.addf %463, %464 : vector<8x32xf32>
    %466 = math.tanh %465 : vector<8x32xf32>
    %467 = arith.mulf %462, %466 : vector<8x32xf32>
    %c88 = arith.constant 88 : index
    %c0_102 = arith.constant 0 : index
    %468 = vector.load %arg3[%c88, %c0_102] : memref<128x128xf32, #tpu.memory_space<vmem>>, vector<8x128xf32>
    %469 = vector.extract_strided_slice %19 {offsets = [0, 11], sizes = [8, 1], strides = [1, 1]} : vector<8x16xf32> to vector<8x1xf32>
    %470 = vector.broadcast %469 : vector<8x1xf32> to vector<8x128xf32>
    %471 = vector.broadcast %24 : vector<1x128xf32> to vector<8x128xf32>
    %472 = arith.mulf %470, %471 : vector<8x128xf32>
    %473 = arith.addf %468, %472 : vector<8x128xf32>
    %cst_103 = arith.constant dense<0.000000e+00> : vector<8x128xf32>
    %474 = tpu.matmul %450, %25, %cst_103 {dimension_numbers = #tpu.dot_dimension_numbers<[1], [0], [0], [1], [0, 0, 1, 1], [], []>} : vector<8x32xf32>, vector<32x128xf32>, vector<8x128xf32> -> vector<8x128xf32>
    %475 = arith.addf %473, %474 : vector<8x128xf32>
    %476 = math.tanh %475 : vector<8x128xf32>
    %477 = vector.extract_strided_slice %476 {offsets = [0, 0], sizes = [8, 96], strides = [1, 1]} : vector<8x128xf32> to vector<8x96xf32>
    %cst_104 = arith.constant 5.000000e-01 : f32
    %478 = vector.broadcast %cst_104 : f32 to vector<8x96xf32>
    %479 = arith.mulf %477, %478 : vector<8x96xf32>
    %cst_105 = arith.constant 5.000000e-01 : f32
    %480 = vector.broadcast %cst_105 : f32 to vector<8x96xf32>
    %481 = arith.addf %479, %480 : vector<8x96xf32>
    %482 = vector.extract_strided_slice %476 {offsets = [0, 96], sizes = [8, 32], strides = [1, 1]} : vector<8x128xf32> to vector<8x32xf32>
    %483 = vector.extract_strided_slice %481 {offsets = [0, 0], sizes = [8, 32], strides = [1, 1]} : vector<8x96xf32> to vector<8x32xf32>
    %484 = vector.extract_strided_slice %481 {offsets = [0, 32], sizes = [8, 32], strides = [1, 1]} : vector<8x96xf32> to vector<8x32xf32>
    %485 = vector.extract_strided_slice %481 {offsets = [0, 64], sizes = [8, 32], strides = [1, 1]} : vector<8x96xf32> to vector<8x32xf32>
    %486 = arith.mulf %484, %448 : vector<8x32xf32>
    %487 = arith.mulf %483, %482 : vector<8x32xf32>
    %488 = arith.addf %486, %487 : vector<8x32xf32>
    %489 = math.tanh %488 : vector<8x32xf32>
    %490 = arith.mulf %485, %489 : vector<8x32xf32>
    %491 = tpu.concatenate %490, %467 in 1 : vector<8x32xf32>, vector<8x32xf32> -> vector<8x64xf32>
    %cst_106 = arith.constant dense<0.000000e+00> : vector<8x128xf32>
    %492 = tpu.matmul %491, %26, %cst_106 {dimension_numbers = #tpu.dot_dimension_numbers<[1], [0], [0], [1], [0, 0, 1, 1], [], []>} : vector<8x64xf32>, vector<64x128xf32>, vector<8x128xf32> -> vector<8x128xf32>
    %493 = math.tanh %492 : vector<8x128xf32>
    %494 = vector.extract_strided_slice %493 {offsets = [0, 0], sizes = [8, 96], strides = [1, 1]} : vector<8x128xf32> to vector<8x96xf32>
    %cst_107 = arith.constant 5.000000e-01 : f32
    %495 = vector.broadcast %cst_107 : f32 to vector<8x96xf32>
    %496 = arith.mulf %494, %495 : vector<8x96xf32>
    %cst_108 = arith.constant 5.000000e-01 : f32
    %497 = vector.broadcast %cst_108 : f32 to vector<8x96xf32>
    %498 = arith.addf %496, %497 : vector<8x96xf32>
    %499 = vector.extract_strided_slice %493 {offsets = [0, 96], sizes = [8, 32], strides = [1, 1]} : vector<8x128xf32> to vector<8x32xf32>
    %500 = vector.extract_strided_slice %498 {offsets = [0, 0], sizes = [8, 32], strides = [1, 1]} : vector<8x96xf32> to vector<8x32xf32>
    %501 = vector.extract_strided_slice %498 {offsets = [0, 32], sizes = [8, 32], strides = [1, 1]} : vector<8x96xf32> to vector<8x32xf32>
    %502 = vector.extract_strided_slice %498 {offsets = [0, 64], sizes = [8, 32], strides = [1, 1]} : vector<8x96xf32> to vector<8x32xf32>
    %503 = arith.mulf %501, %465 : vector<8x32xf32>
    %504 = arith.mulf %500, %499 : vector<8x32xf32>
    %505 = arith.addf %503, %504 : vector<8x32xf32>
    %506 = math.tanh %505 : vector<8x32xf32>
    %507 = arith.mulf %502, %506 : vector<8x32xf32>
    %c96 = arith.constant 96 : index
    %c0_109 = arith.constant 0 : index
    %508 = vector.load %arg3[%c96, %c0_109] : memref<128x128xf32, #tpu.memory_space<vmem>>, vector<8x128xf32>
    %509 = vector.extract_strided_slice %19 {offsets = [0, 12], sizes = [8, 1], strides = [1, 1]} : vector<8x16xf32> to vector<8x1xf32>
    %510 = vector.broadcast %509 : vector<8x1xf32> to vector<8x128xf32>
    %511 = vector.broadcast %24 : vector<1x128xf32> to vector<8x128xf32>
    %512 = arith.mulf %510, %511 : vector<8x128xf32>
    %513 = arith.addf %508, %512 : vector<8x128xf32>
    %cst_110 = arith.constant dense<0.000000e+00> : vector<8x128xf32>
    %514 = tpu.matmul %490, %25, %cst_110 {dimension_numbers = #tpu.dot_dimension_numbers<[1], [0], [0], [1], [0, 0, 1, 1], [], []>} : vector<8x32xf32>, vector<32x128xf32>, vector<8x128xf32> -> vector<8x128xf32>
    %515 = arith.addf %513, %514 : vector<8x128xf32>
    %516 = math.tanh %515 : vector<8x128xf32>
    %517 = vector.extract_strided_slice %516 {offsets = [0, 0], sizes = [8, 96], strides = [1, 1]} : vector<8x128xf32> to vector<8x96xf32>
    %cst_111 = arith.constant 5.000000e-01 : f32
    %518 = vector.broadcast %cst_111 : f32 to vector<8x96xf32>
    %519 = arith.mulf %517, %518 : vector<8x96xf32>
    %cst_112 = arith.constant 5.000000e-01 : f32
    %520 = vector.broadcast %cst_112 : f32 to vector<8x96xf32>
    %521 = arith.addf %519, %520 : vector<8x96xf32>
    %522 = vector.extract_strided_slice %516 {offsets = [0, 96], sizes = [8, 32], strides = [1, 1]} : vector<8x128xf32> to vector<8x32xf32>
    %523 = vector.extract_strided_slice %521 {offsets = [0, 0], sizes = [8, 32], strides = [1, 1]} : vector<8x96xf32> to vector<8x32xf32>
    %524 = vector.extract_strided_slice %521 {offsets = [0, 32], sizes = [8, 32], strides = [1, 1]} : vector<8x96xf32> to vector<8x32xf32>
    %525 = vector.extract_strided_slice %521 {offsets = [0, 64], sizes = [8, 32], strides = [1, 1]} : vector<8x96xf32> to vector<8x32xf32>
    %526 = arith.mulf %524, %488 : vector<8x32xf32>
    %527 = arith.mulf %523, %522 : vector<8x32xf32>
    %528 = arith.addf %526, %527 : vector<8x32xf32>
    %529 = math.tanh %528 : vector<8x32xf32>
    %530 = arith.mulf %525, %529 : vector<8x32xf32>
    %531 = tpu.concatenate %530, %507 in 1 : vector<8x32xf32>, vector<8x32xf32> -> vector<8x64xf32>
    %cst_113 = arith.constant dense<0.000000e+00> : vector<8x128xf32>
    %532 = tpu.matmul %531, %26, %cst_113 {dimension_numbers = #tpu.dot_dimension_numbers<[1], [0], [0], [1], [0, 0, 1, 1], [], []>} : vector<8x64xf32>, vector<64x128xf32>, vector<8x128xf32> -> vector<8x128xf32>
    %533 = math.tanh %532 : vector<8x128xf32>
    %534 = vector.extract_strided_slice %533 {offsets = [0, 0], sizes = [8, 96], strides = [1, 1]} : vector<8x128xf32> to vector<8x96xf32>
    %cst_114 = arith.constant 5.000000e-01 : f32
    %535 = vector.broadcast %cst_114 : f32 to vector<8x96xf32>
    %536 = arith.mulf %534, %535 : vector<8x96xf32>
    %cst_115 = arith.constant 5.000000e-01 : f32
    %537 = vector.broadcast %cst_115 : f32 to vector<8x96xf32>
    %538 = arith.addf %536, %537 : vector<8x96xf32>
    %539 = vector.extract_strided_slice %533 {offsets = [0, 96], sizes = [8, 32], strides = [1, 1]} : vector<8x128xf32> to vector<8x32xf32>
    %540 = vector.extract_strided_slice %538 {offsets = [0, 0], sizes = [8, 32], strides = [1, 1]} : vector<8x96xf32> to vector<8x32xf32>
    %541 = vector.extract_strided_slice %538 {offsets = [0, 32], sizes = [8, 32], strides = [1, 1]} : vector<8x96xf32> to vector<8x32xf32>
    %542 = vector.extract_strided_slice %538 {offsets = [0, 64], sizes = [8, 32], strides = [1, 1]} : vector<8x96xf32> to vector<8x32xf32>
    %543 = arith.mulf %541, %505 : vector<8x32xf32>
    %544 = arith.mulf %540, %539 : vector<8x32xf32>
    %545 = arith.addf %543, %544 : vector<8x32xf32>
    %546 = math.tanh %545 : vector<8x32xf32>
    %547 = arith.mulf %542, %546 : vector<8x32xf32>
    %c104_116 = arith.constant 104 : index
    %c0_117 = arith.constant 0 : index
    %548 = vector.load %arg3[%c104_116, %c0_117] : memref<128x128xf32, #tpu.memory_space<vmem>>, vector<8x128xf32>
    %549 = vector.extract_strided_slice %19 {offsets = [0, 13], sizes = [8, 1], strides = [1, 1]} : vector<8x16xf32> to vector<8x1xf32>
    %550 = vector.broadcast %549 : vector<8x1xf32> to vector<8x128xf32>
    %551 = vector.broadcast %24 : vector<1x128xf32> to vector<8x128xf32>
    %552 = arith.mulf %550, %551 : vector<8x128xf32>
    %553 = arith.addf %548, %552 : vector<8x128xf32>
    %cst_118 = arith.constant dense<0.000000e+00> : vector<8x128xf32>
    %554 = tpu.matmul %530, %25, %cst_118 {dimension_numbers = #tpu.dot_dimension_numbers<[1], [0], [0], [1], [0, 0, 1, 1], [], []>} : vector<8x32xf32>, vector<32x128xf32>, vector<8x128xf32> -> vector<8x128xf32>
    %555 = arith.addf %553, %554 : vector<8x128xf32>
    %556 = math.tanh %555 : vector<8x128xf32>
    %557 = vector.extract_strided_slice %556 {offsets = [0, 0], sizes = [8, 96], strides = [1, 1]} : vector<8x128xf32> to vector<8x96xf32>
    %cst_119 = arith.constant 5.000000e-01 : f32
    %558 = vector.broadcast %cst_119 : f32 to vector<8x96xf32>
    %559 = arith.mulf %557, %558 : vector<8x96xf32>
    %cst_120 = arith.constant 5.000000e-01 : f32
    %560 = vector.broadcast %cst_120 : f32 to vector<8x96xf32>
    %561 = arith.addf %559, %560 : vector<8x96xf32>
    %562 = vector.extract_strided_slice %556 {offsets = [0, 96], sizes = [8, 32], strides = [1, 1]} : vector<8x128xf32> to vector<8x32xf32>
    %563 = vector.extract_strided_slice %561 {offsets = [0, 0], sizes = [8, 32], strides = [1, 1]} : vector<8x96xf32> to vector<8x32xf32>
    %564 = vector.extract_strided_slice %561 {offsets = [0, 32], sizes = [8, 32], strides = [1, 1]} : vector<8x96xf32> to vector<8x32xf32>
    %565 = vector.extract_strided_slice %561 {offsets = [0, 64], sizes = [8, 32], strides = [1, 1]} : vector<8x96xf32> to vector<8x32xf32>
    %566 = arith.mulf %564, %528 : vector<8x32xf32>
    %567 = arith.mulf %563, %562 : vector<8x32xf32>
    %568 = arith.addf %566, %567 : vector<8x32xf32>
    %569 = math.tanh %568 : vector<8x32xf32>
    %570 = arith.mulf %565, %569 : vector<8x32xf32>
    %571 = tpu.concatenate %570, %547 in 1 : vector<8x32xf32>, vector<8x32xf32> -> vector<8x64xf32>
    %cst_121 = arith.constant dense<0.000000e+00> : vector<8x128xf32>
    %572 = tpu.matmul %571, %26, %cst_121 {dimension_numbers = #tpu.dot_dimension_numbers<[1], [0], [0], [1], [0, 0, 1, 1], [], []>} : vector<8x64xf32>, vector<64x128xf32>, vector<8x128xf32> -> vector<8x128xf32>
    %573 = math.tanh %572 : vector<8x128xf32>
    %574 = vector.extract_strided_slice %573 {offsets = [0, 0], sizes = [8, 96], strides = [1, 1]} : vector<8x128xf32> to vector<8x96xf32>
    %cst_122 = arith.constant 5.000000e-01 : f32
    %575 = vector.broadcast %cst_122 : f32 to vector<8x96xf32>
    %576 = arith.mulf %574, %575 : vector<8x96xf32>
    %cst_123 = arith.constant 5.000000e-01 : f32
    %577 = vector.broadcast %cst_123 : f32 to vector<8x96xf32>
    %578 = arith.addf %576, %577 : vector<8x96xf32>
    %579 = vector.extract_strided_slice %573 {offsets = [0, 96], sizes = [8, 32], strides = [1, 1]} : vector<8x128xf32> to vector<8x32xf32>
    %580 = vector.extract_strided_slice %578 {offsets = [0, 0], sizes = [8, 32], strides = [1, 1]} : vector<8x96xf32> to vector<8x32xf32>
    %581 = vector.extract_strided_slice %578 {offsets = [0, 32], sizes = [8, 32], strides = [1, 1]} : vector<8x96xf32> to vector<8x32xf32>
    %582 = vector.extract_strided_slice %578 {offsets = [0, 64], sizes = [8, 32], strides = [1, 1]} : vector<8x96xf32> to vector<8x32xf32>
    %583 = arith.mulf %581, %545 : vector<8x32xf32>
    %584 = arith.mulf %580, %579 : vector<8x32xf32>
    %585 = arith.addf %583, %584 : vector<8x32xf32>
    %586 = math.tanh %585 : vector<8x32xf32>
    %587 = arith.mulf %582, %586 : vector<8x32xf32>
    %c112_124 = arith.constant 112 : index
    %c0_125 = arith.constant 0 : index
    %588 = vector.load %arg3[%c112_124, %c0_125] : memref<128x128xf32, #tpu.memory_space<vmem>>, vector<8x128xf32>
    %589 = vector.extract_strided_slice %19 {offsets = [0, 14], sizes = [8, 1], strides = [1, 1]} : vector<8x16xf32> to vector<8x1xf32>
    %590 = vector.broadcast %589 : vector<8x1xf32> to vector<8x128xf32>
    %591 = vector.broadcast %24 : vector<1x128xf32> to vector<8x128xf32>
    %592 = arith.mulf %590, %591 : vector<8x128xf32>
    %593 = arith.addf %588, %592 : vector<8x128xf32>
    %cst_126 = arith.constant dense<0.000000e+00> : vector<8x128xf32>
    %594 = tpu.matmul %570, %25, %cst_126 {dimension_numbers = #tpu.dot_dimension_numbers<[1], [0], [0], [1], [0, 0, 1, 1], [], []>} : vector<8x32xf32>, vector<32x128xf32>, vector<8x128xf32> -> vector<8x128xf32>
    %595 = arith.addf %593, %594 : vector<8x128xf32>
    %596 = math.tanh %595 : vector<8x128xf32>
    %597 = vector.extract_strided_slice %596 {offsets = [0, 0], sizes = [8, 96], strides = [1, 1]} : vector<8x128xf32> to vector<8x96xf32>
    %cst_127 = arith.constant 5.000000e-01 : f32
    %598 = vector.broadcast %cst_127 : f32 to vector<8x96xf32>
    %599 = arith.mulf %597, %598 : vector<8x96xf32>
    %cst_128 = arith.constant 5.000000e-01 : f32
    %600 = vector.broadcast %cst_128 : f32 to vector<8x96xf32>
    %601 = arith.addf %599, %600 : vector<8x96xf32>
    %602 = vector.extract_strided_slice %596 {offsets = [0, 96], sizes = [8, 32], strides = [1, 1]} : vector<8x128xf32> to vector<8x32xf32>
    %603 = vector.extract_strided_slice %601 {offsets = [0, 0], sizes = [8, 32], strides = [1, 1]} : vector<8x96xf32> to vector<8x32xf32>
    %604 = vector.extract_strided_slice %601 {offsets = [0, 32], sizes = [8, 32], strides = [1, 1]} : vector<8x96xf32> to vector<8x32xf32>
    %605 = vector.extract_strided_slice %601 {offsets = [0, 64], sizes = [8, 32], strides = [1, 1]} : vector<8x96xf32> to vector<8x32xf32>
    %606 = arith.mulf %604, %568 : vector<8x32xf32>
    %607 = arith.mulf %603, %602 : vector<8x32xf32>
    %608 = arith.addf %606, %607 : vector<8x32xf32>
    %609 = math.tanh %608 : vector<8x32xf32>
    %610 = arith.mulf %605, %609 : vector<8x32xf32>
    %611 = tpu.concatenate %610, %587 in 1 : vector<8x32xf32>, vector<8x32xf32> -> vector<8x64xf32>
    %cst_129 = arith.constant dense<0.000000e+00> : vector<8x128xf32>
    %612 = tpu.matmul %611, %26, %cst_129 {dimension_numbers = #tpu.dot_dimension_numbers<[1], [0], [0], [1], [0, 0, 1, 1], [], []>} : vector<8x64xf32>, vector<64x128xf32>, vector<8x128xf32> -> vector<8x128xf32>
    %613 = math.tanh %612 : vector<8x128xf32>
    %614 = vector.extract_strided_slice %613 {offsets = [0, 0], sizes = [8, 96], strides = [1, 1]} : vector<8x128xf32> to vector<8x96xf32>
    %cst_130 = arith.constant 5.000000e-01 : f32
    %615 = vector.broadcast %cst_130 : f32 to vector<8x96xf32>
    %616 = arith.mulf %614, %615 : vector<8x96xf32>
    %cst_131 = arith.constant 5.000000e-01 : f32
    %617 = vector.broadcast %cst_131 : f32 to vector<8x96xf32>
    %618 = arith.addf %616, %617 : vector<8x96xf32>
    %619 = vector.extract_strided_slice %613 {offsets = [0, 96], sizes = [8, 32], strides = [1, 1]} : vector<8x128xf32> to vector<8x32xf32>
    %620 = vector.extract_strided_slice %618 {offsets = [0, 0], sizes = [8, 32], strides = [1, 1]} : vector<8x96xf32> to vector<8x32xf32>
    %621 = vector.extract_strided_slice %618 {offsets = [0, 32], sizes = [8, 32], strides = [1, 1]} : vector<8x96xf32> to vector<8x32xf32>
    %622 = vector.extract_strided_slice %618 {offsets = [0, 64], sizes = [8, 32], strides = [1, 1]} : vector<8x96xf32> to vector<8x32xf32>
    %623 = arith.mulf %621, %585 : vector<8x32xf32>
    %624 = arith.mulf %620, %619 : vector<8x32xf32>
    %625 = arith.addf %623, %624 : vector<8x32xf32>
    %626 = math.tanh %625 : vector<8x32xf32>
    %627 = arith.mulf %622, %626 : vector<8x32xf32>
    %c120 = arith.constant 120 : index
    %c0_132 = arith.constant 0 : index
    %628 = vector.load %arg3[%c120, %c0_132] : memref<128x128xf32, #tpu.memory_space<vmem>>, vector<8x128xf32>
    %629 = vector.extract_strided_slice %19 {offsets = [0, 15], sizes = [8, 1], strides = [1, 1]} : vector<8x16xf32> to vector<8x1xf32>
    %630 = vector.broadcast %629 : vector<8x1xf32> to vector<8x128xf32>
    %631 = vector.broadcast %24 : vector<1x128xf32> to vector<8x128xf32>
    %632 = arith.mulf %630, %631 : vector<8x128xf32>
    %633 = arith.addf %628, %632 : vector<8x128xf32>
    %cst_133 = arith.constant dense<0.000000e+00> : vector<8x128xf32>
    %634 = tpu.matmul %610, %25, %cst_133 {dimension_numbers = #tpu.dot_dimension_numbers<[1], [0], [0], [1], [0, 0, 1, 1], [], []>} : vector<8x32xf32>, vector<32x128xf32>, vector<8x128xf32> -> vector<8x128xf32>
    %635 = arith.addf %633, %634 : vector<8x128xf32>
    %636 = math.tanh %635 : vector<8x128xf32>
    %637 = vector.extract_strided_slice %636 {offsets = [0, 0], sizes = [8, 96], strides = [1, 1]} : vector<8x128xf32> to vector<8x96xf32>
    %cst_134 = arith.constant 5.000000e-01 : f32
    %638 = vector.broadcast %cst_134 : f32 to vector<8x96xf32>
    %639 = arith.mulf %637, %638 : vector<8x96xf32>
    %cst_135 = arith.constant 5.000000e-01 : f32
    %640 = vector.broadcast %cst_135 : f32 to vector<8x96xf32>
    %641 = arith.addf %639, %640 : vector<8x96xf32>
    %642 = vector.extract_strided_slice %636 {offsets = [0, 96], sizes = [8, 32], strides = [1, 1]} : vector<8x128xf32> to vector<8x32xf32>
    %643 = vector.extract_strided_slice %641 {offsets = [0, 0], sizes = [8, 32], strides = [1, 1]} : vector<8x96xf32> to vector<8x32xf32>
    %644 = vector.extract_strided_slice %641 {offsets = [0, 32], sizes = [8, 32], strides = [1, 1]} : vector<8x96xf32> to vector<8x32xf32>
    %645 = vector.extract_strided_slice %641 {offsets = [0, 64], sizes = [8, 32], strides = [1, 1]} : vector<8x96xf32> to vector<8x32xf32>
    %646 = arith.mulf %644, %608 : vector<8x32xf32>
    %647 = arith.mulf %643, %642 : vector<8x32xf32>
    %648 = arith.addf %646, %647 : vector<8x32xf32>
    %649 = math.tanh %648 : vector<8x32xf32>
    %650 = arith.mulf %645, %649 : vector<8x32xf32>
    %651 = tpu.concatenate %650, %627 in 1 : vector<8x32xf32>, vector<8x32xf32> -> vector<8x64xf32>
    %cst_136 = arith.constant dense<0.000000e+00> : vector<8x128xf32>
    %652 = tpu.matmul %651, %26, %cst_136 {dimension_numbers = #tpu.dot_dimension_numbers<[1], [0], [0], [1], [0, 0, 1, 1], [], []>} : vector<8x64xf32>, vector<64x128xf32>, vector<8x128xf32> -> vector<8x128xf32>
    %653 = math.tanh %652 : vector<8x128xf32>
    %654 = vector.extract_strided_slice %653 {offsets = [0, 0], sizes = [8, 96], strides = [1, 1]} : vector<8x128xf32> to vector<8x96xf32>
    %cst_137 = arith.constant 5.000000e-01 : f32
    %655 = vector.broadcast %cst_137 : f32 to vector<8x96xf32>
    %656 = arith.mulf %654, %655 : vector<8x96xf32>
    %cst_138 = arith.constant 5.000000e-01 : f32
    %657 = vector.broadcast %cst_138 : f32 to vector<8x96xf32>
    %658 = arith.addf %656, %657 : vector<8x96xf32>
    %659 = vector.extract_strided_slice %653 {offsets = [0, 96], sizes = [8, 32], strides = [1, 1]} : vector<8x128xf32> to vector<8x32xf32>
    %660 = vector.extract_strided_slice %658 {offsets = [0, 0], sizes = [8, 32], strides = [1, 1]} : vector<8x96xf32> to vector<8x32xf32>
    %661 = vector.extract_strided_slice %658 {offsets = [0, 32], sizes = [8, 32], strides = [1, 1]} : vector<8x96xf32> to vector<8x32xf32>
    %662 = vector.extract_strided_slice %658 {offsets = [0, 64], sizes = [8, 32], strides = [1, 1]} : vector<8x96xf32> to vector<8x32xf32>
    %663 = arith.mulf %661, %625 : vector<8x32xf32>
    %664 = arith.mulf %660, %659 : vector<8x32xf32>
    %665 = arith.addf %663, %664 : vector<8x32xf32>
    %666 = math.tanh %665 : vector<8x32xf32>
    %667 = arith.mulf %662, %666 : vector<8x32xf32>
    %c248 = arith.constant 248 : index
    %c0_139 = arith.constant 0 : index
    %668 = vector.load %arg1[%c248, %c0_139] : memref<280x128xf32, #tpu.memory_space<vmem>>, vector<32x1xf32>
    %cst_140 = arith.constant dense<0.000000e+00> : vector<8x1xf32>
    %669 = tpu.matmul %667, %668, %cst_140 {dimension_numbers = #tpu.dot_dimension_numbers<[1], [0], [0], [1], [0, 0, 1, 1], [], []>} : vector<8x32xf32>, vector<32x1xf32>, vector<8x1xf32> -> vector<8x1xf32>
    %c0_141 = arith.constant 0 : index
    %c0_142 = arith.constant 0 : index
    %670 = vector.load %arg2[%c0_141, %c0_142] : memref<8x1xf32, #tpu.memory_space<vmem>>, vector<8x1xf32>
    tpu.vector_store %arg2[%c0_141, %c0_142], %669 {strides = array<i32>} : memref<8x1xf32, #tpu.memory_space<vmem>>, vector<8x1xf32>,
    return
  }
}

</mosaic_0001>

<bundles_post_ra>
// kernel: comnn_forward.1
= control target key start
LH: loop header
LB: loop body
LE: loop exit
PB: predicated region body
PF: predicated region fallthrough
CT: control target
= control target key end

     0   :  { %v4892_v0 = vmov 0.0   ;;  %vm4893_vm0 = vmmov 0   ;;  %vm25_vm1 = vcmask 523264   ;;  %vm109_vm2 = vcmask 261120   ;;  %s4895_s5 = smov 32   ;;  %s4897_s22 = smov 64   ;;  %s6102_s1 = inlined_call_operand.vmem [shape: f32[280,128], index: 1, kind: input, shape index: {}]   ;;  %s6103_s0 = inlined_call_operand.vmem [shape: f32[136,128], index: 0, kind: input, shape index: {}]   ;;  %s6104_s2 = inlined_call_operand.vmem [shape: f32[8,1], index: 2, kind: output, shape index: {}]  }
   0x1   :  { %4147 = vmatprep.subr.mxu0 %v4892_v0  ;;  %v19_v1 = vld [vmem:[%s6102_s1 + $0x38] sm:$0xff]  ;;  %v18_v2 = vld [vmem:[%s6102_s1 + $0x30] sm:$0xff]  ;;  %4163 = vmatprep.mubr.msk.f32.mxu0 %vm4893_vm0, %v4892_v0  ;;  %v17_v3 = vld [vmem:[%s6102_s1 + $0x28] sm:$0xff]  ;;  %vm331_vm3 = vcmask 1043456   ;;  %vm191_vm4 = vcmask 130048   ;;  %vm282_vm5 = vcmask 31744  }
   0x2   :  { %4148 = vmatpush3.msra.mxu0 %v19_v1  ;;  %4166 = vmatprep.subr.mxu1 %v4892_v0  ;;  %v103_v4 = vld [vmem:[%s6102_s1 + $0x60] sm:$0xff]  ;;  %v15_v6 = vld [vmem:[%s6102_s1 + $0x18] sm:$0xff]  ;;  %v14_v7 = vld [vmem:[%s6102_s1 + $0x10] sm:$0xff]  ;;  %v4894_v33 = vmov 0   ;;  %v4896_v52 = vmov 1   ;;  %s4899_s25 = smov 96  }
   0x3   :  { %4149 = vmatprep.subr.mxu0 %v4892_v0  ;;  %4174 = vmatprep.mubr.msk.f32.mxu1 %vm4893_vm0, %v4892_v0  ;;  %v16_v5 = vld [vmem:[%s6102_s1 + $0x20] sm:$0xff]  ;;  %v13_v8 = vld [vmem:[%s6102_s1 + $0x8] sm:$0xff]  ;;  %v102_v11 = vld [vmem:[%s6102_s1 + $0x58] sm:$0xff]  ;;  %vm3822_vm6 = vcmask 7168  }
   0x4   :  { %4150 = vmatpush3.msra.mxu0 %v18_v2  ;;  %4167 = vmatpush3.msra.mxu1 %v103_v4  ;;  %v12_v9 = vld [vmem:[%s6102_s1] sm:$0xff]  ;;  %v101_v12 = vld [vmem:[%s6102_s1 + $0x50] sm:$0xff]  ;;  %v100_v13 = vld [vmem:[%s6102_s1 + $0x48] sm:$0xff] }
   0x5   :  { %4151 = vmatprep.subr.mxu0 %v4892_v0  ;;  %4168 = vmatprep.subr.mxu1 %v4892_v0  ;;  %v11_v10 = vld [vmem:[%s6103_s0] sm:$0xff]  ;;  %v185_v19 = vld [vmem:[%s6102_s1 + $0x78] sm:$0xff]  ;;  %v184_v20 = vld [vmem:[%s6102_s1 + $0x70] sm:$0xff] }
   0x6   :  { %4152 = vmatpush3.msra.mxu0 %v17_v3  ;;  %4169 = vmatpush3.msra.mxu1 %v102_v11  ;;  %v3828_v14 = vld [vmem:[%s6102_s1 + $0x40] ss:$0 sm:$0xff]  ;;  %v281_v21 = vld [vmem:[%s6102_s1 + $0x88] sm:$0xf]  ;;  %v5007_v22 = vld [vmem:[%s6102_s1 + $0xb0] sm:$0xff] }
   0x7   :  { %4153 = vmatprep.subr.mxu0 %v4892_v0  ;;  %4170 = vmatprep.subr.mxu1 %v4892_v0  ;;  %v5014_v23 = vld [vmem:[%s6102_s1 + $0xa8] sm:$0xff]  ;;  %v5022_v24 = vld [vmem:[%s6102_s1 + $0xa0] sm:$0xff]  ;;  %v5027_v25 = vld [vmem:[%s6102_s1 + $0x98] sm:$0xff] }
   0x8   :  { %4154 = vmatpush3.msra.mxu0 %v16_v5  ;;  %4171 = vmatpush3.msra.mxu1 %v101_v12  ;;  %v3830_v26 = vld [vmem:[%s6102_s1 + $0x68] ss:$0 sm:$0xff]  ;;  %v266_v32 = vld [vmem:[%s6103_s0 + $0x10] sm:$0xff]  ;;  %v3832_v34 = vld [vmem:[%s6102_s1 + $0x80] ss:$0 sm:$0xff] }
   0x9   :  { %4155 = vmatprep.subr.mxu0 %v4892_v0  ;;  %4172 = vmatprep.subr.mxu1 %v4892_v0  ;;  %v265_v31 = vld [vmem:[%s6103_s0 + $0x8] sm:$0xff]  ;;  %v5060_v41 = vld [vmem:[%s6102_s1 + $0x90] ss:$0 sm:$0xff]  ;;  %v5085_v59 = vld [vmem:[%s6102_s1 + $0xe0] sm:$0xff] }
   0xa   :  { %4156 = vmatpush3.msra.mxu0 %v15_v6  ;;  %4173 = vmatpush3.msra.mxu1 %v100_v13  ;;  %v5072_v57 = vld [vmem:[%s6102_s1 + $0xf0] sm:$0xff]  ;;  %v5077_v58 = vld [vmem:[%s6102_s1 + $0xe8] sm:$0xff]  ;;  %v5095_v60 = vld [vmem:[%s6102_s1 + $0xd8] sm:$0xff] }
   0xb   :  { %4157 = vmatprep.subr.mxu0 %v4892_v0  ;;  %4177 = vmatprep.subr.mxu1 %v4892_v0  ;;  %v5103_v61 = vld [vmem:[%s6102_s1 + $0xd0] sm:$0xff]  ;;  %v5112_v62 = vld [vmem:[%s6102_s1 + $0xc8] sm:$0xff]  ;;  %v5121_v63 = vld [vmem:[%s6102_s1 + $0xc0] sm:$0xff] }
   0xc   :  { %4158 = vmatpush3.msra.mxu0 %v14_v7  ;;  %4722 = vset.pattern.permute.xlu0 %v4894_v33  ;;  %v5130_v1 = vld [vmem:[%s6102_s1 + $0xb8] sm:$0xff] }
   0xd   :  { %4159 = vmatprep.subr.mxu0 %v4892_v0  ;;  %4723 = vset.pattern.permute.xlu1 %v4896_v52  ;;  %v280_v52 = vld [vmem:[%s6103_s0 + $0x80] sm:$0xff] }
   0xe   :  { %4160 = vmatpush3.msra.mxu0 %v13_v8 }
   0xf   :  { %4161 = vmatprep.subr.mxu0 %v4892_v0 }
  0x10   :  { %4162 = vmatpush3.msra.mxu0 %v12_v9 }
  0x11   :  { %4164 = vmatmul.mubr.msk.f32.vlgmr.msra.gmra.mxu0 %vm25_vm1, %v11_v10  ;;  %4210 = vmatprep.subr.mxu0 %v4892_v0 }
  0x12   :  { %4218 = vmatprep.mubr.msk.f32.mxu0 %vm4893_vm0, %v4892_v0  ;;  %4211 = vmatpush3.msra.mxu0 %v5007_v22 }
  0x13   :  { %4212 = vmatprep.subr.mxu0 %v4892_v0 }
  0x14   :  { %4213 = vmatpush3.msra.mxu0 %v5014_v23 }
  0x15   :  { %4214 = vmatprep.subr.mxu0 %v4892_v0 }
  0x16   :  { %4215 = vmatpush3.msra.mxu0 %v5022_v24 }
  0x17   :  { %4216 = vmatprep.subr.mxu0 %v4892_v0 }
  0x18   :  { %4217 = vmatpush3.msra.mxu0 %v5027_v25 }
  0x19   :  { %4219 = vmatmul.mubr.f32.vlgmr.msra.gmra.mxu0 %v4892_v0  ;;  %4221 = vmatprep.subr.mxu0 %v4892_v0 }
  0x1a   :  { %4237 = vmatprep.mubr.msk.f32.mxu0 %vm4893_vm0, %v4892_v0  ;;  %4222 = vmatpush3.msra.mxu0 %v5072_v57 }
  0x1b   :  { %4223 = vmatprep.subr.mxu0 %v4892_v0 }
  0x1c   :  { %4224 = vmatpush3.msra.mxu0 %v5077_v58 }
  0x1d   :  { %4225 = vmatprep.subr.mxu0 %v4892_v0 }
  0x1e   :  { %4226 = vmatpush3.msra.mxu0 %v5085_v59 }
  0x1f   :  { %4227 = vmatprep.subr.mxu0 %v4892_v0 }
  0x20   :  { %4228 = vmatpush3.msra.mxu0 %v5095_v60 }
  0x21   :  { %4229 = vmatprep.subr.mxu0 %v4892_v0 }
  0x22   :  { %4230 = vmatpush3.msra.mxu0 %v5103_v61 }
  0x23   :  { %4231 = vmatprep.subr.mxu0 %v4892_v0 }
  0x24   :  { %4232 = vmatpush3.msra.mxu0 %v5112_v62 }
  0x25   :  { %4233 = vmatprep.subr.mxu0 %v4892_v0 }
  0x26   :  { %4234 = vmatpush3.msra.mxu0 %v5121_v63 }
  0x27   :  { %4235 = vmatprep.subr.mxu0 %v4892_v0 }
  0x28   :  { %4236 = vmatpush3.msra.mxu0 %v5130_v1 }
  0x29   :  { %4240 = vmatprep.subr.mxu0 %v4892_v0 }
  0xd1   :  { %v95_v15 = vpop.f32.mrf.mxu0 }
  0xd2   :  { %v96_v16 = vadd.f32 %v3828_v14, %v95_v15 }
  0xd3   :  { %v4165_v17 = vpop.f32.mrf.mxu0 }
  0xd4   :  { %v99_v18 = vmax.f32 %v96_v16, 0.0 }
  0xd6   :  { %4175 = vmatmul.mubr.msk.f32.vlgmr.msra.gmra.mxu1 %vm109_vm2, %v99_v18 }
  0xd7   :  { %4181 = vmatprep.mubr.msk.f32.mxu1 %vm4893_vm0, %v4892_v0  ;;  %4178 = vmatpush3.msra.mxu1 %v185_v19 }
  0xd8   :  { %4179 = vmatprep.subr.mxu1 %v4892_v0 }
  0xd9   :  { %4180 = vmatpush3.msra.mxu1 %v184_v20  ;;  %v590_v36 = vpop.f32.mrf.mxu0 }
  0xda   :  { %4184 = vmatprep.subr.msk.mxu1 %vm331_vm3, %v281_v21 }
  0xdb   :  { %v4220_v39 = vpop.f32.mrf.mxu0 }
  0xdc   :  { %v269_v39 = vld [vmem:[%s6103_s0 + $0x28] sm:$0xff] }
 0x196   :  { %v179_v27 = vpop.f32.mrf.mxu1 }
 0x197   :  { %v180_v28 = vadd.f32 %v3830_v26, %v179_v27 }
 0x198   :  { %v4176_v29 = vpop.f32.mrf.mxu1 }
 0x199   :  { %v183_v30 = vmax.f32 %v180_v28, 0.0  ;;  %v267_v28 = vld [vmem:[%s6103_s0 + $0x18] sm:$0xff]  ;;  %v268_v29 = vld [vmem:[%s6103_s0 + $0x20] sm:$0xff] }
 0x19b   :  { %4182 = vmatmul.mubr.msk.f32.vlgmr.msra.gmra.mxu1 %vm191_vm4, %v183_v30 }
 0x19c   :  { %4185 = vmatpush3.msk.msra.mxu1 %vm331_vm3, %v281_v21  ;;  %4186 = vmatprep.mubr.msk.f32.mxu1 %vm282_vm5, %v265_v31 }
 0x19d   :  { %4251 = vmatprep.subr.mxu1 %v4892_v0 }
 0x19f   :  { %4187 = vmatmul.mubr.msk.f32.vlgmr.msra.gmra.mxu1 %vm282_vm5, %v266_v32 }
 0x1a0   :  { %4252 = vmatpush3.msra.mxu1 %v5072_v57  ;;  %4189 = vmatprep.mubr.msk.f32.mxu1 %vm282_vm5, %v267_v28 }
 0x1a1   :  { %4253 = vmatprep.subr.mxu1 %v4892_v0 }
 0x1a2   :  { %4254 = vmatpush3.msra.mxu1 %v5077_v58 }
 0x1a3   :  { %4255 = vmatprep.subr.mxu1 %v4892_v0  ;;  %4190 = vmatmul.mubr.msk.f32.gmra.mxu1 %vm282_vm5, %v268_v29 }
 0x1a4   :  { %4256 = vmatpush3.msra.mxu1 %v5085_v59  ;;  %4192 = vmatprep.mubr.msk.f32.mxu1 %vm282_vm5, %v269_v39 }
 0x1a5   :  { %4257 = vmatprep.subr.mxu1 %v4892_v0 }
 0x1a6   :  { %4258 = vmatpush3.msra.mxu1 %v5095_v60 }
 0x1a7   :  { %4259 = vmatprep.subr.mxu1 %v4892_v0 }
 0x1a8   :  { %4260 = vmatpush3.msra.mxu1 %v5103_v61 }
 0x1a9   :  { %4261 = vmatprep.subr.mxu1 %v4892_v0 }
 0x1aa   :  { %4262 = vmatpush3.msra.mxu1 %v5112_v62 }
 0x1ab   :  { %4263 = vmatprep.subr.mxu1 %v4892_v0 }
 0x1ac   :  { %4264 = vmatpush3.msra.mxu1 %v5121_v63 }
 0x1ad   :  { %4265 = vmatprep.subr.mxu1 %v4892_v0 }
 0x1ae   :  { %4266 = vmatpush3.msra.mxu1 %v5130_v1 }
 0x1af   :  { %4281 = vmatprep.subr.mxu1 %v4892_v0 }
 0x25b   :  { %v261_v35 = vpop.f32.mrf.mxu1 }
 0x25c   :  { %v5052_v37 = vadd.f32 %v3832_v34, %v261_v35 }
 0x25d   :  { %v4183_v38 = vpop.f32.mrf.mxu1 }
 0x25e   :  { %512 = vperm.xlu0 %4722, %v5052_v37   ;;  %v4898_v38 = vmov 2  }
 0x25f   :  { %v5055_v40 = vpop.f32.mrf.mxu1 }
 0x261   :  { %v401_v44 = vpop.f32.mrf.mxu1 }
 0x262   :  { %4724 = vset.pattern.permute.xlu0 %v4898_v38 }
 0x2d9   :  { %v513_v42 = vpop.permute.xlu0 %512 }
 0x2da   :  { %v519_v43 = vmul.f32 %v5060_v41, %v513_v42  ;;  %v271_v42 = vld [vmem:[%s6103_s0 + $0x38] sm:$0xff] }
 0x2dc   :  { %v520_v45 = vadd.f32 %v519_v43, %v401_v44  ;;  %v272_v43 = vld [vmem:[%s6103_s0 + $0x40] sm:$0xff]  ;;  %v273_v44 = vld [vmem:[%s6103_s0 + $0x48] sm:$0xff] }
 0x2de   :  { %v594_v46 = vadd.f32 %v590_v36, %v520_v45 }
 0x2e0   :  { %4738 = vtanh.f32 %v594_v46  ;;  %v274_v46 = vld [vmem:[%s6103_s0 + $0x50] sm:$0xff] }
 0x2ed   :  { %v4739_v47 = vpop.eup %4738 }
 0x2ee   :  { %600 = vrot.lane.b32.xlu0 %v4739_v47, %s4895_s5  ;;  %v596_v48 = vmul.f32 0.5, %v4739_v47  ;;  %v275_v47 = vld [vmem:[%s6103_s0 + $0x58] sm:$0xff] }
 0x2f0   :  { %v597_v49 = vadd.f32 0.5, %v596_v48  ;;  %v276_v48 = vld [vmem:[%s6103_s0 + $0x60] sm:$0xff] }
 0x2f2   :  { %v598_v53 = vmul.f32 0.0, %v597_v49 }
 0x360   :  { %v601_v50 = vpop.permute.xlu0 %600 }
 0x361   :  { %v603_v51 = vmul.f32 %v601_v50, %v597_v49  ;;  %v278_v50 = vld [vmem:[%s6103_s0 + $0x70] sm:$0xff] }
 0x363   :  { %605 = vrot.lane.b32.xlu1 %v603_v51, %s4895_s5  ;;  %v279_v51 = vld [vmem:[%s6103_s0 + $0x78] sm:$0xff] }
 0x3d5   :  { %v606_v54 = vpop.permute.xlu1 %605 }
 0x3d6   :  { %v5065_v55 = vadd.f32 %v606_v54, %v598_v53 }
 0x3d8   :  { %4740 = vtanh.f32 %v5065_v55 }
 0x3e5   :  { %v4741_v56 = vpop.eup %4740 }
 0x3e6   :  { %611 = vrot.lane.b32.xlu1 %v4741_v56, %s4895_s5 }
 0x3ea   :  { %715 = vperm.xlu1 %4723, %v5052_v37  }
 0x458   :  { %v612_v2 = vpop.permute.xlu1 %611 }
 0x459   :  { %v614_v3 = vmul.f32 %v612_v2, %v597_v49  ;;  %v277_v49 = vld [vmem:[%s6103_s0 + $0x68] sm:$0xff] }
 0x45b   :  { %616 = vrot.lane.b32.xlu0 %v614_v3, %s4897_s22 }
 0x465   :  { %v716_v6 = vpop.permute.xlu1 %715 }
 0x466   :  { %v718_v9 = vmul.f32 %v5060_v41, %v716_v6 }
 0x468   :  { %v719_v10 = vadd.f32 %v5055_v40, %v718_v9  ;;  %v270_v40 = vld [vmem:[%s6103_s0 + $0x30] sm:$0xff] }
 0x469   :  { %4193 = vmatmul.mubr.msk.f32.gmra.mxu1 %vm282_vm5, %v270_v40 }
 0x46a   :  { %4195 = vmatprep.mubr.msk.f32.mxu1 %vm282_vm5, %v271_v42 }
 0x46d   :  { %4196 = vmatmul.mubr.msk.f32.gmra.mxu1 %vm282_vm5, %v272_v43 }
 0x46e   :  { %4198 = vmatprep.mubr.msk.f32.mxu1 %vm282_vm5, %v273_v44 }
 0x471   :  { %4199 = vmatmul.mubr.msk.f32.gmra.mxu1 %vm282_vm5, %v274_v46 }
 0x472   :  { %4201 = vmatprep.mubr.msk.f32.mxu1 %vm282_vm5, %v275_v47 }
 0x475   :  { %4202 = vmatmul.mubr.msk.f32.gmra.mxu1 %vm282_vm5, %v276_v48 }
 0x476   :  { %4204 = vmatprep.mubr.msk.f32.mxu1 %vm282_vm5, %v277_v49 }
 0x479   :  { %4205 = vmatmul.mubr.msk.f32.gmra.mxu1 %vm282_vm5, %v278_v50 }
 0x47a   :  { %4207 = vmatprep.mubr.msk.f32.mxu1 %vm282_vm5, %v279_v51  ;;  %v4900_v51 = vmov 3  }
 0x47d   :  { %4208 = vmatmul.mubr.msk.f32.gmra.mxu1 %vm282_vm5, %v280_v52 }
 0x47e   :  { %4267 = vmatprep.mubr.msk.f32.mxu1 %vm4893_vm0, %v4892_v0 }
 0x4cd   :  { %v617_v4 = vpop.permute.xlu0 %616 }
 0x4ce   :  { %v619_v5 = vsel %vm109_vm2, %v617_v4, 0.0 }
 0x4cf   :  { %4238 = vmatmul.mubr.msk.f32.vlgmr.msra.gmra.mxu0 %vm25_vm1, %v619_v5  ;;  %v5273_v5 = vpop.f32.mrf.mxu1 }
 0x4d0   :  { %4241 = vmatpush3.msra.mxu0 %v5007_v22  ;;  %4248 = vmatprep.mubr.msk.f32.mxu0 %vm4893_vm0, %v4892_v0 }
 0x4d1   :  { %4242 = vmatprep.subr.mxu0 %v4892_v0  ;;  %v411_v6 = vpop.f32.mrf.mxu1 }
 0x4d2   :  { %4243 = vmatpush3.msra.mxu0 %v5014_v23 }
 0x4d3   :  { %4244 = vmatprep.subr.mxu0 %v4892_v0 }
 0x4d4   :  { %4245 = vmatpush3.msra.mxu0 %v5022_v24 }
 0x4d5   :  { %4246 = vmatprep.subr.mxu0 %v4892_v0 }
 0x4d6   :  { %4247 = vmatpush3.msra.mxu0 %v5027_v25 }
 0x4d7   :  { %4249 = vmatmul.mubr.msk.f32.vlgmr.msra.gmra.mxu0 %vm109_vm2, %v617_v4  ;;  %4270 = vmatprep.subr.mxu0 %v4892_v0 }
 0x4d8   :  { %4271 = vmatpush3.msra.mxu0 %v5007_v22  ;;  %4278 = vmatprep.mubr.msk.f32.mxu0 %vm4893_vm0, %v4892_v0 }
 0x4d9   :  { %4272 = vmatprep.subr.mxu0 %v4892_v0 }
 0x4da   :  { %4273 = vmatpush3.msra.mxu0 %v5014_v23 }
 0x4db   :  { %4274 = vmatprep.subr.mxu0 %v4892_v0 }
 0x4dc   :  { %4275 = vmatpush3.msra.mxu0 %v5022_v24 }
 0x4dd   :  { %4276 = vmatprep.subr.mxu0 %v4892_v0 }
 0x4de   :  { %4277 = vmatpush3.msra.mxu0 %v5027_v25 }
 0x4df   :  { %4300 = vmatprep.subr.mxu0 %v4892_v0 }
 0x58f   :  { %v689_v7 = vpop.f32.mrf.mxu0 }
 0x590   :  { %4742 = vtanh.f32 %v689_v7  ;;  %v5275_v7 = vpop.f32.mrf.mxu1 }
 0x591   :  { %v4239_v8 = vpop.f32.mrf.mxu0 }
 0x592   :  { %v5277_v8 = vpop.f32.mrf.mxu1 }
 0x594   :  { %v5279_v9 = vpop.f32.mrf.mxu1 }
 0x597   :  { %v788_v11 = vpop.f32.mrf.mxu0 }
 0x598   :  { %v792_v12 = vadd.f32 %v788_v11, %v719_v10  ;;  %v5281_v10 = vpop.f32.mrf.mxu1 }
 0x599   :  { %v4250_v13 = vpop.f32.mrf.mxu0 }
 0x59a   :  { %4744 = vtanh.f32 %v792_v12  ;;  %v5283_v11 = vpop.f32.mrf.mxu1 }
 0x59c   :  { %v5285_v12 = vpop.f32.mrf.mxu1 }
 0x59d   :  { %v4743_v14 = vpop.eup %4742 }
 0x59e   :  { %698 = vrot.lane.b32.xlu1 %v4743_v14, %s4895_s5  ;;  %v694_v16 = vmul.f32 0.5, %v4743_v14  ;;  %v5287_v13 = vpop.f32.mrf.mxu1 }
 0x5a0   :  { %v695_v17 = vadd.f32 0.5, %v694_v16  ;;  %v5289_v14 = vpop.f32.mrf.mxu1 }
 0x5a2   :  { %v696_v30 = vmul.f32 0.0, %v695_v17 }
 0x5a7   :  { %v4745_v15 = vpop.eup %4744 }
 0x5a8   :  { %798 = vrot.lane.b32.xlu0 %v4745_v15, %s4895_s5  ;;  %v794_v20 = vmul.f32 0.5, %v4745_v15  ;;  %v5291_v15 = vpop.f32.mrf.mxu1 }
 0x5aa   :  { %v795_v21 = vadd.f32 0.5, %v794_v20  ;;  %v5293_v16 = vpop.f32.mrf.mxu1 }
 0x5ac   :  { %v796_v33 = vmul.f32 %v795_v21, %v5065_v55 }
 0x610   :  { %v699_v18 = vpop.permute.xlu1 %698 }
 0x611   :  { %v701_v19 = vmul.f32 %v699_v18, %v695_v17  ;;  %v5295_v18 = vpop.f32.mrf.mxu1 }
 0x613   :  { %703 = vrot.lane.b32.xlu1 %v701_v19, %s4895_s5  ;;  %v5298_v20 = vpop.f32.mrf.mxu1 }
 0x61a   :  { %v799_v26 = vpop.permute.xlu0 %798 }
 0x61b   :  { %v801_v27 = vmul.f32 %v799_v26, %v795_v21 }
 0x61d   :  { %803 = vrot.lane.b32.xlu0 %v801_v27, %s4895_s5 }
 0x685   :  { %v704_v31 = vpop.permute.xlu1 %703 }
 0x686   :  { %v5180_v32 = vadd.f32 %v704_v31, %v696_v30 }
 0x688   :  { %4746 = vtanh.f32 %v5180_v32 }
 0x68f   :  { %v804_v34 = vpop.permute.xlu0 %803 }
 0x690   :  { %v5184_v35 = vadd.f32 %v804_v34, %v796_v33 }
 0x692   :  { %4748 = vtanh.f32 %v5184_v35 }
 0x695   :  { %v4747_v36 = vpop.eup %4746 }
 0x696   :  { %709 = vrot.lane.b32.xlu1 %v4747_v36, %s4895_s5 }
 0x69f   :  { %v4749_v45 = vpop.eup %4748 }
 0x6a0   :  { %809 = vrot.lane.b32.xlu0 %v4749_v45, %s4895_s5 }
 0x708   :  { %v710_v53 = vpop.permute.xlu1 %709 }
 0x709   :  { %v712_v54 = vmul.f32 %v710_v53, %v695_v17 }
 0x70b   :  { %818 = vrot.lane.b32.xlu1 %v712_v54, %s4899_s25 }
 0x712   :  { %v810_v55 = vpop.permute.xlu0 %809 }
 0x713   :  { %v812_v56 = vmul.f32 %v810_v55, %v795_v21 }
 0x715   :  { %814 = vrot.lane.b32.xlu0 %v812_v56, %s4897_s22 }
 0x719   :  { %917 = vperm.xlu0 %4724, %v5052_v37  }
 0x71d   :  { %4725 = vset.pattern.permute.xlu0 %v4900_v51 }
 0x77d   :  { %v819_v2 = vpop.permute.xlu1 %818 }
 0x787   :  { %v815_v3 = vpop.permute.xlu0 %814 }
 0x788   :  { %v821_v4 = vsel %vm109_vm2, %v815_v3, %v819_v2  ;;  %4279 = vmatmul.mubr.msk.f32.vlgmr.msra.gmra.mxu0 %vm109_vm2, %v815_v3 }
 0x789   :  { %4268 = vmatmul.mubr.msk.f32.vlgmr.msra.gmra.mxu1 %vm25_vm1, %v821_v4  ;;  %4301 = vmatpush3.msra.mxu0 %v5007_v22 }
 0x78a   :  { %4282 = vmatpush3.msra.mxu1 %v5072_v57  ;;  %4302 = vmatprep.subr.mxu0 %v4892_v0 }
 0x78b   :  { %4283 = vmatprep.subr.mxu1 %v4892_v0  ;;  %4303 = vmatpush3.msra.mxu0 %v5014_v23 }
 0x78c   :  { %4284 = vmatpush3.msra.mxu1 %v5077_v58  ;;  %4304 = vmatprep.subr.mxu0 %v4892_v0 }
 0x78d   :  { %4285 = vmatprep.subr.mxu1 %v4892_v0  ;;  %4305 = vmatpush3.msra.mxu0 %v5022_v24 }
 0x78e   :  { %4286 = vmatpush3.msra.mxu1 %v5085_v59  ;;  %4306 = vmatprep.subr.mxu0 %v4892_v0 }
 0x78f   :  { %4287 = vmatprep.subr.mxu1 %v4892_v0  ;;  %4307 = vmatpush3.msra.mxu0 %v5027_v25 }
 0x790   :  { %4288 = vmatpush3.msra.mxu1 %v5095_v60  ;;  %4308 = vmatprep.mubr.msk.f32.mxu0 %vm4893_vm0, %v4892_v0 }
 0x791   :  { %4289 = vmatprep.subr.mxu1 %v4892_v0  ;;  %4297 = vmatprep.mubr.msk.f32.mxu1 %vm4893_vm0, %v4892_v0 }
 0x792   :  { %4290 = vmatpush3.msra.mxu1 %v5103_v61  ;;  %4311 = vmatprep.subr.mxu0 %v4892_v0 }
 0x793   :  { %4291 = vmatprep.subr.mxu1 %v4892_v0 }
 0x794   :  { %4292 = vmatpush3.msra.mxu1 %v5112_v62  ;;  %v918_v17 = vpop.permute.xlu0 %917 }
 0x795   :  { %4293 = vmatprep.subr.mxu1 %v4892_v0  ;;  %v920_v19 = vmul.f32 %v5060_v41, %v918_v17 }
 0x796   :  { %4294 = vmatpush3.msra.mxu1 %v5121_v63 }
 0x797   :  { %4295 = vmatprep.subr.mxu1 %v4892_v0  ;;  %v921_v21 = vadd.f32 %v920_v19, %v411_v6 }
 0x798   :  { %4296 = vmatpush3.msra.mxu1 %v5130_v1 }
 0x799   :  { %4330 = vmatprep.subr.mxu1 %v4892_v0 }
 0x848   :  { %v990_v26 = vpop.f32.mrf.mxu0 }
 0x849   :  { %v994_v27 = vadd.f32 %v990_v26, %v921_v21  ;;  %v891_v28 = vpop.f32.mrf.mxu1 }
 0x84a   :  { %v4280_v29 = vpop.f32.mrf.mxu0 }
 0x84b   :  { %4750 = vtanh.f32 %v994_v27  ;;  %v4269_v30 = vpop.f32.mrf.mxu1 }
 0x84c   :  { %4752 = vtanh.f32 %v891_v28 }
 0x858   :  { %v4751_v31 = vpop.eup %4750 }
 0x859   :  { %1000 = vrot.lane.b32.xlu1 %v4751_v31, %s4895_s5  ;;  %v4753_v33 = vpop.eup %4752  ;;  %v996_v34 = vmul.f32 0.5, %v4751_v31 }
 0x85a   :  { %v896_v38 = vmul.f32 0.5, %v4753_v33 }
 0x85b   :  { %v997_v36 = vadd.f32 0.5, %v996_v34 }
 0x85c   :  { %v897_v42 = vadd.f32 0.5, %v896_v38 }
 0x85d   :  { %900 = vrot.lane.b32.xlu1 %v4753_v33, %s4895_s5  ;;  %v998_v45 = vmul.f32 %v997_v36, %v5184_v35 }
 0x85e   :  { %v898_v48 = vmul.f32 %v897_v42, %v5180_v32 }
 0x8cb   :  { %v1001_v39 = vpop.permute.xlu1 %1000 }
 0x8cc   :  { %v1003_v40 = vmul.f32 %v1001_v39, %v997_v36 }
 0x8ce   :  { %1005 = vrot.lane.b32.xlu0 %v1003_v40, %s4895_s5 }
 0x8cf   :  { %v901_v43 = vpop.permute.xlu1 %900 }
 0x8d0   :  { %v903_v44 = vmul.f32 %v901_v43, %v897_v42 }
 0x8d2   :  { %905 = vrot.lane.b32.xlu1 %v903_v44, %s4895_s5 }
 0x940   :  { %v1006_v46 = vpop.permute.xlu0 %1005 }
 0x941   :  { %v5305_v47 = vadd.f32 %v1006_v46, %v998_v45 }
 0x943   :  { %4754 = vtanh.f32 %v5305_v47 }
 0x944   :  { %v906_v49 = vpop.permute.xlu1 %905 }
 0x945   :  { %v5309_v50 = vadd.f32 %v906_v49, %v898_v48  ;;  %v4901_v49 = vmov 4  }
 0x947   :  { %4756 = vtanh.f32 %v5309_v50 }
 0x950   :  { %v4755_v52 = vpop.eup %4754 }
 0x951   :  { %1011 = vrot.lane.b32.xlu0 %v4755_v52, %s4895_s5 }
 0x954   :  { %v4757_v53 = vpop.eup %4756 }
 0x955   :  { %911 = vrot.lane.b32.xlu1 %v4757_v53, %s4895_s5 }
 0x9c3   :  { %v1012_v35 = vpop.permute.xlu0 %1011 }
 0x9c4   :  { %v1014_v54 = vmul.f32 %v1012_v35, %v997_v36 }
 0x9c6   :  { %1016 = vrot.lane.b32.xlu0 %v1014_v54, %s4897_s22 }
 0x9c7   :  { %v912_v55 = vpop.permute.xlu1 %911 }
 0x9c8   :  { %v914_v56 = vmul.f32 %v912_v55, %v897_v42 }
 0x9ca   :  { %1020 = vrot.lane.b32.xlu1 %v914_v56, %s4899_s25  ;;  %1119 = vperm.xlu0 %4725, %v5052_v37  }
 0x9ce   :  { %4726 = vset.pattern.permute.xlu0 %v4901_v49 }
 0xa38   :  { %v1017_v32 = vpop.permute.xlu0 %1016 }
 0xa39   :  { %4309 = vmatmul.mubr.msk.f32.vlgmr.msra.gmra.mxu0 %vm109_vm2, %v1017_v32 }
 0xa3a   :  { %4312 = vmatpush3.msra.mxu0 %v5072_v57  ;;  %4327 = vmatprep.mubr.msk.f32.mxu0 %vm4893_vm0, %v4892_v0 }
 0xa3b   :  { %4313 = vmatprep.subr.mxu0 %v4892_v0 }
 0xa3c   :  { %v1021_v2 = vpop.permute.xlu1 %1020  ;;  %4314 = vmatpush3.msra.mxu0 %v5077_v58 }
 0xa3d   :  { %v1023_v3 = vsel %vm109_vm2, %v1017_v32, %v1021_v2  ;;  %4315 = vmatprep.subr.mxu0 %v4892_v0 }
 0xa3e   :  { %4298 = vmatmul.mubr.msk.f32.vlgmr.msra.gmra.mxu1 %vm25_vm1, %v1023_v3  ;;  %4316 = vmatpush3.msra.mxu0 %v5085_v59 }
 0xa3f   :  { %4331 = vmatpush3.msra.mxu1 %v5007_v22  ;;  %4317 = vmatprep.subr.mxu0 %v4892_v0 }
 0xa40   :  { %4332 = vmatprep.subr.mxu1 %v4892_v0  ;;  %4318 = vmatpush3.msra.mxu0 %v5095_v60 }
 0xa41   :  { %4333 = vmatpush3.msra.mxu1 %v5014_v23  ;;  %4319 = vmatprep.subr.mxu0 %v4892_v0 }
 0xa42   :  { %4334 = vmatprep.subr.mxu1 %v4892_v0  ;;  %4320 = vmatpush3.msra.mxu0 %v5103_v61 }
 0xa43   :  { %4335 = vmatpush3.msra.mxu1 %v5022_v24  ;;  %4321 = vmatprep.subr.mxu0 %v4892_v0 }
 0xa44   :  { %4336 = vmatprep.subr.mxu1 %v4892_v0  ;;  %4338 = vmatprep.mubr.msk.f32.mxu1 %vm4893_vm0, %v4892_v0 }
 0xa45   :  { %4337 = vmatpush3.msra.mxu1 %v5027_v25  ;;  %4322 = vmatpush3.msra.mxu0 %v5112_v62  ;;  %v1120_v4 = vpop.permute.xlu0 %1119 }
 0xa46   :  { %4323 = vmatprep.subr.mxu0 %v4892_v0  ;;  %4341 = vmatprep.subr.mxu1 %v4892_v0  ;;  %v1122_v6 = vmul.f32 %v5060_v41, %v1120_v4 }
 0xa47   :  { %4324 = vmatpush3.msra.mxu0 %v5121_v63 }
 0xa48   :  { %4325 = vmatprep.subr.mxu0 %v4892_v0  ;;  %v1123_v17 = vadd.f32 %v5273_v5, %v1122_v6 }
 0xa49   :  { %4326 = vmatpush3.msra.mxu0 %v5130_v1 }
 0xa4a   :  { %4360 = vmatprep.subr.mxu0 %v4892_v0 }
 0xaf9   :  { %v1192_v19 = vpop.f32.mrf.mxu0 }
 0xafa   :  { %v1196_v21 = vadd.f32 %v1192_v19, %v1123_v17 }
 0xafb   :  { %v4310_v26 = vpop.f32.mrf.mxu0 }
 0xafc   :  { %4758 = vtanh.f32 %v1196_v21 }
 0xafe   :  { %v1093_v27 = vpop.f32.mrf.mxu1 }
 0xaff   :  { %4760 = vtanh.f32 %v1093_v27 }
 0xb00   :  { %v4299_v28 = vpop.f32.mrf.mxu1 }
 0xb09   :  { %v4759_v29 = vpop.eup %4758 }
 0xb0a   :  { %1202 = vrot.lane.b32.xlu1 %v4759_v29, %s4895_s5  ;;  %v1198_v31 = vmul.f32 0.5, %v4759_v29 }
 0xb0c   :  { %v4761_v30 = vpop.eup %4760  ;;  %v1199_v33 = vadd.f32 0.5, %v1198_v31 }
 0xb0d   :  { %v1098_v34 = vmul.f32 0.5, %v4761_v30 }
 0xb0e   :  { %1102 = vrot.lane.b32.xlu1 %v4761_v30, %s4895_s5  ;;  %v1200_v42 = vmul.f32 %v1199_v33, %v5305_v47 }
 0xb0f   :  { %v1099_v5 = vadd.f32 0.5, %v1098_v34 }
 0xb11   :  { %v1100_v45 = vmul.f32 %v1099_v5, %v5309_v50 }
 0xb7c   :  { %v1203_v36 = vpop.permute.xlu1 %1202 }
 0xb7d   :  { %v1205_v38 = vmul.f32 %v1203_v36, %v1199_v33 }
 0xb7f   :  { %1207 = vrot.lane.b32.xlu0 %v1205_v38, %s4895_s5 }
 0xb80   :  { %v1103_v39 = vpop.permute.xlu1 %1102 }
 0xb81   :  { %v1105_v40 = vmul.f32 %v1103_v39, %v1099_v5 }
 0xb83   :  { %1107 = vrot.lane.b32.xlu1 %v1105_v40, %s4895_s5 }
 0xbf1   :  { %v1208_v43 = vpop.permute.xlu0 %1207 }
 0xbf2   :  { %v5355_v44 = vadd.f32 %v1208_v43, %v1200_v42 }
 0xbf4   :  { %4762 = vtanh.f32 %v5355_v44 }
 0xbf5   :  { %v1108_v46 = vpop.permute.xlu1 %1107 }
 0xbf6   :  { %v5359_v48 = vadd.f32 %v1108_v46, %v1100_v45  ;;  %v4902_v45 = vmov 5  }
 0xbf8   :  { %4764 = vtanh.f32 %v5359_v48 }
 0xc01   :  { %v4763_v51 = vpop.eup %4762 }
 0xc02   :  { %1213 = vrot.lane.b32.xlu0 %v4763_v51, %s4895_s5 }
 0xc05   :  { %v4765_v52 = vpop.eup %4764 }
 0xc06   :  { %1113 = vrot.lane.b32.xlu1 %v4765_v52, %s4895_s5 }
 0xc74   :  { %v1214_v47 = vpop.permute.xlu0 %1213 }
 0xc75   :  { %v1216_v53 = vmul.f32 %v1214_v47, %v1199_v33 }
 0xc77   :  { %1218 = vrot.lane.b32.xlu0 %v1216_v53, %s4897_s22 }
 0xc78   :  { %v1114_v35 = vpop.permute.xlu1 %1113 }
 0xc79   :  { %v1116_v54 = vmul.f32 %v1114_v35, %v1099_v5 }
 0xc7b   :  { %1222 = vrot.lane.b32.xlu1 %v1116_v54, %s4899_s25  ;;  %1321 = vperm.xlu0 %4726, %v5052_v37  }
 0xc7f   :  { %4727 = vset.pattern.permute.xlu0 %v4902_v45  ;;  %v5521_v45 = vld [vmem:[%s6102_s1 + $0x90] ss:$0 sm:$0xff] }
 0xce9   :  { %v1219_v50 = vpop.permute.xlu0 %1218 }
 0xcea   :  { %4339 = vmatmul.mubr.msk.f32.vlgmr.msra.gmra.mxu1 %vm109_vm2, %v1219_v50 }
 0xceb   :  { %4342 = vmatpush3.msra.mxu1 %v5072_v57  ;;  %4357 = vmatprep.mubr.msk.f32.mxu1 %vm4893_vm0, %v4892_v0 }
 0xcec   :  { %4343 = vmatprep.subr.mxu1 %v4892_v0 }
 0xced   :  { %v1223_v55 = vpop.permute.xlu1 %1222  ;;  %4344 = vmatpush3.msra.mxu1 %v5077_v58 }
 0xcee   :  { %v1225_v56 = vsel %vm109_vm2, %v1219_v50, %v1223_v55  ;;  %4345 = vmatprep.subr.mxu1 %v4892_v0 }
 0xcef   :  { %4328 = vmatmul.mubr.msk.f32.vlgmr.msra.gmra.mxu0 %vm25_vm1, %v1225_v56  ;;  %4346 = vmatpush3.msra.mxu1 %v5085_v59 }
 0xcf0   :  { %4361 = vmatpush3.msra.mxu0 %v5007_v22  ;;  %4347 = vmatprep.subr.mxu1 %v4892_v0 }
 0xcf1   :  { %4362 = vmatprep.subr.mxu0 %v4892_v0  ;;  %4348 = vmatpush3.msra.mxu1 %v5095_v60 }
 0xcf2   :  { %4363 = vmatpush3.msra.mxu0 %v5014_v23  ;;  %4349 = vmatprep.subr.mxu1 %v4892_v0 }
 0xcf3   :  { %4364 = vmatprep.subr.mxu0 %v4892_v0  ;;  %4350 = vmatpush3.msra.mxu1 %v5103_v61 }
 0xcf4   :  { %4365 = vmatpush3.msra.mxu0 %v5022_v24  ;;  %4351 = vmatprep.subr.mxu1 %v4892_v0 }
 0xcf5   :  { %4366 = vmatprep.subr.mxu0 %v4892_v0  ;;  %4368 = vmatprep.mubr.msk.f32.mxu0 %vm4893_vm0, %v4892_v0 }
 0xcf6   :  { %4367 = vmatpush3.msra.mxu0 %v5027_v25  ;;  %4352 = vmatpush3.msra.mxu1 %v5112_v62  ;;  %v1322_v32 = vpop.permute.xlu0 %1321 }
 0xcf7   :  { %4353 = vmatprep.subr.mxu1 %v4892_v0  ;;  %4371 = vmatprep.subr.mxu0 %v4892_v0  ;;  %v1324_v2 = vmul.f32 %v5060_v41, %v1322_v32 }
 0xcf8   :  { %4354 = vmatpush3.msra.mxu1 %v5121_v63 }
 0xcf9   :  { %4355 = vmatprep.subr.mxu1 %v4892_v0  ;;  %v1325_v3 = vadd.f32 %v1324_v2, %v5277_v8 }
 0xcfa   :  { %4356 = vmatpush3.msra.mxu1 %v5130_v1 }
 0xcfb   :  { %4390 = vmatprep.subr.mxu1 %v4892_v0 }
 0xdaa   :  { %v1394_v4 = vpop.f32.mrf.mxu1 }
 0xdab   :  { %v1398_v6 = vadd.f32 %v1394_v4, %v1325_v3 }
 0xdac   :  { %v4340_v17 = vpop.f32.mrf.mxu1 }
 0xdad   :  { %4766 = vtanh.f32 %v1398_v6 }
 0xdaf   :  { %v1295_v19 = vpop.f32.mrf.mxu0 }
 0xdb0   :  { %4768 = vtanh.f32 %v1295_v19 }
 0xdb1   :  { %v4329_v21 = vpop.f32.mrf.mxu0 }
 0xdba   :  { %v4767_v26 = vpop.eup %4766 }
 0xdbb   :  { %1404 = vrot.lane.b32.xlu1 %v4767_v26, %s4895_s5  ;;  %v1400_v28 = vmul.f32 0.5, %v4767_v26 }
 0xdbd   :  { %v4769_v27 = vpop.eup %4768  ;;  %v1401_v29 = vadd.f32 0.5, %v1400_v28 }
 0xdbe   :  { %v1300_v30 = vmul.f32 0.5, %v4769_v27 }
 0xdbf   :  { %1304 = vrot.lane.b32.xlu1 %v4769_v27, %s4895_s5  ;;  %v1402_v38 = vmul.f32 %v1401_v29, %v5355_v44 }
 0xdc0   :  { %v1301_v8 = vadd.f32 0.5, %v1300_v30 }
 0xdc2   :  { %v1302_v40 = vmul.f32 %v1301_v8, %v5359_v48 }
 0xe2d   :  { %v1405_v31 = vpop.permute.xlu1 %1404 }
 0xe2e   :  { %v1407_v33 = vmul.f32 %v1405_v31, %v1401_v29 }
 0xe30   :  { %1409 = vrot.lane.b32.xlu0 %v1407_v33, %s4895_s5  ;;  %v4903_v33 = vmov 6  }
 0xe31   :  { %v1305_v34 = vpop.permute.xlu1 %1304 }
 0xe32   :  { %v1307_v36 = vmul.f32 %v1305_v34, %v1301_v8 }
 0xe34   :  { %1309 = vrot.lane.b32.xlu1 %v1307_v36, %s4895_s5 }
 0xea2   :  { %v1410_v5 = vpop.permute.xlu0 %1409 }
 0xea3   :  { %v5405_v39 = vadd.f32 %v1410_v5, %v1402_v38 }
 0xea5   :  { %4770 = vtanh.f32 %v5405_v39 }
 0xea6   :  { %v1310_v42 = vpop.permute.xlu1 %1309 }
 0xea7   :  { %v5409_v43 = vadd.f32 %v1310_v42, %v1302_v40 }
 0xea9   :  { %4772 = vtanh.f32 %v5409_v43 }
 0xeb2   :  { %v4771_v46 = vpop.eup %4770 }
 0xeb3   :  { %1415 = vrot.lane.b32.xlu0 %v4771_v46, %s4895_s5 }
 0xeb6   :  { %v4773_v49 = vpop.eup %4772 }
 0xeb7   :  { %1315 = vrot.lane.b32.xlu1 %v4773_v49, %s4895_s5 }
 0xf25   :  { %v1416_v44 = vpop.permute.xlu0 %1415 }
 0xf26   :  { %v1418_v51 = vmul.f32 %v1416_v44, %v1401_v29 }
 0xf28   :  { %1420 = vrot.lane.b32.xlu0 %v1418_v51, %s4897_s22 }
 0xf29   :  { %v1316_v52 = vpop.permute.xlu1 %1315 }
 0xf2a   :  { %v1318_v47 = vmul.f32 %v1316_v52, %v1301_v8 }
 0xf2c   :  { %1523 = vperm.xlu0 %4727, %v5052_v37   ;;  %1424 = vrot.lane.b32.xlu1 %v1318_v47, %s4899_s25 }
 0xf30   :  { %4728 = vset.pattern.permute.xlu0 %v4903_v33  ;;  %v5582_v33 = vld [vmem:[%s6102_s1 + $0xd0] sm:$0xff] }
 0xf9a   :  { %v1421_v48 = vpop.permute.xlu0 %1420 }
 0xf9b   :  { %4369 = vmatmul.mubr.msk.f32.vlgmr.msra.gmra.mxu0 %vm109_vm2, %v1421_v48 }
 0xf9c   :  { %4372 = vmatpush3.msra.mxu0 %v5072_v57  ;;  %4387 = vmatprep.mubr.msk.f32.mxu0 %vm4893_vm0, %v4892_v0 }
 0xf9d   :  { %4373 = vmatprep.subr.mxu0 %v4892_v0 }
 0xf9e   :  { %v1425_v53 = vpop.permute.xlu1 %1424  ;;  %4374 = vmatpush3.msra.mxu0 %v5077_v58 }
 0xf9f   :  { %v1427_v35 = vsel %vm109_vm2, %v1421_v48, %v1425_v53  ;;  %4375 = vmatprep.subr.mxu0 %v4892_v0 }
 0xfa0   :  { %4358 = vmatmul.mubr.msk.f32.vlgmr.msra.gmra.mxu1 %vm25_vm1, %v1427_v35  ;;  %4376 = vmatpush3.msra.mxu0 %v5085_v59 }
 0xfa1   :  { %4391 = vmatpush3.msra.mxu1 %v5007_v22  ;;  %4377 = vmatprep.subr.mxu0 %v4892_v0 }
 0xfa2   :  { %4392 = vmatprep.subr.mxu1 %v4892_v0  ;;  %4378 = vmatpush3.msra.mxu0 %v5095_v60 }
 0xfa3   :  { %4393 = vmatpush3.msra.mxu1 %v5014_v23  ;;  %4379 = vmatprep.subr.mxu0 %v4892_v0 }
 0xfa4   :  { %4394 = vmatprep.subr.mxu1 %v4892_v0  ;;  %4380 = vmatpush3.msra.mxu0 %v5103_v61 }
 0xfa5   :  { %4395 = vmatpush3.msra.mxu1 %v5022_v24  ;;  %4381 = vmatprep.subr.mxu0 %v4892_v0 }
 0xfa6   :  { %4396 = vmatprep.subr.mxu1 %v4892_v0  ;;  %4398 = vmatprep.mubr.msk.f32.mxu1 %vm4893_vm0, %v4892_v0 }
 0xfa7   :  { %4397 = vmatpush3.msra.mxu1 %v5027_v25  ;;  %4382 = vmatpush3.msra.mxu0 %v5112_v62  ;;  %v1524_v22 = vpop.permute.xlu0 %1523 }
 0xfa8   :  { %4383 = vmatprep.subr.mxu0 %v4892_v0  ;;  %4401 = vmatprep.subr.mxu1 %v4892_v0  ;;  %v1526_v23 = vmul.f32 %v5060_v41, %v1524_v22 }
 0xfa9   :  { %4384 = vmatpush3.msra.mxu0 %v5121_v63 }
 0xfaa   :  { %4385 = vmatprep.subr.mxu0 %v4892_v0  ;;  %v1527_v24 = vadd.f32 %v5275_v7, %v1526_v23 }
 0xfab   :  { %4386 = vmatpush3.msra.mxu0 %v5130_v1 }
 0xfac   :  { %4420 = vmatprep.subr.mxu0 %v4892_v0 }
0x105b   :  { %v1596_v25 = vpop.f32.mrf.mxu0 }
0x105c   :  { %v1600_v54 = vadd.f32 %v1596_v25, %v1527_v24 }
0x105d   :  { %v4370_v50 = vpop.f32.mrf.mxu0 }
0x105e   :  { %4774 = vtanh.f32 %v1600_v54 }
0x1060   :  { %v1497_v55 = vpop.f32.mrf.mxu1 }
0x1061   :  { %4776 = vtanh.f32 %v1497_v55 }
0x1062   :  { %v4359_v56 = vpop.f32.mrf.mxu1 }
0x106b   :  { %v4775_v32 = vpop.eup %4774 }
0x106c   :  { %1606 = vrot.lane.b32.xlu1 %v4775_v32, %s4895_s5  ;;  %v1602_v3 = vmul.f32 0.5, %v4775_v32 }
0x106e   :  { %v4777_v2 = vpop.eup %4776  ;;  %v1603_v4 = vadd.f32 0.5, %v1602_v3  ;;  %v4904_v3 = vmov 7  }
0x106f   :  { %v1502_v6 = vmul.f32 0.5, %v4777_v2 }
0x1070   :  { %1506 = vrot.lane.b32.xlu1 %v4777_v2, %s4895_s5  ;;  %v1604_v26 = vmul.f32 %v1603_v4, %v5405_v39 }
0x1071   :  { %v1503_v7 = vadd.f32 0.5, %v1502_v6 }
0x1073   :  { %v1504_v29 = vmul.f32 %v1503_v7, %v5409_v43 }
0x10de   :  { %v1607_v17 = vpop.permute.xlu1 %1606 }
0x10df   :  { %v1609_v41 = vmul.f32 %v1607_v17, %v1603_v4 }
0x10e1   :  { %1611 = vrot.lane.b32.xlu0 %v1609_v41, %s4895_s5 }
0x10e2   :  { %v1507_v19 = vpop.permute.xlu1 %1506 }
0x10e3   :  { %v1509_v21 = vmul.f32 %v1507_v19, %v1503_v7 }
0x10e5   :  { %1511 = vrot.lane.b32.xlu1 %v1509_v21, %s4895_s5 }
0x1153   :  { %v1612_v27 = vpop.permute.xlu0 %1611 }
0x1154   :  { %v5455_v28 = vadd.f32 %v1612_v27, %v1604_v26  ;;  %v5546_v26 = vld [vmem:[%s6102_s1 + $0xf0] sm:$0xff] }
0x1156   :  { %4778 = vtanh.f32 %v5455_v28 }
0x1157   :  { %v1512_v30 = vpop.permute.xlu1 %1511 }
0x1158   :  { %v5459_v31 = vadd.f32 %v1512_v30, %v1504_v29  ;;  %v5564_v30 = vld [vmem:[%s6102_s1 + $0xe0] sm:$0xff] }
0x115a   :  { %4780 = vtanh.f32 %v5459_v31 }
0x1163   :  { %v4779_v8 = vpop.eup %4778 }
0x1164   :  { %1617 = vrot.lane.b32.xlu0 %v4779_v8, %s4895_s5  ;;  %v5594_v8 = vld [vmem:[%s6102_s1 + $0xc8] sm:$0xff] }
0x1167   :  { %v4781_v34 = vpop.eup %4780 }
0x1168   :  { %1517 = vrot.lane.b32.xlu1 %v4781_v34, %s4895_s5  ;;  %v5602_v34 = vld [vmem:[%s6102_s1 + $0xc0] sm:$0xff] }
0x11d6   :  { %v1618_v36 = vpop.permute.xlu0 %1617 }
0x11d7   :  { %v1620_v38 = vmul.f32 %v1618_v36, %v1603_v4  ;;  %v5609_v36 = vld [vmem:[%s6102_s1 + $0xb8] sm:$0xff] }
0x11d9   :  { %1622 = vrot.lane.b32.xlu0 %v1620_v38, %s4897_s22 }
0x11da   :  { %v1518_v5 = vpop.permute.xlu1 %1517 }
0x11db   :  { %v1520_v39 = vmul.f32 %v1518_v5, %v1503_v7 }
0x11dd   :  { %1626 = vrot.lane.b32.xlu1 %v1520_v39, %s4899_s25  ;;  %1725 = vperm.xlu0 %4728, %v5052_v37  }
0x11e1   :  { %4729 = vset.pattern.permute.xlu0 %v4904_v3 }
0x124b   :  { %v1623_v40 = vpop.permute.xlu0 %1622 }
0x124c   :  { %4399 = vmatmul.mubr.msk.f32.vlgmr.msra.gmra.mxu1 %vm109_vm2, %v1623_v40 }
0x124d   :  { %4402 = vmatpush3.msra.mxu1 %v5072_v57  ;;  %4417 = vmatprep.mubr.msk.f32.mxu1 %vm4893_vm0, %v4892_v0  ;;  %v5480_v57 = vld [vmem:[%s6102_s1 + $0xb0] sm:$0xff] }
0x124e   :  { %4403 = vmatprep.subr.mxu1 %v4892_v0 }
0x124f   :  { %v1627_v42 = vpop.permute.xlu1 %1626  ;;  %4404 = vmatpush3.msra.mxu1 %v5077_v58  ;;  %v5489_v58 = vld [vmem:[%s6102_s1 + $0xa8] sm:$0xff] }
0x1250   :  { %v1629_v43 = vsel %vm109_vm2, %v1623_v40, %v1627_v42  ;;  %4405 = vmatprep.subr.mxu1 %v4892_v0 }
0x1251   :  { %4388 = vmatmul.mubr.msk.f32.vlgmr.msra.gmra.mxu0 %vm25_vm1, %v1629_v43  ;;  %4406 = vmatpush3.msra.mxu1 %v5085_v59  ;;  %v5498_v59 = vld [vmem:[%s6102_s1 + $0xa0] sm:$0xff] }
0x1252   :  { %4421 = vmatpush3.msra.mxu0 %v5480_v57  ;;  %4407 = vmatprep.subr.mxu1 %v4892_v0 }
0x1253   :  { %4422 = vmatprep.subr.mxu0 %v4892_v0  ;;  %4408 = vmatpush3.msra.mxu1 %v5095_v60  ;;  %v5508_v60 = vld [vmem:[%s6102_s1 + $0x98] sm:$0xff] }
0x1254   :  { %4423 = vmatpush3.msra.mxu0 %v5489_v58  ;;  %4409 = vmatprep.subr.mxu1 %v4892_v0 }
0x1255   :  { %4424 = vmatprep.subr.mxu0 %v4892_v0  ;;  %4410 = vmatpush3.msra.mxu1 %v5103_v61 }
0x1256   :  { %4425 = vmatpush3.msra.mxu0 %v5498_v59  ;;  %4411 = vmatprep.subr.mxu1 %v4892_v0 }
0x1257   :  { %4426 = vmatprep.subr.mxu0 %v4892_v0  ;;  %4428 = vmatprep.mubr.msk.f32.mxu0 %vm4893_vm0, %v4892_v0 }
0x1258   :  { %4427 = vmatpush3.msra.mxu0 %v5508_v60  ;;  %4412 = vmatpush3.msra.mxu1 %v5112_v62  ;;  %v1726_v61 = vpop.permute.xlu0 %1725 }
0x1259   :  { %4413 = vmatprep.subr.mxu1 %v4892_v0  ;;  %4431 = vmatprep.subr.mxu0 %v4892_v0  ;;  %v1728_v62 = vmul.f32 %v5521_v45, %v1726_v61 }
0x125a   :  { %4414 = vmatpush3.msra.mxu1 %v5121_v63 }
0x125b   :  { %4415 = vmatprep.subr.mxu1 %v4892_v0  ;;  %v1729_v46 = vadd.f32 %v1728_v62, %v5281_v10 }
0x125c   :  { %4416 = vmatpush3.msra.mxu1 %v5130_v1 }
0x125d   :  { %4450 = vmatprep.subr.mxu1 %v4892_v0 }
0x130c   :  { %v1798_v49 = vpop.f32.mrf.mxu1 }
0x130d   :  { %v1802_v44 = vadd.f32 %v1798_v49, %v1729_v46 }
0x130e   :  { %v4400_v51 = vpop.f32.mrf.mxu1 }
0x130f   :  { %4782 = vtanh.f32 %v1802_v44 }
0x1311   :  { %v1699_v63 = vpop.f32.mrf.mxu0 }
0x1312   :  { %4784 = vtanh.f32 %v1699_v63 }
0x1313   :  { %v4389_v52 = vpop.f32.mrf.mxu0 }
0x131c   :  { %v4783_v1 = vpop.eup %4782 }
0x131d   :  { %1808 = vrot.lane.b32.xlu1 %v4783_v1, %s4895_s5  ;;  %v1804_v48 = vmul.f32 0.5, %v4783_v1 }
0x131f   :  { %v4785_v47 = vpop.eup %4784  ;;  %v1805_v53 = vadd.f32 0.5, %v1804_v48 }
0x1320   :  { %v1704_v35 = vmul.f32 0.5, %v4785_v47 }
0x1321   :  { %1708 = vrot.lane.b32.xlu1 %v4785_v47, %s4895_s5  ;;  %v1806_v54 = vmul.f32 %v1805_v53, %v5455_v28  ;;  %v5555_v28 = vld [vmem:[%s6102_s1 + $0xe8] sm:$0xff] }
0x1322   :  { %v1705_v10 = vadd.f32 0.5, %v1704_v35 }
0x1324   :  { %v1706_v56 = vmul.f32 %v1705_v10, %v5459_v31  ;;  %v5573_v31 = vld [vmem:[%s6102_s1 + $0xd8] sm:$0xff] }
0x138f   :  { %v1809_v22 = vpop.permute.xlu1 %1808 }
0x1390   :  { %v1811_v23 = vmul.f32 %v1809_v22, %v1805_v53 }
0x1392   :  { %1813 = vrot.lane.b32.xlu0 %v1811_v23, %s4895_s5 }
0x1393   :  { %v1709_v24 = vpop.permute.xlu1 %1708 }
0x1394   :  { %v1711_v25 = vmul.f32 %v1709_v24, %v1705_v10 }
0x1396   :  { %1713 = vrot.lane.b32.xlu1 %v1711_v25, %s4895_s5  ;;  %v4905_v25 = vmov 8  }
0x1404   :  { %v1814_v50 = vpop.permute.xlu0 %1813 }
0x1405   :  { %v5530_v55 = vadd.f32 %v1814_v50, %v1806_v54 }
0x1407   :  { %4786 = vtanh.f32 %v5530_v55 }
0x1408   :  { %v1714_v32 = vpop.permute.xlu1 %1713 }
0x1409   :  { %v5534_v2 = vadd.f32 %v1714_v32, %v1706_v56 }
0x140b   :  { %4788 = vtanh.f32 %v5534_v2 }
0x1414   :  { %v4787_v4 = vpop.eup %4786 }
0x1415   :  { %1819 = vrot.lane.b32.xlu0 %v4787_v4, %s4895_s5 }
0x1418   :  { %v4789_v6 = vpop.eup %4788 }
0x1419   :  { %1719 = vrot.lane.b32.xlu1 %v4789_v6, %s4895_s5 }
0x1487   :  { %v1820_v17 = vpop.permute.xlu0 %1819 }
0x1488   :  { %v1822_v41 = vmul.f32 %v1820_v17, %v1805_v53 }
0x148a   :  { %1824 = vrot.lane.b32.xlu0 %v1822_v41, %s4897_s22 }
0x148b   :  { %v1720_v7 = vpop.permute.xlu1 %1719 }
0x148c   :  { %v1722_v19 = vmul.f32 %v1720_v7, %v1705_v10 }
0x148e   :  { %1927 = vperm.xlu0 %4729, %v5052_v37   ;;  %1828 = vrot.lane.b32.xlu1 %v1722_v19, %s4899_s25 }
0x1492   :  { %4730 = vset.pattern.permute.xlu0 %v4905_v25 }
0x14fc   :  { %v1825_v21 = vpop.permute.xlu0 %1824 }
0x14fd   :  { %4429 = vmatmul.mubr.msk.f32.vlgmr.msra.gmra.mxu0 %vm109_vm2, %v1825_v21 }
0x14fe   :  { %4432 = vmatpush3.msra.mxu0 %v5546_v26  ;;  %4447 = vmatprep.mubr.msk.f32.mxu0 %vm4893_vm0, %v4892_v0 }
0x14ff   :  { %4433 = vmatprep.subr.mxu0 %v4892_v0 }
0x1500   :  { %v1829_v27 = vpop.permute.xlu1 %1828  ;;  %4434 = vmatpush3.msra.mxu0 %v5555_v28 }
0x1501   :  { %v1831_v29 = vsel %vm109_vm2, %v1825_v21, %v1829_v27  ;;  %4435 = vmatprep.subr.mxu0 %v4892_v0 }
0x1502   :  { %4418 = vmatmul.mubr.msk.f32.vlgmr.msra.gmra.mxu1 %vm25_vm1, %v1831_v29  ;;  %4436 = vmatpush3.msra.mxu0 %v5564_v30 }
0x1503   :  { %4451 = vmatpush3.msra.mxu1 %v5480_v57  ;;  %4437 = vmatprep.subr.mxu0 %v4892_v0 }
0x1504   :  { %4452 = vmatprep.subr.mxu1 %v4892_v0  ;;  %4438 = vmatpush3.msra.mxu0 %v5573_v31 }
0x1505   :  { %4453 = vmatpush3.msra.mxu1 %v5489_v58  ;;  %4439 = vmatprep.subr.mxu0 %v4892_v0 }
0x1506   :  { %4454 = vmatprep.subr.mxu1 %v4892_v0  ;;  %4440 = vmatpush3.msra.mxu0 %v5582_v33 }
0x1507   :  { %4455 = vmatpush3.msra.mxu1 %v5498_v59  ;;  %4441 = vmatprep.subr.mxu0 %v4892_v0 }
0x1508   :  { %4456 = vmatprep.subr.mxu1 %v4892_v0  ;;  %4458 = vmatprep.mubr.msk.f32.mxu1 %vm4893_vm0, %v4892_v0 }
0x1509   :  { %4457 = vmatpush3.msra.mxu1 %v5508_v60  ;;  %4442 = vmatpush3.msra.mxu0 %v5594_v8  ;;  %v1928_v38 = vpop.permute.xlu0 %1927 }
0x150a   :  { %4443 = vmatprep.subr.mxu0 %v4892_v0  ;;  %4461 = vmatprep.subr.mxu1 %v4892_v0  ;;  %v1930_v5 = vmul.f32 %v5521_v45, %v1928_v38 }
0x150b   :  { %4444 = vmatpush3.msra.mxu0 %v5602_v34 }
0x150c   :  { %4445 = vmatprep.subr.mxu0 %v4892_v0  ;;  %v1931_v39 = vadd.f32 %v5279_v9, %v1930_v5 }
0x150d   :  { %4446 = vmatpush3.msra.mxu0 %v5609_v36 }
0x150e   :  { %4480 = vmatprep.subr.mxu0 %v4892_v0 }
0x15bd   :  { %v2000_v40 = vpop.f32.mrf.mxu0 }
0x15be   :  { %v2004_v42 = vadd.f32 %v2000_v40, %v1931_v39 }
0x15bf   :  { %v4430_v43 = vpop.f32.mrf.mxu0 }
0x15c0   :  { %4790 = vtanh.f32 %v2004_v42 }
0x15c2   :  { %v1901_v61 = vpop.f32.mrf.mxu1 }
0x15c3   :  { %4792 = vtanh.f32 %v1901_v61 }
0x15c4   :  { %v4419_v62 = vpop.f32.mrf.mxu1 }
0x15cd   :  { %v4791_v46 = vpop.eup %4790 }
0x15ce   :  { %2010 = vrot.lane.b32.xlu1 %v4791_v46, %s4895_s5  ;;  %v2006_v44 = vmul.f32 0.5, %v4791_v46 }
0x15d0   :  { %v4793_v49 = vpop.eup %4792  ;;  %v2007_v51 = vadd.f32 0.5, %v2006_v44 }
0x15d1   :  { %v1906_v63 = vmul.f32 0.5, %v4793_v49 }
0x15d2   :  { %1910 = vrot.lane.b32.xlu1 %v4793_v49, %s4895_s5  ;;  %v2008_v53 = vmul.f32 %v2007_v51, %v5530_v55 }
0x15d3   :  { %v1907_v9 = vadd.f32 0.5, %v1906_v63 }
0x15d5   :  { %v1908_v23 = vmul.f32 %v1907_v9, %v5534_v2 }
0x1640   :  { %v2011_v52 = vpop.permute.xlu1 %2010 }
0x1641   :  { %v2013_v1 = vmul.f32 %v2011_v52, %v2007_v51 }
0x1643   :  { %2015 = vrot.lane.b32.xlu0 %v2013_v1, %s4895_s5 }
0x1644   :  { %v1911_v47 = vpop.permute.xlu1 %1910 }
0x1645   :  { %v1913_v48 = vmul.f32 %v1911_v47, %v1907_v9  ;;  %v4906_v47 = vmov 9  }
0x1647   :  { %1915 = vrot.lane.b32.xlu1 %v1913_v48, %s4895_s5 }
0x16b5   :  { %v2016_v35 = vpop.permute.xlu0 %2015 }
0x16b6   :  { %v5620_v22 = vadd.f32 %v2016_v35, %v2008_v53 }
0x16b8   :  { %4794 = vtanh.f32 %v5620_v22 }
0x16b9   :  { %v1916_v10 = vpop.permute.xlu1 %1915 }
0x16ba   :  { %v5624_v24 = vadd.f32 %v1916_v10, %v1908_v23 }
0x16bc   :  { %4796 = vtanh.f32 %v5624_v24 }
0x16c5   :  { %v4795_v54 = vpop.eup %4794 }
0x16c6   :  { %2021 = vrot.lane.b32.xlu0 %v4795_v54, %s4895_s5 }
0x16c9   :  { %v4797_v50 = vpop.eup %4796 }
0x16ca   :  { %1921 = vrot.lane.b32.xlu1 %v4797_v50, %s4895_s5 }
0x1738   :  { %v2022_v55 = vpop.permute.xlu0 %2021 }
0x1739   :  { %v2024_v56 = vmul.f32 %v2022_v55, %v2007_v51 }
0x173b   :  { %2026 = vrot.lane.b32.xlu0 %v2024_v56, %s4897_s22 }
0x173c   :  { %v1922_v32 = vpop.permute.xlu1 %1921 }
0x173d   :  { %v1924_v3 = vmul.f32 %v1922_v32, %v1907_v9 }
0x173f   :  { %2030 = vrot.lane.b32.xlu1 %v1924_v3, %s4899_s25  ;;  %2129 = vperm.xlu0 %4730, %v5052_v37  }
0x1743   :  { %4731 = vset.pattern.permute.xlu0 %v4906_v47 }
0x17ad   :  { %v2027_v2 = vpop.permute.xlu0 %2026 }
0x17ae   :  { %4459 = vmatmul.mubr.msk.f32.vlgmr.msra.gmra.mxu1 %vm109_vm2, %v2027_v2 }
0x17af   :  { %4462 = vmatpush3.msra.mxu1 %v5546_v26  ;;  %4477 = vmatprep.mubr.msk.f32.mxu1 %vm4893_vm0, %v4892_v0 }
0x17b0   :  { %4463 = vmatprep.subr.mxu1 %v4892_v0 }
0x17b1   :  { %v2031_v4 = vpop.permute.xlu1 %2030  ;;  %4464 = vmatpush3.msra.mxu1 %v5555_v28 }
0x17b2   :  { %v2033_v6 = vsel %vm109_vm2, %v2027_v2, %v2031_v4  ;;  %4465 = vmatprep.subr.mxu1 %v4892_v0 }
0x17b3   :  { %4448 = vmatmul.mubr.msk.f32.vlgmr.msra.gmra.mxu0 %vm25_vm1, %v2033_v6  ;;  %4466 = vmatpush3.msra.mxu1 %v5564_v30 }
0x17b4   :  { %4481 = vmatpush3.msra.mxu0 %v5480_v57  ;;  %4467 = vmatprep.subr.mxu1 %v4892_v0 }
0x17b5   :  { %4482 = vmatprep.subr.mxu0 %v4892_v0  ;;  %4468 = vmatpush3.msra.mxu1 %v5573_v31 }
0x17b6   :  { %4483 = vmatpush3.msra.mxu0 %v5489_v58  ;;  %4469 = vmatprep.subr.mxu1 %v4892_v0 }
0x17b7   :  { %4484 = vmatprep.subr.mxu0 %v4892_v0  ;;  %4470 = vmatpush3.msra.mxu1 %v5582_v33 }
0x17b8   :  { %4485 = vmatpush3.msra.mxu0 %v5498_v59  ;;  %4471 = vmatprep.subr.mxu1 %v4892_v0 }
0x17b9   :  { %4486 = vmatprep.subr.mxu0 %v4892_v0  ;;  %4488 = vmatprep.mubr.msk.f32.mxu0 %vm4893_vm0, %v4892_v0 }
0x17ba   :  { %4487 = vmatpush3.msra.mxu0 %v5508_v60  ;;  %4472 = vmatpush3.msra.mxu1 %v5594_v8  ;;  %v2130_v17 = vpop.permute.xlu0 %2129 }
0x17bb   :  { %4473 = vmatprep.subr.mxu1 %v4892_v0  ;;  %4491 = vmatprep.subr.mxu0 %v4892_v0  ;;  %v2132_v41 = vmul.f32 %v5521_v45, %v2130_v17 }
0x17bc   :  { %4474 = vmatpush3.msra.mxu1 %v5602_v34 }
0x17bd   :  { %4475 = vmatprep.subr.mxu1 %v4892_v0  ;;  %v2133_v7 = vadd.f32 %v2132_v41, %v5285_v12 }
0x17be   :  { %4476 = vmatpush3.msra.mxu1 %v5609_v36 }
0x17bf   :  { %4510 = vmatprep.subr.mxu1 %v4892_v0 }
0x186e   :  { %v2202_v19 = vpop.f32.mrf.mxu1 }
0x186f   :  { %v2206_v21 = vadd.f32 %v2202_v19, %v2133_v7 }
0x1870   :  { %v4460_v27 = vpop.f32.mrf.mxu1 }
0x1871   :  { %4798 = vtanh.f32 %v2206_v21 }
0x1873   :  { %v2103_v29 = vpop.f32.mrf.mxu0 }
0x1874   :  { %4800 = vtanh.f32 %v2103_v29 }
0x1875   :  { %v4449_v38 = vpop.f32.mrf.mxu0 }
0x187e   :  { %v4799_v5 = vpop.eup %4798 }
0x187f   :  { %2212 = vrot.lane.b32.xlu1 %v4799_v5, %s4895_s5  ;;  %v2208_v40 = vmul.f32 0.5, %v4799_v5 }
0x1881   :  { %v4801_v39 = vpop.eup %4800  ;;  %v2209_v42 = vadd.f32 0.5, %v2208_v40 }
0x1882   :  { %v2108_v43 = vmul.f32 0.5, %v4801_v39 }
0x1883   :  { %2112 = vrot.lane.b32.xlu1 %v4801_v39, %s4895_s5  ;;  %v2210_v44 = vmul.f32 %v2209_v42, %v5620_v22 }
0x1884   :  { %v2109_v12 = vadd.f32 0.5, %v2108_v43 }
0x1886   :  { %v2110_v52 = vmul.f32 %v2109_v12, %v5624_v24 }
0x18f1   :  { %v2213_v61 = vpop.permute.xlu1 %2212 }
0x18f2   :  { %v2215_v62 = vmul.f32 %v2213_v61, %v2209_v42 }
0x18f4   :  { %2217 = vrot.lane.b32.xlu0 %v2215_v62, %s4895_s5 }
0x18f5   :  { %v2113_v46 = vpop.permute.xlu1 %2112 }
0x18f6   :  { %v2115_v49 = vmul.f32 %v2113_v46, %v2109_v12 }
0x18f8   :  { %2117 = vrot.lane.b32.xlu1 %v2115_v49, %s4895_s5 }
0x1966   :  { %v2218_v51 = vpop.permute.xlu0 %2217 }
0x1967   :  { %v5670_v63 = vadd.f32 %v2218_v51, %v2210_v44 }
0x1969   :  { %4802 = vtanh.f32 %v5670_v63 }
0x196a   :  { %v2118_v1 = vpop.permute.xlu1 %2117 }
0x196b   :  { %v5674_v9 = vadd.f32 %v2118_v1, %v2110_v52 }
0x196d   :  { %4804 = vtanh.f32 %v5674_v9 }
0x1976   :  { %v4803_v48 = vpop.eup %4802 }
0x1977   :  { %2223 = vrot.lane.b32.xlu0 %v4803_v48, %s4895_s5 }
0x197a   :  { %v4805_v53 = vpop.eup %4804 }
0x197b   :  { %2123 = vrot.lane.b32.xlu1 %v4805_v53, %s4895_s5 }
0x19e9   :  { %v2224_v35 = vpop.permute.xlu0 %2223 }
0x19ea   :  { %v2226_v22 = vmul.f32 %v2224_v35, %v2209_v42 }
0x19ec   :  { %2228 = vrot.lane.b32.xlu0 %v2226_v22, %s4897_s22 }
0x19ed   :  { %v2124_v23 = vpop.permute.xlu1 %2123 }
0x19ee   :  { %v2126_v10 = vmul.f32 %v2124_v23, %v2109_v12  ;;  %v4907_v12 = vmov 10  }
0x19f0   :  { %2331 = vperm.xlu0 %4731, %v5052_v37   ;;  %2232 = vrot.lane.b32.xlu1 %v2126_v10, %s4899_s25 }
0x19f4   :  { %4732 = vset.pattern.permute.xlu0 %v4907_v12 }
0x1a5e   :  { %v2229_v24 = vpop.permute.xlu0 %2228 }
0x1a5f   :  { %4489 = vmatmul.mubr.msk.f32.vlgmr.msra.gmra.mxu0 %vm109_vm2, %v2229_v24 }
0x1a60   :  { %4492 = vmatpush3.msra.mxu0 %v5546_v26  ;;  %4507 = vmatprep.mubr.msk.f32.mxu0 %vm4893_vm0, %v4892_v0 }
0x1a61   :  { %4493 = vmatprep.subr.mxu0 %v4892_v0 }
0x1a62   :  { %v2233_v25 = vpop.permute.xlu1 %2232  ;;  %4494 = vmatpush3.msra.mxu0 %v5555_v28 }
0x1a63   :  { %v2235_v54 = vsel %vm109_vm2, %v2229_v24, %v2233_v25  ;;  %4495 = vmatprep.subr.mxu0 %v4892_v0 }
0x1a64   :  { %4478 = vmatmul.mubr.msk.f32.vlgmr.msra.gmra.mxu1 %vm25_vm1, %v2235_v54  ;;  %4496 = vmatpush3.msra.mxu0 %v5564_v30 }
0x1a65   :  { %4511 = vmatpush3.msra.mxu1 %v5480_v57  ;;  %4497 = vmatprep.subr.mxu0 %v4892_v0 }
0x1a66   :  { %4512 = vmatprep.subr.mxu1 %v4892_v0  ;;  %4498 = vmatpush3.msra.mxu0 %v5573_v31 }
0x1a67   :  { %4513 = vmatpush3.msra.mxu1 %v5489_v58  ;;  %4499 = vmatprep.subr.mxu0 %v4892_v0 }
0x1a68   :  { %4514 = vmatprep.subr.mxu1 %v4892_v0  ;;  %4500 = vmatpush3.msra.mxu0 %v5582_v33 }
0x1a69   :  { %4515 = vmatpush3.msra.mxu1 %v5498_v59  ;;  %4501 = vmatprep.subr.mxu0 %v4892_v0 }
0x1a6a   :  { %4516 = vmatprep.subr.mxu1 %v4892_v0  ;;  %4518 = vmatprep.mubr.msk.f32.mxu1 %vm4893_vm0, %v4892_v0 }
0x1a6b   :  { %4517 = vmatpush3.msra.mxu1 %v5508_v60  ;;  %4502 = vmatpush3.msra.mxu0 %v5594_v8  ;;  %v2332_v50 = vpop.permute.xlu0 %2331 }
0x1a6c   :  { %4503 = vmatprep.subr.mxu0 %v4892_v0  ;;  %4521 = vmatprep.subr.mxu1 %v4892_v0  ;;  %v2334_v55 = vmul.f32 %v5521_v45, %v2332_v50 }
0x1a6d   :  { %4504 = vmatpush3.msra.mxu0 %v5602_v34 }
0x1a6e   :  { %4505 = vmatprep.subr.mxu0 %v4892_v0  ;;  %v2335_v56 = vadd.f32 %v5283_v11, %v2334_v55 }
0x1a6f   :  { %4506 = vmatpush3.msra.mxu0 %v5609_v36 }
0x1a70   :  { %4540 = vmatprep.subr.mxu0 %v4892_v0 }
0x1b1f   :  { %v2404_v32 = vpop.f32.mrf.mxu0 }
0x1b20   :  { %v2408_v3 = vadd.f32 %v2404_v32, %v2335_v56 }
0x1b21   :  { %v4490_v2 = vpop.f32.mrf.mxu0 }
0x1b22   :  { %4806 = vtanh.f32 %v2408_v3 }
0x1b24   :  { %v2305_v4 = vpop.f32.mrf.mxu1 }
0x1b25   :  { %4808 = vtanh.f32 %v2305_v4 }
0x1b26   :  { %v4479_v6 = vpop.f32.mrf.mxu1 }
0x1b2f   :  { %v4807_v17 = vpop.eup %4806 }
0x1b30   :  { %2414 = vrot.lane.b32.xlu1 %v4807_v17, %s4895_s5  ;;  %v2410_v7 = vmul.f32 0.5, %v4807_v17 }
0x1b32   :  { %v4809_v41 = vpop.eup %4808  ;;  %v2411_v19 = vadd.f32 0.5, %v2410_v7 }
0x1b33   :  { %v2310_v21 = vmul.f32 0.5, %v4809_v41 }
0x1b34   :  { %2314 = vrot.lane.b32.xlu1 %v4809_v41, %s4895_s5  ;;  %v2412_v39 = vmul.f32 %v2411_v19, %v5670_v63 }
0x1b35   :  { %v2311_v11 = vadd.f32 0.5, %v2310_v21 }
0x1b37   :  { %v2312_v43 = vmul.f32 %v2311_v11, %v5674_v9 }
0x1ba2   :  { %v2415_v27 = vpop.permute.xlu1 %2414 }
0x1ba3   :  { %v2417_v29 = vmul.f32 %v2415_v27, %v2411_v19 }
0x1ba5   :  { %2419 = vrot.lane.b32.xlu0 %v2417_v29, %s4895_s5  ;;  %v4908_v29 = vmov 11  }
0x1ba6   :  { %v2315_v38 = vpop.permute.xlu1 %2314 }
0x1ba7   :  { %v2317_v5 = vmul.f32 %v2315_v38, %v2311_v11 }
0x1ba9   :  { %2319 = vrot.lane.b32.xlu1 %v2317_v5, %s4895_s5 }
0x1c17   :  { %v2420_v40 = vpop.permute.xlu0 %2419 }
0x1c18   :  { %v5720_v42 = vadd.f32 %v2420_v40, %v2412_v39 }
0x1c1a   :  { %4810 = vtanh.f32 %v5720_v42 }
0x1c1b   :  { %v2320_v61 = vpop.permute.xlu1 %2319 }
0x1c1c   :  { %v5724_v62 = vadd.f32 %v2320_v61, %v2312_v43 }
0x1c1e   :  { %4812 = vtanh.f32 %v5724_v62 }
0x1c27   :  { %v4811_v46 = vpop.eup %4810 }
0x1c28   :  { %2425 = vrot.lane.b32.xlu0 %v4811_v46, %s4895_s5 }
0x1c2b   :  { %v4813_v49 = vpop.eup %4812 }
0x1c2c   :  { %2325 = vrot.lane.b32.xlu1 %v4813_v49, %s4895_s5 }
0x1c9a   :  { %v2426_v44 = vpop.permute.xlu0 %2425 }
0x1c9b   :  { %v2428_v51 = vmul.f32 %v2426_v44, %v2411_v19 }
0x1c9d   :  { %2430 = vrot.lane.b32.xlu0 %v2428_v51, %s4897_s22 }
0x1c9e   :  { %v2326_v63 = vpop.permute.xlu1 %2325 }
0x1c9f   :  { %v2328_v52 = vmul.f32 %v2326_v63, %v2311_v11 }
0x1ca1   :  { %2434 = vrot.lane.b32.xlu1 %v2328_v52, %s4899_s25  ;;  %2533 = vperm.xlu0 %4732, %v5052_v37  }
0x1ca5   :  { %4733 = vset.pattern.permute.xlu0 %v4908_v29 }
0x1d0f   :  { %v2431_v1 = vpop.permute.xlu0 %2430 }
0x1d10   :  { %4519 = vmatmul.mubr.msk.f32.vlgmr.msra.gmra.mxu1 %vm109_vm2, %v2431_v1 }
0x1d11   :  { %4522 = vmatpush3.msra.mxu1 %v5546_v26  ;;  %4537 = vmatprep.mubr.msk.f32.mxu1 %vm4893_vm0, %v4892_v0 }
0x1d12   :  { %4523 = vmatprep.subr.mxu1 %v4892_v0 }
0x1d13   :  { %v2435_v9 = vpop.permute.xlu1 %2434  ;;  %4524 = vmatpush3.msra.mxu1 %v5555_v28 }
0x1d14   :  { %v2437_v47 = vsel %vm109_vm2, %v2431_v1, %v2435_v9  ;;  %4525 = vmatprep.subr.mxu1 %v4892_v0 }
0x1d15   :  { %4508 = vmatmul.mubr.msk.f32.vlgmr.msra.gmra.mxu0 %vm25_vm1, %v2437_v47  ;;  %4526 = vmatpush3.msra.mxu1 %v5564_v30 }
0x1d16   :  { %4541 = vmatpush3.msra.mxu0 %v5480_v57  ;;  %4527 = vmatprep.subr.mxu1 %v4892_v0 }
0x1d17   :  { %4542 = vmatprep.subr.mxu0 %v4892_v0  ;;  %4528 = vmatpush3.msra.mxu1 %v5573_v31 }
0x1d18   :  { %4543 = vmatpush3.msra.mxu0 %v5489_v58  ;;  %4529 = vmatprep.subr.mxu1 %v4892_v0 }
0x1d19   :  { %4544 = vmatprep.subr.mxu0 %v4892_v0  ;;  %4530 = vmatpush3.msra.mxu1 %v5582_v33 }
0x1d1a   :  { %4545 = vmatpush3.msra.mxu0 %v5498_v59  ;;  %4531 = vmatprep.subr.mxu1 %v4892_v0 }
0x1d1b   :  { %4546 = vmatprep.subr.mxu0 %v4892_v0  ;;  %4548 = vmatprep.mubr.msk.f32.mxu0 %vm4893_vm0, %v4892_v0 }
0x1d1c   :  { %4547 = vmatpush3.msra.mxu0 %v5508_v60  ;;  %4532 = vmatpush3.msra.mxu1 %v5594_v8  ;;  %v2534_v48 = vpop.permute.xlu0 %2533 }
0x1d1d   :  { %4533 = vmatprep.subr.mxu1 %v4892_v0  ;;  %4551 = vmatprep.subr.mxu0 %v4892_v0  ;;  %v2536_v53 = vmul.f32 %v5521_v45, %v2534_v48 }
0x1d1e   :  { %4534 = vmatpush3.msra.mxu1 %v5602_v34 }
0x1d1f   :  { %4535 = vmatprep.subr.mxu1 %v4892_v0  ;;  %v2537_v35 = vadd.f32 %v2536_v53, %v5289_v14 }
0x1d20   :  { %4536 = vmatpush3.msra.mxu1 %v5609_v36 }
0x1d21   :  { %4570 = vmatprep.subr.mxu1 %v4892_v0 }
0x1dd0   :  { %v2606_v22 = vpop.f32.mrf.mxu1 }
0x1dd1   :  { %v2610_v23 = vadd.f32 %v2606_v22, %v2537_v35 }
0x1dd2   :  { %v4520_v10 = vpop.f32.mrf.mxu1 }
0x1dd3   :  { %4814 = vtanh.f32 %v2610_v23 }
0x1dd5   :  { %v2507_v24 = vpop.f32.mrf.mxu0 }
0x1dd6   :  { %4816 = vtanh.f32 %v2507_v24 }
0x1dd7   :  { %v4509_v25 = vpop.f32.mrf.mxu0 }
0x1de0   :  { %v4815_v54 = vpop.eup %4814 }
0x1de1   :  { %2616 = vrot.lane.b32.xlu1 %v4815_v54, %s4895_s5  ;;  %v2612_v55 = vmul.f32 0.5, %v4815_v54 }
0x1de3   :  { %v4817_v50 = vpop.eup %4816  ;;  %v2613_v56 = vadd.f32 0.5, %v2612_v55 }
0x1de4   :  { %v2512_v32 = vmul.f32 0.5, %v4817_v50 }
0x1de5   :  { %2516 = vrot.lane.b32.xlu1 %v4817_v50, %s4895_s5  ;;  %v2614_v17 = vmul.f32 %v2613_v56, %v5720_v42 }
0x1de6   :  { %v2513_v14 = vadd.f32 0.5, %v2512_v32 }
0x1de8   :  { %v2514_v19 = vmul.f32 %v2513_v14, %v5724_v62 }
0x1e53   :  { %v2617_v3 = vpop.permute.xlu1 %2616 }
0x1e54   :  { %v2619_v2 = vmul.f32 %v2617_v3, %v2613_v56  ;;  %v4909_v3 = vmov 12  }
0x1e56   :  { %2621 = vrot.lane.b32.xlu0 %v2619_v2, %s4895_s5 }
0x1e57   :  { %v2517_v4 = vpop.permute.xlu1 %2516 }
0x1e58   :  { %v2519_v6 = vmul.f32 %v2517_v4, %v2513_v14 }
0x1e5a   :  { %2521 = vrot.lane.b32.xlu1 %v2519_v6, %s4895_s5 }
0x1ec8   :  { %v2622_v41 = vpop.permute.xlu0 %2621 }
0x1ec9   :  { %v5770_v7 = vadd.f32 %v2622_v41, %v2614_v17 }
0x1ecb   :  { %4818 = vtanh.f32 %v5770_v7 }
0x1ecc   :  { %v2522_v21 = vpop.permute.xlu1 %2521 }
0x1ecd   :  { %v5774_v27 = vadd.f32 %v2522_v21, %v2514_v19 }
0x1ecf   :  { %4820 = vtanh.f32 %v5774_v27 }
0x1ed8   :  { %v4819_v11 = vpop.eup %4818 }
0x1ed9   :  { %2627 = vrot.lane.b32.xlu0 %v4819_v11, %s4895_s5 }
0x1edc   :  { %v4821_v38 = vpop.eup %4820 }
0x1edd   :  { %2527 = vrot.lane.b32.xlu1 %v4821_v38, %s4895_s5 }
0x1f4b   :  { %v2628_v5 = vpop.permute.xlu0 %2627 }
0x1f4c   :  { %v2630_v39 = vmul.f32 %v2628_v5, %v2613_v56 }
0x1f4e   :  { %2632 = vrot.lane.b32.xlu0 %v2630_v39, %s4897_s22 }
0x1f4f   :  { %v2528_v40 = vpop.permute.xlu1 %2527 }
0x1f50   :  { %v2530_v42 = vmul.f32 %v2528_v40, %v2513_v14 }
0x1f52   :  { %2735 = vperm.xlu0 %4733, %v5052_v37   ;;  %2636 = vrot.lane.b32.xlu1 %v2530_v42, %s4899_s25 }
0x1f56   :  { %4734 = vset.pattern.permute.xlu0 %v4909_v3 }
0x1fc0   :  { %v2633_v43 = vpop.permute.xlu0 %2632 }
0x1fc1   :  { %4549 = vmatmul.mubr.msk.f32.vlgmr.msra.gmra.mxu0 %vm109_vm2, %v2633_v43 }
0x1fc2   :  { %4552 = vmatpush3.msra.mxu0 %v5546_v26  ;;  %4567 = vmatprep.mubr.msk.f32.mxu0 %vm4893_vm0, %v4892_v0 }
0x1fc3   :  { %4553 = vmatprep.subr.mxu0 %v4892_v0 }
0x1fc4   :  { %v2637_v61 = vpop.permute.xlu1 %2636  ;;  %4554 = vmatpush3.msra.mxu0 %v5555_v28 }
0x1fc5   :  { %v2639_v62 = vsel %vm109_vm2, %v2633_v43, %v2637_v61  ;;  %4555 = vmatprep.subr.mxu0 %v4892_v0 }
0x1fc6   :  { %4538 = vmatmul.mubr.msk.f32.vlgmr.msra.gmra.mxu1 %vm25_vm1, %v2639_v62  ;;  %4556 = vmatpush3.msra.mxu0 %v5564_v30 }
0x1fc7   :  { %4571 = vmatpush3.msra.mxu1 %v5480_v57  ;;  %4557 = vmatprep.subr.mxu0 %v4892_v0 }
0x1fc8   :  { %4572 = vmatprep.subr.mxu1 %v4892_v0  ;;  %4558 = vmatpush3.msra.mxu0 %v5573_v31 }
0x1fc9   :  { %4573 = vmatpush3.msra.mxu1 %v5489_v58  ;;  %4559 = vmatprep.subr.mxu0 %v4892_v0 }
0x1fca   :  { %4574 = vmatprep.subr.mxu1 %v4892_v0  ;;  %4560 = vmatpush3.msra.mxu0 %v5582_v33 }
0x1fcb   :  { %4575 = vmatpush3.msra.mxu1 %v5498_v59  ;;  %4561 = vmatprep.subr.mxu0 %v4892_v0 }
0x1fcc   :  { %4576 = vmatprep.subr.mxu1 %v4892_v0  ;;  %4578 = vmatprep.mubr.msk.f32.mxu1 %vm4893_vm0, %v4892_v0 }
0x1fcd   :  { %4577 = vmatpush3.msra.mxu1 %v5508_v60  ;;  %4562 = vmatpush3.msra.mxu0 %v5594_v8  ;;  %v2736_v12 = vpop.permute.xlu0 %2735 }
0x1fce   :  { %4563 = vmatprep.subr.mxu0 %v4892_v0  ;;  %4581 = vmatprep.subr.mxu1 %v4892_v0  ;;  %v2738_v46 = vmul.f32 %v5521_v45, %v2736_v12 }
0x1fcf   :  { %4564 = vmatpush3.msra.mxu0 %v5602_v34 }
0x1fd0   :  { %4565 = vmatprep.subr.mxu0 %v4892_v0  ;;  %v2739_v49 = vadd.f32 %v5287_v13, %v2738_v46 }
0x1fd1   :  { %4566 = vmatpush3.msra.mxu0 %v5609_v36 }
0x1fd2   :  { %4600 = vmatprep.subr.mxu0 %v4892_v0 }
0x2081   :  { %v2808_v44 = vpop.f32.mrf.mxu0 }
0x2082   :  { %v2812_v51 = vadd.f32 %v2808_v44, %v2739_v49 }
0x2083   :  { %v4550_v63 = vpop.f32.mrf.mxu0 }
0x2084   :  { %4822 = vtanh.f32 %v2812_v51 }
0x2086   :  { %v2709_v52 = vpop.f32.mrf.mxu1 }
0x2087   :  { %4824 = vtanh.f32 %v2709_v52 }
0x2088   :  { %v4539_v1 = vpop.f32.mrf.mxu1 }
0x2089   :  { %v4910_v1 = vmov 13  }
0x2091   :  { %v4823_v9 = vpop.eup %4822 }
0x2092   :  { %2818 = vrot.lane.b32.xlu1 %v4823_v9, %s4895_s5  ;;  %v2814_v48 = vmul.f32 0.5, %v4823_v9 }
0x2094   :  { %v4825_v47 = vpop.eup %4824  ;;  %v2815_v53 = vadd.f32 0.5, %v2814_v48 }
0x2095   :  { %v2714_v35 = vmul.f32 0.5, %v4825_v47 }
0x2096   :  { %2718 = vrot.lane.b32.xlu1 %v4825_v47, %s4895_s5  ;;  %v2816_v25 = vmul.f32 %v2815_v53, %v5770_v7 }
0x2097   :  { %v2715_v13 = vadd.f32 0.5, %v2714_v35 }
0x2099   :  { %v2716_v55 = vmul.f32 %v2715_v13, %v5774_v27 }
0x2104   :  { %v2819_v22 = vpop.permute.xlu1 %2818 }
0x2105   :  { %v2821_v23 = vmul.f32 %v2819_v22, %v2815_v53 }
0x2107   :  { %2823 = vrot.lane.b32.xlu0 %v2821_v23, %s4895_s5 }
0x2108   :  { %v2719_v10 = vpop.permute.xlu1 %2718 }
0x2109   :  { %v2721_v24 = vmul.f32 %v2719_v10, %v2715_v13 }
0x210b   :  { %2723 = vrot.lane.b32.xlu1 %v2721_v24, %s4895_s5  ;;  %v5936_v24 = vld [vmem:[%s6102_s1 + $0x90] ss:$0 sm:$0xff] }
0x2179   :  { %v2824_v54 = vpop.permute.xlu0 %2823 }
0x217a   :  { %v5820_v50 = vadd.f32 %v2824_v54, %v2816_v25 }
0x217c   :  { %4826 = vtanh.f32 %v5820_v50 }
0x217d   :  { %v2724_v56 = vpop.permute.xlu1 %2723 }
0x217e   :  { %v5824_v32 = vadd.f32 %v2724_v56, %v2716_v55 }
0x2180   :  { %4828 = vtanh.f32 %v5824_v32 }
0x2189   :  { %v4827_v2 = vpop.eup %4826 }
0x218a   :  { %2829 = vrot.lane.b32.xlu0 %v4827_v2, %s4895_s5 }
0x218d   :  { %v4829_v14 = vpop.eup %4828 }
0x218e   :  { %2729 = vrot.lane.b32.xlu1 %v4829_v14, %s4895_s5 }
0x21fc   :  { %v2830_v4 = vpop.permute.xlu0 %2829 }
0x21fd   :  { %v2832_v6 = vmul.f32 %v2830_v4, %v2815_v53 }
0x21ff   :  { %2834 = vrot.lane.b32.xlu0 %v2832_v6, %s4897_s22 }
0x2200   :  { %v2730_v17 = vpop.permute.xlu1 %2729 }
0x2201   :  { %v2732_v41 = vmul.f32 %v2730_v17, %v2715_v13 }
0x2203   :  { %2838 = vrot.lane.b32.xlu1 %v2732_v41, %s4899_s25  ;;  %2937 = vperm.xlu0 %4734, %v5052_v37  }
0x2207   :  { %4735 = vset.pattern.permute.xlu0 %v4910_v1 }
0x2271   :  { %v2835_v7 = vpop.permute.xlu0 %2834 }
0x2272   :  { %4579 = vmatmul.mubr.msk.f32.vlgmr.msra.gmra.mxu1 %vm109_vm2, %v2835_v7 }
0x2273   :  { %4582 = vmatpush3.msra.mxu1 %v5546_v26  ;;  %4597 = vmatprep.mubr.msk.f32.mxu1 %vm4893_vm0, %v4892_v0 }
0x2274   :  { %4583 = vmatprep.subr.mxu1 %v4892_v0 }
0x2275   :  { %v2839_v19 = vpop.permute.xlu1 %2838  ;;  %4584 = vmatpush3.msra.mxu1 %v5555_v28 }
0x2276   :  { %v2841_v21 = vsel %vm109_vm2, %v2835_v7, %v2839_v19  ;;  %4585 = vmatprep.subr.mxu1 %v4892_v0 }
0x2277   :  { %4568 = vmatmul.mubr.msk.f32.vlgmr.msra.gmra.mxu0 %vm25_vm1, %v2841_v21  ;;  %4586 = vmatpush3.msra.mxu1 %v5564_v30 }
0x2278   :  { %4601 = vmatpush3.msra.mxu0 %v5480_v57  ;;  %4587 = vmatprep.subr.mxu1 %v4892_v0 }
0x2279   :  { %4602 = vmatprep.subr.mxu0 %v4892_v0  ;;  %4588 = vmatpush3.msra.mxu1 %v5573_v31 }
0x227a   :  { %4603 = vmatpush3.msra.mxu0 %v5489_v58  ;;  %4589 = vmatprep.subr.mxu1 %v4892_v0 }
0x227b   :  { %4604 = vmatprep.subr.mxu0 %v4892_v0  ;;  %4590 = vmatpush3.msra.mxu1 %v5582_v33 }
0x227c   :  { %4605 = vmatpush3.msra.mxu0 %v5498_v59  ;;  %4591 = vmatprep.subr.mxu1 %v4892_v0 }
0x227d   :  { %4606 = vmatprep.subr.mxu0 %v4892_v0  ;;  %4608 = vmatprep.mubr.msk.f32.mxu0 %vm4893_vm0, %v4892_v0 }
0x227e   :  { %4607 = vmatpush3.msra.mxu0 %v5508_v60  ;;  %4592 = vmatpush3.msra.mxu1 %v5594_v8  ;;  %v2938_v57 = vpop.permute.xlu0 %2937 }
0x227f   :  { %4593 = vmatprep.subr.mxu1 %v4892_v0  ;;  %4611 = vmatprep.subr.mxu0 %v4892_v0  ;;  %v2940_v58 = vmul.f32 %v5521_v45, %v2938_v57 }
0x2280   :  { %4594 = vmatpush3.msra.mxu1 %v5602_v34 }
0x2281   :  { %4595 = vmatprep.subr.mxu1 %v4892_v0  ;;  %v2941_v59 = vadd.f32 %v2940_v58, %v5293_v16 }
0x2282   :  { %4596 = vmatpush3.msra.mxu1 %v5609_v36 }
0x2283   :  { %4630 = vmatprep.subr.mxu1 %v4892_v0 }
0x2332   :  { %v3010_v60 = vpop.f32.mrf.mxu1 }
0x2333   :  { %v3014_v27 = vadd.f32 %v3010_v60, %v2941_v59  ;;  %v4911_v60 = vmov 14  }
0x2334   :  { %v4580_v29 = vpop.f32.mrf.mxu1 }
0x2335   :  { %4830 = vtanh.f32 %v3014_v27 }
0x2337   :  { %v2911_v11 = vpop.f32.mrf.mxu0 }
0x2338   :  { %4832 = vtanh.f32 %v2911_v11 }
0x2339   :  { %v4569_v38 = vpop.f32.mrf.mxu0 }
0x2342   :  { %v4831_v5 = vpop.eup %4830 }
0x2343   :  { %3020 = vrot.lane.b32.xlu1 %v4831_v5, %s4895_s5  ;;  %v3016_v40 = vmul.f32 0.5, %v4831_v5 }
0x2345   :  { %v4833_v39 = vpop.eup %4832  ;;  %v3017_v42 = vadd.f32 0.5, %v3016_v40 }
0x2346   :  { %v2916_v43 = vmul.f32 0.5, %v4833_v39 }
0x2347   :  { %2920 = vrot.lane.b32.xlu1 %v4833_v39, %s4895_s5  ;;  %v3018_v46 = vmul.f32 %v3017_v42, %v5820_v50 }
0x2348   :  { %v2917_v16 = vadd.f32 0.5, %v2916_v43 }
0x234a   :  { %v2918_v51 = vmul.f32 %v2917_v16, %v5824_v32 }
0x23b5   :  { %v3021_v61 = vpop.permute.xlu1 %3020 }
0x23b6   :  { %v3023_v45 = vmul.f32 %v3021_v61, %v3017_v42  ;;  %v5970_v61 = vld [vmem:[%s6102_s1 + $0xe8] sm:$0xff] }
0x23b8   :  { %3025 = vrot.lane.b32.xlu0 %v3023_v45, %s4895_s5 }
0x23b9   :  { %v2921_v62 = vpop.permute.xlu1 %2920 }
0x23ba   :  { %v2923_v12 = vmul.f32 %v2921_v62, %v2917_v16  ;;  %v5988_v62 = vld [vmem:[%s6102_s1 + $0xd8] sm:$0xff] }
0x23bc   :  { %2925 = vrot.lane.b32.xlu1 %v2923_v12, %s4895_s5  ;;  %v5997_v12 = vld [vmem:[%s6102_s1 + $0xd0] sm:$0xff] }
0x242a   :  { %v3026_v49 = vpop.permute.xlu0 %3025 }
0x242b   :  { %v5870_v44 = vadd.f32 %v3026_v49, %v3018_v46  ;;  %v6009_v46 = vld [vmem:[%s6102_s1 + $0xc8] sm:$0xff]  ;;  %v6017_v49 = vld [vmem:[%s6102_s1 + $0xc0] sm:$0xff] }
0x242d   :  { %4834 = vtanh.f32 %v5870_v44 }
0x242e   :  { %v2926_v63 = vpop.permute.xlu1 %2925 }
0x242f   :  { %v5874_v52 = vadd.f32 %v2926_v63, %v2918_v51 }
0x2431   :  { %4836 = vtanh.f32 %v5874_v52 }
0x243a   :  { %v4835_v9 = vpop.eup %4834 }
0x243b   :  { %3031 = vrot.lane.b32.xlu0 %v4835_v9, %s4895_s5 }
0x243e   :  { %v4837_v47 = vpop.eup %4836 }
0x243f   :  { %2931 = vrot.lane.b32.xlu1 %v4837_v47, %s4895_s5 }
0x24ad   :  { %v3032_v48 = vpop.permute.xlu0 %3031 }
0x24ae   :  { %v3034_v53 = vmul.f32 %v3032_v48, %v3017_v42  ;;  %v5961_v42 = vld [vmem:[%s6102_s1 + $0xf0] sm:$0xff] }
0x24b0   :  { %3036 = vrot.lane.b32.xlu0 %v3034_v53, %s4897_s22 }
0x24b1   :  { %v2932_v35 = vpop.permute.xlu1 %2931 }
0x24b2   :  { %v2934_v22 = vmul.f32 %v2932_v35, %v2917_v16  ;;  %v5979_v16 = vld [vmem:[%s6102_s1 + $0xe0] sm:$0xff] }
0x24b4   :  { %3139 = vperm.xlu0 %4735, %v5052_v37   ;;  %3040 = vrot.lane.b32.xlu1 %v2934_v22, %s4899_s25 }
0x24b8   :  { %4736 = vset.pattern.permute.xlu0 %v4911_v60 }
0x2522   :  { %v3037_v23 = vpop.permute.xlu0 %3036 }
0x2523   :  { %4609 = vmatmul.mubr.msk.f32.vlgmr.msra.gmra.mxu0 %vm109_vm2, %v3037_v23 }
0x2524   :  { %4612 = vmatpush3.msra.mxu0 %v5546_v26  ;;  %4627 = vmatprep.mubr.msk.f32.mxu0 %vm4893_vm0, %v4892_v0  ;;  %v5895_v26 = vld [vmem:[%s6102_s1 + $0xb0] sm:$0xff] }
0x2525   :  { %4613 = vmatprep.subr.mxu0 %v4892_v0 }
0x2526   :  { %v3041_v13 = vpop.permute.xlu1 %3040  ;;  %4614 = vmatpush3.msra.mxu0 %v5555_v28  ;;  %v5904_v28 = vld [vmem:[%s6102_s1 + $0xa8] sm:$0xff] }
0x2527   :  { %v3043_v10 = vsel %vm109_vm2, %v3037_v23, %v3041_v13  ;;  %4615 = vmatprep.subr.mxu0 %v4892_v0 }
0x2528   :  { %4598 = vmatmul.mubr.msk.f32.vlgmr.msra.gmra.mxu1 %vm25_vm1, %v3043_v10  ;;  %4616 = vmatpush3.msra.mxu0 %v5564_v30  ;;  %v5913_v30 = vld [vmem:[%s6102_s1 + $0xa0] sm:$0xff] }
0x2529   :  { %4631 = vmatpush3.msra.mxu1 %v5895_v26  ;;  %4617 = vmatprep.subr.mxu0 %v4892_v0 }
0x252a   :  { %4632 = vmatprep.subr.mxu1 %v4892_v0  ;;  %4618 = vmatpush3.msra.mxu0 %v5573_v31  ;;  %v5923_v31 = vld [vmem:[%s6102_s1 + $0x98] sm:$0xff] }
0x252b   :  { %4633 = vmatpush3.msra.mxu1 %v5904_v28  ;;  %4619 = vmatprep.subr.mxu0 %v4892_v0 }
0x252c   :  { %4634 = vmatprep.subr.mxu1 %v4892_v0  ;;  %4620 = vmatpush3.msra.mxu0 %v5582_v33 }
0x252d   :  { %4635 = vmatpush3.msra.mxu1 %v5913_v30  ;;  %4621 = vmatprep.subr.mxu0 %v4892_v0 }
0x252e   :  { %4636 = vmatprep.subr.mxu1 %v4892_v0  ;;  %4638 = vmatprep.mubr.msk.f32.mxu1 %vm4893_vm0, %v4892_v0 }
0x252f   :  { %4637 = vmatpush3.msra.mxu1 %v5923_v31  ;;  %4622 = vmatpush3.msra.mxu0 %v5594_v8  ;;  %v3140_v33 = vpop.permute.xlu0 %3139 }
0x2530   :  { %4623 = vmatprep.subr.mxu0 %v4892_v0  ;;  %4641 = vmatprep.subr.mxu1 %v4892_v0  ;;  %v3142_v8 = vmul.f32 %v5936_v24, %v3140_v33 }
0x2531   :  { %4624 = vmatpush3.msra.mxu0 %v5602_v34 }
0x2532   :  { %4625 = vmatprep.subr.mxu0 %v4892_v0  ;;  %v3143_v25 = vadd.f32 %v5291_v15, %v3142_v8 }
0x2533   :  { %4626 = vmatpush3.msra.mxu0 %v5609_v36 }
0x2534   :  { %4660 = vmatprep.subr.mxu0 %v4892_v0 }
0x25e3   :  { %v3212_v54 = vpop.f32.mrf.mxu0 }
0x25e4   :  { %v3216_v50 = vadd.f32 %v3212_v54, %v3143_v25 }
0x25e5   :  { %v4610_v55 = vpop.f32.mrf.mxu0 }
0x25e6   :  { %4838 = vtanh.f32 %v3216_v50 }
0x25e8   :  { %v3113_v34 = vpop.f32.mrf.mxu1 }
0x25e9   :  { %4840 = vtanh.f32 %v3113_v34  ;;  %v4912_v34 = vmov 15  }
0x25ea   :  { %v4599_v56 = vpop.f32.mrf.mxu1 }
0x25f3   :  { %v4839_v36 = vpop.eup %4838 }
0x25f4   :  { %3222 = vrot.lane.b32.xlu1 %v4839_v36, %s4895_s5  ;;  %v3218_v3 = vmul.f32 0.5, %v4839_v36 }
0x25f6   :  { %v4841_v32 = vpop.eup %4840  ;;  %v3219_v2 = vadd.f32 0.5, %v3218_v3 }
0x25f7   :  { %v3118_v14 = vmul.f32 0.5, %v4841_v32 }
0x25f8   :  { %3122 = vrot.lane.b32.xlu1 %v4841_v32, %s4895_s5  ;;  %v3220_v7 = vmul.f32 %v3219_v2, %v5870_v44  ;;  %v6024_v44 = vld [vmem:[%s6102_s1 + $0xb8] sm:$0xff] }
0x25f9   :  { %v3119_v15 = vadd.f32 0.5, %v3118_v14 }
0x25fb   :  { %v3120_v57 = vmul.f32 %v3119_v15, %v5874_v52 }
0x2666   :  { %v3223_v4 = vpop.permute.xlu1 %3222 }
0x2667   :  { %v3225_v6 = vmul.f32 %v3223_v4, %v3219_v2 }
0x2669   :  { %3227 = vrot.lane.b32.xlu0 %v3225_v6, %s4895_s5 }
0x266a   :  { %v3123_v17 = vpop.permute.xlu1 %3122 }
0x266b   :  { %v3125_v41 = vmul.f32 %v3123_v17, %v3119_v15 }
0x266d   :  { %3127 = vrot.lane.b32.xlu1 %v3125_v41, %s4895_s5 }
0x26db   :  { %v3228_v19 = vpop.permute.xlu0 %3227 }
0x26dc   :  { %v5945_v21 = vadd.f32 %v3228_v19, %v3220_v7 }
0x26de   :  { %4842 = vtanh.f32 %v5945_v21 }
0x26df   :  { %v3128_v58 = vpop.permute.xlu1 %3127 }
0x26e0   :  { %v5949_v59 = vadd.f32 %v3128_v58, %v3120_v57 }
0x26e2   :  { %4844 = vtanh.f32 %v5949_v59 }
0x26eb   :  { %v4843_v27 = vpop.eup %4842 }
0x26ec   :  { %3233 = vrot.lane.b32.xlu0 %v4843_v27, %s4895_s5 }
0x26ef   :  { %v4845_v29 = vpop.eup %4844 }
0x26f0   :  { %3133 = vrot.lane.b32.xlu1 %v4845_v29, %s4895_s5 }
0x275e   :  { %v3234_v11 = vpop.permute.xlu0 %3233 }
0x275f   :  { %v3236_v38 = vmul.f32 %v3234_v11, %v3219_v2 }
0x2761   :  { %3238 = vrot.lane.b32.xlu0 %v3236_v38, %s4897_s22 }
0x2762   :  { %v3134_v5 = vpop.permute.xlu1 %3133 }
0x2763   :  { %v3136_v39 = vmul.f32 %v3134_v5, %v3119_v15 }
0x2765   :  { %3242 = vrot.lane.b32.xlu1 %v3136_v39, %s4899_s25  ;;  %3341 = vperm.xlu0 %4736, %v5052_v37  }
0x2769   :  { %4737 = vset.pattern.permute.xlu0 %v4912_v34 }
0x27d3   :  { %v3239_v40 = vpop.permute.xlu0 %3238 }
0x27d4   :  { %4639 = vmatmul.mubr.msk.f32.vlgmr.msra.gmra.mxu1 %vm109_vm2, %v3239_v40 }
0x27d5   :  { %4642 = vmatpush3.msra.mxu1 %v5961_v42  ;;  %4657 = vmatprep.mubr.msk.f32.mxu1 %vm4893_vm0, %v4892_v0 }
0x27d6   :  { %4643 = vmatprep.subr.mxu1 %v4892_v0 }
0x27d7   :  { %v3243_v43 = vpop.permute.xlu1 %3242  ;;  %4644 = vmatpush3.msra.mxu1 %v5970_v61 }
0x27d8   :  { %v3245_v45 = vsel %vm109_vm2, %v3239_v40, %v3243_v43  ;;  %4645 = vmatprep.subr.mxu1 %v4892_v0 }
0x27d9   :  { %4628 = vmatmul.mubr.msk.f32.vlgmr.msra.gmra.mxu0 %vm25_vm1, %v3245_v45  ;;  %4646 = vmatpush3.msra.mxu1 %v5979_v16 }
0x27da   :  { %4661 = vmatpush3.msra.mxu0 %v5895_v26  ;;  %4647 = vmatprep.subr.mxu1 %v4892_v0 }
0x27db   :  { %4662 = vmatprep.subr.mxu0 %v4892_v0  ;;  %4648 = vmatpush3.msra.mxu1 %v5988_v62 }
0x27dc   :  { %4663 = vmatpush3.msra.mxu0 %v5904_v28  ;;  %4649 = vmatprep.subr.mxu1 %v4892_v0 }
0x27dd   :  { %4664 = vmatprep.subr.mxu0 %v4892_v0  ;;  %4650 = vmatpush3.msra.mxu1 %v5997_v12 }
0x27de   :  { %4665 = vmatpush3.msra.mxu0 %v5913_v30  ;;  %4651 = vmatprep.subr.mxu1 %v4892_v0 }
0x27df   :  { %4666 = vmatprep.subr.mxu0 %v4892_v0  ;;  %4668 = vmatprep.mubr.msk.f32.mxu0 %vm4893_vm0, %v4892_v0 }
0x27e0   :  { %4667 = vmatpush3.msra.mxu0 %v5923_v31  ;;  %4652 = vmatpush3.msra.mxu1 %v6009_v46  ;;  %v3342_v51 = vpop.permute.xlu0 %3341 }
0x27e1   :  { %4653 = vmatprep.subr.mxu1 %v4892_v0  ;;  %4671 = vmatprep.subr.mxu0 %v4892_v0  ;;  %v3344_v63 = vmul.f32 %v5936_v24, %v3342_v51 }
0x27e2   :  { %4654 = vmatpush3.msra.mxu1 %v6017_v49 }
0x27e3   :  { %4655 = vmatprep.subr.mxu1 %v4892_v0  ;;  %v3345_v52 = vadd.f32 %v3344_v63, %v5298_v20 }
0x27e4   :  { %4656 = vmatpush3.msra.mxu1 %v6024_v44 }
0x27e5   :  { %4690 = vmatprep.subr.mxu1 %v4892_v0 }
0x2894   :  { %v3414_v1 = vpop.f32.mrf.mxu1 }
0x2895   :  { %v3418_v9 = vadd.f32 %v3414_v1, %v3345_v52 }
0x2896   :  { %v4640_v47 = vpop.f32.mrf.mxu1 }
0x2897   :  { %4846 = vtanh.f32 %v3418_v9 }
0x2899   :  { %v3315_v48 = vpop.f32.mrf.mxu0 }
0x289a   :  { %4848 = vtanh.f32 %v3315_v48 }
0x289b   :  { %v4629_v53 = vpop.f32.mrf.mxu0 }
0x28a4   :  { %v4847_v35 = vpop.eup %4846 }
0x28a5   :  { %3424 = vrot.lane.b32.xlu1 %v4847_v35, %s4895_s5  ;;  %v3420_v23 = vmul.f32 0.5, %v4847_v35 }
0x28a7   :  { %v4849_v22 = vpop.eup %4848  ;;  %v3421_v13 = vadd.f32 0.5, %v3420_v23 }
0x28a8   :  { %v3320_v10 = vmul.f32 0.5, %v4849_v22 }
0x28a9   :  { %3324 = vrot.lane.b32.xlu1 %v4849_v22, %s4895_s5  ;;  %v3422_v33 = vmul.f32 %v3421_v13, %v5945_v21 }
0x28aa   :  { %v3321_v20 = vadd.f32 0.5, %v3320_v10 }
0x28ac   :  { %v3322_v54 = vmul.f32 %v3321_v20, %v5949_v59 }
0x2917   :  { %v3425_v26 = vpop.permute.xlu1 %3424 }
0x2918   :  { %v3427_v28 = vmul.f32 %v3425_v26, %v3421_v13 }
0x291a   :  { %3429 = vrot.lane.b32.xlu0 %v3427_v28, %s4895_s5  ;;  %v3746_v28 = vld [vmem:[%s6102_s1 + $0x110] sm:$0xff] }
0x291b   :  { %v3325_v30 = vpop.permute.xlu1 %3324 }
0x291c   :  { %v3327_v31 = vmul.f32 %v3325_v30, %v3321_v20  ;;  %v3744_v30 = vld [vmem:[%s6102_s1 + $0x100] sm:$0xff] }
0x291e   :  { %3329 = vrot.lane.b32.xlu1 %v3327_v31, %s4895_s5  ;;  %v3743_v31 = vld [vmem:[%s6102_s1 + $0xf8] sm:$0xff] }
0x298c   :  { %v3430_v8 = vpop.permute.xlu0 %3429 }
0x298d   :  { %v6035_v25 = vadd.f32 %v3430_v8, %v3422_v33 }
0x298f   :  { %4850 = vtanh.f32 %v6035_v25 }
0x2990   :  { %v3330_v50 = vpop.permute.xlu1 %3329 }
0x2991   :  { %v3332_v55 = vadd.f32 %v3330_v50, %v3322_v54 }
0x2993   :  { %4852 = vtanh.f32 %v3332_v55 }
0x299c   :  { %v4851_v56 = vpop.eup %4850 }
0x299d   :  { %3435 = vrot.lane.b32.xlu0 %v4851_v56, %s4895_s5 }
0x29a0   :  { %v4853_v36 = vpop.eup %4852 }
0x29a1   :  { %3335 = vrot.lane.b32.xlu1 %v4853_v36, %s4895_s5 }
0x2a0f   :  { %v3436_v32 = vpop.permute.xlu0 %3435 }
0x2a10   :  { %v3438_v3 = vmul.f32 %v3436_v32, %v3421_v13 }
0x2a12   :  { %3440 = vrot.lane.b32.xlu0 %v3438_v3, %s4897_s22 }
0x2a13   :  { %v3336_v2 = vpop.permute.xlu1 %3335 }
0x2a14   :  { %v3338_v14 = vmul.f32 %v3336_v2, %v3321_v20  ;;  %v3745_v20 = vld [vmem:[%s6102_s1 + $0x108] sm:$0xff] }
0x2a16   :  { %3543 = vperm.xlu0 %4737, %v5052_v37   ;;  %3444 = vrot.lane.b32.xlu1 %v3338_v14, %s4899_s25 }
0x2a84   :  { %v3441_v4 = vpop.permute.xlu0 %3440 }
0x2a85   :  { %4669 = vmatmul.mubr.msk.f32.vlgmr.msra.gmra.mxu0 %vm109_vm2, %v3441_v4 }
0x2a86   :  { %4672 = vmatpush3.msra.mxu0 %v5961_v42  ;;  %4687 = vmatprep.mubr.msk.f32.mxu0 %vm4893_vm0, %v4892_v0 }
0x2a87   :  { %4673 = vmatprep.subr.mxu0 %v4892_v0 }
0x2a88   :  { %v3445_v6 = vpop.permute.xlu1 %3444  ;;  %4674 = vmatpush3.msra.mxu0 %v5970_v61 }
0x2a89   :  { %v3447_v15 = vsel %vm109_vm2, %v3441_v4, %v3445_v6  ;;  %4675 = vmatprep.subr.mxu0 %v4892_v0 }
0x2a8a   :  { %4658 = vmatmul.mubr.msk.f32.vlgmr.msra.gmra.mxu1 %vm25_vm1, %v3447_v15  ;;  %4676 = vmatpush3.msra.mxu0 %v5979_v16 }
0x2a8b   :  { %4677 = vmatprep.subr.mxu0 %v4892_v0  ;;  %4698 = vmatprep.mubr.msk.f32.mxu1 %vm4893_vm0, %v4892_v0 }
0x2a8c   :  { %4678 = vmatpush3.msra.mxu0 %v5988_v62  ;;  %4691 = vmatpush3.msra.mxu1 %v3746_v28 }
0x2a8d   :  { %4679 = vmatprep.subr.mxu0 %v4892_v0  ;;  %4692 = vmatprep.subr.mxu1 %v4892_v0 }
0x2a8e   :  { %4680 = vmatpush3.msra.mxu0 %v5997_v12  ;;  %4693 = vmatpush3.msra.mxu1 %v3745_v20 }
0x2a8f   :  { %4681 = vmatprep.subr.mxu0 %v4892_v0  ;;  %4694 = vmatprep.subr.mxu1 %v4892_v0 }
0x2a90   :  { %4682 = vmatpush3.msra.mxu0 %v6009_v46  ;;  %4695 = vmatpush3.msra.mxu1 %v3744_v30 }
0x2a91   :  { %4683 = vmatprep.subr.mxu0 %v4892_v0  ;;  %v3544_v37 = vpop.permute.xlu0 %3543  ;;  %4696 = vmatprep.subr.mxu1 %v4892_v0 }
0x2a92   :  { %4684 = vmatpush3.msra.mxu0 %v6017_v49  ;;  %v3546_v17 = vmul.f32 %v5936_v24, %v3544_v37  ;;  %4697 = vmatpush3.msra.mxu1 %v3743_v31 }
0x2a93   :  { %4685 = vmatprep.subr.mxu0 %v4892_v0 }
0x2a94   :  { %4686 = vmatpush3.msra.mxu0 %v6024_v44  ;;  %v3547_v19 = vadd.f32 %v5295_v18, %v3546_v17 }
0x2b45   :  { %v3616_v41 = vpop.f32.mrf.mxu0 }
0x2b46   :  { %v3620_v57 = vadd.f32 %v3616_v41, %v3547_v19 }
0x2b47   :  { %v4670_v7 = vpop.f32.mrf.mxu0 }
0x2b4a   :  { %v3517_v21 = vpop.f32.mrf.mxu1 }
0x2b4b   :  { %4854 = vtanh.f32 %v3517_v21 }
0x2b4c   :  { %v4659_v58 = vpop.f32.mrf.mxu1  ;;  %4856 = vtanh.f32 %v3620_v57 }
0x2b58   :  { %v4855_v59 = vpop.eup %4854 }
0x2b59   :  { %3526 = vrot.lane.b32.xlu1 %v4855_v59, %s4895_s5  ;;  %v4857_v60 = vpop.eup %4856  ;;  %v3522_v27 = vmul.f32 0.5, %v4855_v59 }
0x2b5a   :  { %v3622_v11 = vmul.f32 0.5, %v4857_v60 }
0x2b5b   :  { %v3523_v29 = vadd.f32 0.5, %v3522_v27 }
0x2b5c   :  { %v3623_v5 = vadd.f32 0.5, %v3622_v11 }
0x2b5d   :  { %3626 = vrot.lane.b32.xlu1 %v4857_v60, %s4895_s5  ;;  %v3524_v40 = vmul.f32 %v3523_v29, %v3332_v55 }
0x2b5e   :  { %v3624_v61 = vmul.f32 %v3623_v5, %v6035_v25 }
0x2bcb   :  { %v3527_v38 = vpop.permute.xlu1 %3526 }
0x2bcc   :  { %v3529_v24 = vmul.f32 %v3527_v38, %v3523_v29 }
0x2bce   :  { %3531 = vrot.lane.b32.xlu0 %v3529_v24, %s4895_s5 }
0x2bcf   :  { %v3627_v18 = vpop.permute.xlu1 %3626 }
0x2bd0   :  { %v3629_v39 = vmul.f32 %v3627_v18, %v3623_v5 }
0x2bd2   :  { %3631 = vrot.lane.b32.xlu1 %v3629_v39, %s4895_s5 }
0x2c40   :  { %v3532_v42 = vpop.permute.xlu0 %3531 }
0x2c41   :  { %v3534_v43 = vadd.f32 %v3532_v42, %v3524_v40 }
0x2c43   :  { %4858 = vtanh.f32 %v3534_v43 }
0x2c44   :  { %v3632_v45 = vpop.permute.xlu1 %3631 }
0x2c45   :  { %v3634_v16 = vadd.f32 %v3632_v45, %v3624_v61 }
0x2c47   :  { %4860 = vtanh.f32 %v3634_v16 }
0x2c50   :  { %v4859_v62 = vpop.eup %4858 }
0x2c51   :  { %3537 = vrot.lane.b32.xlu0 %v4859_v62, %s4895_s5 }
0x2c54   :  { %v4861_v12 = vpop.eup %4860 }
0x2c55   :  { %3637 = vrot.lane.b32.xlu1 %v4861_v12, %s4895_s5 }
0x2cc3   :  { %v3538_v46 = vpop.permute.xlu0 %3537 }
0x2cc4   :  { %v3540_v49 = vmul.f32 %v3538_v46, %v3523_v29 }
0x2cc6   :  { %3646 = vrot.lane.b32.xlu1 %v3540_v49, %s4899_s25 }
0x2cc7   :  { %v3638_v44 = vpop.permute.xlu1 %3637 }
0x2cc8   :  { %v3640_v51 = vmul.f32 %v3638_v44, %v3623_v5 }
0x2cca   :  { %3642 = vrot.lane.b32.xlu0 %v3640_v51, %s4897_s22 }
0x2d38   :  { %v3647_v63 = vpop.permute.xlu1 %3646 }
0x2d3c   :  { %v3643_v52 = vpop.permute.xlu0 %3642 }
0x2d3d   :  { %v3649_v1 = vsel %vm109_vm2, %v3643_v52, %v3647_v63 }
0x2d3e   :  { %4688 = vmatmul.mubr.msk.f32.vlgmr.msra.gmra.mxu0 %vm25_vm1, %v3649_v1 }
0x2dfe   :  { %v3719_v9 = vpop.f32.mrf.mxu0 }
0x2dff   :  { %4862 = vtanh.f32 %v3719_v9 }
0x2e00   :  { %v4689_v47 = vpop.f32.mrf.mxu0 }
0x2e0c   :  { %v4863_v48 = vpop.eup %4862 }
0x2e0d   :  { %3728 = vrot.lane.b32.xlu0 %v4863_v48, %s4895_s5  ;;  %v3724_v53 = vmul.f32 0.5, %v4863_v48 }
0x2e0f   :  { %v3725_v35 = vadd.f32 0.5, %v3724_v53 }
0x2e11   :  { %v3726_v13 = vmul.f32 %v3725_v35, %v3534_v43 }
0x2e7f   :  { %v3729_v22 = vpop.permute.xlu0 %3728 }
0x2e80   :  { %v3731_v23 = vmul.f32 %v3729_v22, %v3725_v35 }
0x2e82   :  { %3733 = vrot.lane.b32.xlu1 %v3731_v23, %s4895_s5 }
0x2ef4   :  { %v3734_v10 = vpop.permute.xlu1 %3733 }
0x2ef5   :  { %v3736_v26 = vadd.f32 %v3734_v10, %v3726_v13 }
0x2ef7   :  { %4864 = vtanh.f32 %v3736_v26 }
0x2f04   :  { %v4865_v33 = vpop.eup %4864 }
0x2f05   :  { %3739 = vrot.lane.b32.xlu0 %v4865_v33, %s4895_s5 }
0x2f77   :  { %v3740_v8 = vpop.permute.xlu0 %3739 }
0x2f78   :  { %v3742_v25 = vmul.f32 %v3740_v8, %v3725_v35 }
0x2f7a   :  { %3748 = vrot.lane.b32.xlu1 %v3742_v25, %s4897_s22 }
0x2fec   :  { %v3749_v54 = vpop.permute.xlu1 %3748 }
0x2fed   :  { %4699 = vmatmul.mubr.msk.f32.vlgmr.msra.gmra.mxu1 %vm109_vm2, %v3749_v54 }
0x30ad   :  { %v3818_v50 = vpop.f32.mrf.mxu1 }
0x30ae   :  { %3823 = vst.msk [vmem:[%s6104_s2] sm:$0xff] %vm3822_vm6, %v3818_v50 }
0x30af   :  { %v4700_v55 = vpop.f32.mrf.mxu1 }

</bundles_post_ra>
